<compile_context>
chip_gen: v5e
topology: v5e:2x2
jax: 0.10.0
libtpu: 0.0.40
codegen_flags: <defaults>
</compile_context>

<pallas_src>
import jax
import jax.numpy as jnp
from jax.experimental import pallas as pl
from jax.experimental.pallas import tpu as pltpu


# ----------------------------------------------------------------------------
# Small helpers
# ----------------------------------------------------------------------------
def _round_up(n, m):
    return ((n + m - 1) // m) * m


def _vmem_limit():
    """Generation-aware VMEM limit: ~3/4 of capacity, capped at 100 MiB."""
    cap = 64 * 1024 * 1024
    try:
        info = pltpu.get_tpu_info()
        cap = int(getattr(info, "vmem_capacity_bytes", cap))
    except Exception:
        pass
    return int(min(cap * 3 // 4, 100 * 1024 * 1024))


def _max_chunk(btile, hp, dp):
    """Largest time chunk whose VMEM footprint (single-buffered weights,
    f32 projection scratch, double-buffered bf16 in/out blocks, h/c state)
    fits comfortably under the limit."""
    g4 = 4 * hp
    fixed = (dp + hp) * g4 * 2           # W_ih + W_hh (bf16, single-buffered)
    fixed += 2 * btile * hp * 4          # h / c state
    fixed += 2 * 1024 * 1024             # margin (bias, fc head, misc)
    budget = max(_vmem_limit() - fixed, 1 * 1024 * 1024)
    per_step = btile * (g4 * 4 + 2 * 2 * dp + 2 * 2 * hp)
    return int(max(1, min(budget // per_step, 256)))


def _pick_time_chunk(t_len, max_chunk):
    """Largest divisor of T that is <= max_chunk (amortizes the ~0.35us
    per-grid-step overhead; chunk is a leading block dim -> no (8,128) rule).
    # TODO(synk): prime T falls back to chunk=1 (correct but slow); could pad
    # T with an in-kernel valid-step bound instead."""
    if t_len <= max_chunk:
        return t_len
    best = 1
    for c in range(1, max_chunk + 1):
        if t_len % c == 0:
            best = c
    return best


def _pick_batch_tile(bp):
    """Split the (sublane-padded) batch across the two v7x TensorCores when
    large enough; on single-TC chips the extra tile just iterates."""
    if bp >= 16 and bp % 16 == 0:
        return bp // 2
    return bp


def _sigmoid_via_tanh(x):
    # sigmoid(x) == 0.5 * (1 + tanh(0.5 * x)); one EUP op, no VPU divide.
    return 0.5 * (jnp.tanh(0.5 * x) + 1.0)


# ----------------------------------------------------------------------------
# In-kernel building blocks
# ----------------------------------------------------------------------------
def _load_weights_and_reset(t, wih_hbm, whh_hbm, wih_vmem, whh_vmem,
                            dma_sems, h_sc, c_sc):
    """At the first time step of each batch tile: start the one-shot weight
    DMAs, zero the recurrent state while they fly, then wait."""
    @pl.when(t == 0)
    def _():
        cp_ih = pltpu.make_async_copy(wih_hbm, wih_vmem, dma_sems.at[0])
        cp_hh = pltpu.make_async_copy(whh_hbm, whh_vmem, dma_sems.at[1])
        cp_ih.start()
        cp_hh.start()
        h_sc[...] = jnp.zeros_like(h_sc)
        c_sc[...] = jnp.zeros_like(c_sc)
        cp_ih.wait()
        cp_hh.wait()


def _project_and_recur(x_ref, wih_vmem, whh_vmem, b_ref, proj_sc,
                       h_sc, c_sc, out_ref=None):
    """Fused chunk body: one big input-projection matmul into VMEM scratch,
    then the serial recurrence with register-carried h/c state."""
    chunk, bt, dp = x_ref.shape
    hp = h_sc.shape[-1]

    # (chunk*bt, dp) @ (dp, 4hp) -> full-occupancy MXU matmul, f32 accumulate.
    xf = x_ref[...].reshape(chunk * bt, dp)
    proj_sc[...] = jnp.dot(xf, wih_vmem[...],
                           preferred_element_type=jnp.float32) + b_ref[...]

    def step(s, carry):
        h, c = carry
        row = pl.multiple_of(s * bt, 8)
        # TODO(synk): hold W_hh in MXU weight registers across the chunk
        # (pltpu.matmul_push_rhs / matmul_acc_lhs) to avoid re-streaming the
        # RHS for a tiny-M LHS every step.
        gates = proj_sc[pl.ds(row, bt), :] + jnp.dot(
            h.astype(jnp.bfloat16), whh_vmem[...],
            preferred_element_type=jnp.float32)          # (bt, 4hp) f32
        i_g = _sigmoid_via_tanh(gates[:, 0 * hp:1 * hp])
        f_g = _sigmoid_via_tanh(gates[:, 1 * hp:2 * hp])
        g_g = jnp.tanh(gates[:, 2 * hp:3 * hp])
        o_g = _sigmoid_via_tanh(gates[:, 3 * hp:4 * hp])
        c_new = f_g * c + i_g * g_g
        h_new = o_g * jnp.tanh(c_new)
        if out_ref is not None:
            out_ref[s] = h_new.astype(out_ref.dtype)     # full-vreg bf16 store
        return (h_new, c_new)

    h_f, c_f = jax.lax.fori_loop(0, chunk, step,
                                 (h_sc[...], c_sc[...]),
                                 unroll=chunk <= 32)
    h_sc[...] = h_f
    c_sc[...] = c_f


# ----------------------------------------------------------------------------
# Pallas kernels
# ----------------------------------------------------------------------------
def _lstm_seq_kernel(x_ref, wih_hbm, whh_hbm, b_ref, out_ref,
                     wih_vmem, whh_vmem, dma_sems, proj_sc, h_sc, c_sc):
    """Non-final LSTM layer: emits the bf16 hidden sequence (chunk blocks)."""
    t = pl.program_id(1)
    _load_weights_and_reset(t, wih_hbm, whh_hbm, wih_vmem, whh_vmem,
                            dma_sems, h_sc, c_sc)
    _project_and_recur(x_ref, wih_vmem, whh_vmem, b_ref, proj_sc,
                       h_sc, c_sc, out_ref=out_ref)


def _lstm_last_kernel(x_ref, wih_hbm, whh_hbm, b_ref, fcw_ref, fcb_ref,
                      out_ref, wih_vmem, whh_vmem, dma_sems, proj_sc,
                      h_sc, c_sc):
    """Final LSTM layer fused with the FC head: only fc(h_{T-1}) is written."""
    t = pl.program_id(1)
    _load_weights_and_reset(t, wih_hbm, whh_hbm, wih_vmem, whh_vmem,
                            dma_sems, h_sc, c_sc)
    _project_and_recur(x_ref, wih_vmem, whh_vmem, b_ref, proj_sc,
                       h_sc, c_sc, out_ref=None)

    @pl.when(t == pl.num_programs(1) - 1)
    def _():
        out_ref[...] = (
            jnp.dot(h_sc[...].astype(jnp.bfloat16), fcw_ref[...],
                    preferred_element_type=jnp.float32) + fcb_ref[...]
        ).astype(out_ref.dtype)


# ----------------------------------------------------------------------------
# pallas_call wrappers
# ----------------------------------------------------------------------------
def _lstm_layer_seq(x_tm, wih_t, whh_t, bias, hp, chunk, btile):
    """x_tm: (T, Bp, Dp) bf16 time-major -> hidden sequence (T, Bp, Hp) bf16."""
    t_len, bp, dp = x_tm.shape
    g4 = wih_t.shape[1]
    return pl.pallas_call(
        _lstm_seq_kernel,
        out_shape=jax.ShapeDtypeStruct((t_len, bp, hp), jnp.bfloat16),
        grid_spec=pltpu.PrefetchScalarGridSpec(
            num_scalar_prefetch=0,
            grid=(bp // btile, t_len // chunk),
            in_specs=[
                pl.BlockSpec((chunk, btile, dp), lambda b, t: (t, b, 0)),
                pl.BlockSpec(memory_space=pl.ANY),      # W_ih stays in HBM
                pl.BlockSpec(memory_space=pl.ANY),      # W_hh stays in HBM
                pl.BlockSpec((1, g4), lambda b, t: (0, 0)),
            ],
            out_specs=pl.BlockSpec((chunk, btile, hp), lambda b, t: (t, b, 0)),
            scratch_shapes=[
                pltpu.VMEM(wih_t.shape, wih_t.dtype),   # single-buffered W_ih
                pltpu.VMEM(whh_t.shape, whh_t.dtype),   # single-buffered W_hh
                pltpu.SemaphoreType.DMA((2,)),
                pltpu.VMEM((chunk * btile, g4), jnp.float32),  # fused xproj
                pltpu.VMEM((btile, hp), jnp.float32),   # h state
                pltpu.VMEM((btile, hp), jnp.float32),   # c state
            ],
        ),
        compiler_params=pltpu.CompilerParams(
            dimension_semantics=("parallel", "arbitrary"),
            vmem_limit_bytes=_vmem_limit(),
        ),
    )(x_tm, wih_t, whh_t, bias)


def _lstm_layer_last(x_tm, wih_t, whh_t, bias, fcw_t, fcb, hp, chunk, btile):
    """Final layer + fused FC head: (T, Bp, Dp) -> (Bp, O_pad) f32."""
    t_len, bp, dp = x_tm.shape
    g4 = wih_t.shape[1]
    o_pad = fcw_t.shape[1]
    return pl.pallas_call(
        _lstm_last_kernel,
        out_shape=jax.ShapeDtypeStruct((bp, o_pad), jnp.float32),
        grid_spec=pltpu.PrefetchScalarGridSpec(
            num_scalar_prefetch=0,
            grid=(bp // btile, t_len // chunk),
            in_specs=[
                pl.BlockSpec((chunk, btile, dp), lambda b, t: (t, b, 0)),
                pl.BlockSpec(memory_space=pl.ANY),
                pl.BlockSpec(memory_space=pl.ANY),
                pl.BlockSpec((1, g4), lambda b, t: (0, 0)),
                pl.BlockSpec((hp, o_pad), lambda b, t: (0, 0)),
                pl.BlockSpec((1, o_pad), lambda b, t: (0, 0)),
            ],
            out_specs=pl.BlockSpec((btile, o_pad), lambda b, t: (b, 0)),
            scratch_shapes=[
                pltpu.VMEM(wih_t.shape, wih_t.dtype),
                pltpu.VMEM(whh_t.shape, whh_t.dtype),
                pltpu.SemaphoreType.DMA((2,)),
                pltpu.VMEM((chunk * btile, g4), jnp.float32),
                pltpu.VMEM((btile, hp), jnp.float32),
                pltpu.VMEM((btile, hp), jnp.float32),
            ],
        ),
        compiler_params=pltpu.CompilerParams(
            dimension_semantics=("parallel", "arbitrary"),
            vmem_limit_bytes=_vmem_limit(),
        ),
    )(x_tm, wih_t, whh_t, bias, fcw_t, fcb)


@jax.jit
def _forward_padded(x, kparams):
    """x: (B, T, D_in) batch-first f32 -> (Bp, O_pad) f32 (padded output)."""
    batch, t_len, d_in = x.shape
    wih0, whh0, _ = kparams["lstm"][0]
    dp = wih0.shape[0]                           # lane-padded layer-0 features
    hp = whh0.shape[0]                           # lane-padded hidden size
    bp = _round_up(batch, 8)                     # full-sublane batch
    btile = _pick_batch_tile(bp)
    chunk = _pick_time_chunk(t_len, _max_chunk(btile, hp, max(dp, hp)))

    # Pad batch/features, cast to bf16 (halves transpose traffic), go
    # time-major once for the smallest tensor.
    # TODO(synk): the transpose could be folded into the first kernel by
    # reading batch-first blocks and reordering in-kernel.
    x_p = jnp.zeros((bp, t_len, dp), jnp.bfloat16)
    x_p = x_p.at[:batch, :, :d_in].set(x.astype(jnp.bfloat16))
    h_seq = jnp.transpose(x_p, (1, 0, 2))        # (T, Bp, Dp) bf16

    n_layers = len(kparams["lstm"])
    out = None
    for li, (wih_t, whh_t, bias) in enumerate(kparams["lstm"]):
        if li < n_layers - 1:
            # TODO(synk): inter-layer dropout (training mode) omitted; dropout
            # is identity at inference.
            h_seq = _lstm_layer_seq(h_seq, wih_t, whh_t, bias, hp, chunk, btile)
        else:
            out = _lstm_layer_last(h_seq, wih_t, whh_t, bias,
                                   kparams["fc_w_t"], kparams["fc_b"],
                                   hp, chunk, btile)
    return out


def lstm_model_forward(x, kparams, output_dim):
    """Matches LSTMModel.forward: (B, T, D_in) -> (B, output_dim)."""
    return _forward_padded(x, kparams)[: x.shape[0], :output_dim]


# ----------------------------------------------------------------------------
# Parameter init (mirrors the module's __init__) + kernel-layout preparation
# ----------------------------------------------------------------------------
def init_params(key, input_dim, hidden_dim, layer_num, output_dim):
    """Raw, PyTorch-layout parameters (f32)."""
    xavier = jax.nn.initializers.glorot_normal()
    ortho = jax.nn.initializers.orthogonal()
    lstm = []
    for layer in range(layer_num):
        d_in = input_dim if layer == 0 else hidden_dim
        key, k1, k2 = jax.random.split(key, 3)
        w_ih = xavier(k1, (4 * hidden_dim, d_in), jnp.float32)       # xavier_normal_
        w_hh = ortho(k2, (4 * hidden_dim, hidden_dim), jnp.float32)  # orthogonal_
        b = jnp.zeros((4 * hidden_dim,), jnp.float32)                # b_ih + b_hh = 0
        lstm.append((w_ih, w_hh, b))
    key, k3, k4 = jax.random.split(key, 3)
    bound = 1.0 / (hidden_dim ** 0.5)
    fc_w = jax.random.uniform(k3, (output_dim, hidden_dim), jnp.float32, -bound, bound)
    fc_b = jax.random.uniform(k4, (output_dim,), jnp.float32, -bound, bound)
    return {"lstm": lstm, "fc_w": fc_w, "fc_b": fc_b}


def _pad_gate_cols(w_t, h, hp):
    """(D, 4h) with contiguous (i,f,g,o) column blocks -> (D, 4hp); each gate
    block padded to hp lanes (padded columns are zero)."""
    d = w_t.shape[0]
    out = jnp.zeros((d, 4 * hp), w_t.dtype)
    for k in range(4):
        out = out.at[:, k * hp:k * hp + h].set(w_t[:, k * h:(k + 1) * h])
    return out


def prepare_params(raw, input_dim, hidden_dim):
    """Pad/transpose/cast raw params into the kernel layout (bf16 weights)."""
    h = hidden_dim
    hp = _round_up(h, 128)
    dp = _round_up(input_dim, 128)
    layers = []
    for li, (w_ih, w_hh, b) in enumerate(raw["lstm"]):
        d_in = w_ih.shape[1]
        d_pad = dp if li == 0 else hp
        wih_t = _pad_gate_cols(w_ih.T, h, hp)                      # (d_in, 4hp)
        wih_t = jnp.zeros((d_pad, 4 * hp), wih_t.dtype).at[:d_in].set(wih_t)
        whh_t = _pad_gate_cols(w_hh.T, h, hp)                      # (h, 4hp)
        whh_t = jnp.zeros((hp, 4 * hp), whh_t.dtype).at[:h].set(whh_t)
        bias = _pad_gate_cols(b.reshape(1, -1), h, hp)             # (1, 4hp)
        layers.append((wih_t.astype(jnp.bfloat16),
                       whh_t.astype(jnp.bfloat16),
                       bias.astype(jnp.float32)))
    o_dim = raw["fc_w"].shape[0]
    o_pad = _round_up(o_dim, 128)
    fcw_t = jnp.zeros((hp, o_pad), jnp.float32).at[:h, :o_dim].set(raw["fc_w"].T)
    fcb = jnp.zeros((1, o_pad), jnp.float32).at[0, :o_dim].set(raw["fc_b"])
    return {"lstm": layers,
            "fc_w_t": fcw_t.astype(jnp.bfloat16),
            "fc_b": fcb}


# ----------------------------------------------------------------------------
# Pure-JAX f32 reference (module semantics) for correctness check
# ----------------------------------------------------------------------------
def reference_forward(x, raw):
    batch = x.shape[0]
    h_seq = jnp.transpose(x, (1, 0, 2))
    for (w_ih, w_hh, b) in raw["lstm"]:
        hid = w_hh.shape[1]
        wih_t, whh_t = w_ih.T, w_hh.T

        def step(carry, x_t, wih_t=wih_t, whh_t=whh_t, b=b, hid=hid):
            h, c = carry
            gates = x_t @ wih_t + h @ whh_t + b
            i = jax.nn.sigmoid(gates[:, 0 * hid:1 * hid])
            f = jax.nn.sigmoid(gates[:, 1 * hid:2 * hid])
            g = jnp.tanh(gates[:, 2 * hid:3 * hid])
            o = jax.nn.sigmoid(gates[:, 3 * hid:4 * hid])
            c_new = f * c + i * g
            h_new = o * jnp.tanh(c_new)
            return (h_new, c_new), h_new

        init = (jnp.zeros((batch, hid), jnp.float32),
                jnp.zeros((batch, hid), jnp.float32))
        _, h_seq = jax.lax.scan(step, init, h_seq)
    return h_seq[-1] @ raw["fc_w"].T + raw["fc_b"]


# ----------------------------------------------------------------------------
if __name__ == "__main__":
    # Small shapes consistent with the module's forward.
    B, T = 2, 8
    input_dim, hidden_dim, layer_num, output_dim = 4, 32, 2, 2

    key = jax.random.PRNGKey(0)
    key, kx = jax.random.split(key)
    x = jax.random.normal(kx, (B, T, input_dim), jnp.float32)

    raw_params = init_params(key, input_dim, hidden_dim, layer_num, output_dim)
    kparams = prepare_params(raw_params, input_dim, hidden_dim)

    out = lstm_model_forward(x, kparams, output_dim)
    out = jax.block_until_ready(out)

    ref = reference_forward(x, raw_params)
    assert out.shape == (B, output_dim)
    # bf16 MXU weights / bf16 inter-layer activations vs f32 reference.
    assert jnp.allclose(out, ref, atol=3e-2, rtol=3e-2), (out, ref)

    print("KERNEL_OK")
</pallas_src>

<mosaic_0001>
module attributes {stable_mosaic.version = 11 : i64} {
  func.func @_lstm_seq_kernel(%arg0: i32, %arg1: i32, %arg2: memref<8x8x128xbf16, #tpu.memory_space<vmem>>, %arg3: memref<128x512xbf16, #tpu.memory_space<any>>, %arg4: memref<128x512xbf16, #tpu.memory_space<any>>, %arg5: memref<1x512xf32, #tpu.memory_space<vmem>>, %arg6: memref<8x8x128xbf16, #tpu.memory_space<vmem>>, %arg7: memref<128x512xbf16, #tpu.memory_space<vmem>>, %arg8: memref<128x512xbf16, #tpu.memory_space<vmem>>, %arg9: memref<2x!tpu.dma_semaphore, #tpu.memory_space<semaphore_mem>>, %arg10: memref<64x512xf32, #tpu.memory_space<vmem>>, %arg11: memref<8x128xf32, #tpu.memory_space<vmem>>, %arg12: memref<8x128xf32, #tpu.memory_space<vmem>>) attributes {dimension_semantics = [#tpu.dimension_semantics<parallel>, #tpu.dimension_semantics<arbitrary>], iteration_bounds = array<i64: 1, 1>, scalar_prefetch = 0 : i64, scratch_operands = 6 : i64, tpu.core_type = #tpu.core_type<tc>, window_params = [{transform_indices = @transform_0, window_bounds = array<i64: 8, 8, 128>}, {}, {}, {pipeline_mode = #tpu.pipeline_mode<synchronous>, transform_indices = @transform_3, window_bounds = array<i64: 1, 512>}, {transform_indices = @transform_4, window_bounds = array<i64: 8, 8, 128>}]} {
    %c0_i32 = arith.constant 0 : i32
    %0 = arith.cmpi eq, %arg1, %c0_i32 : i32
    %1 = arith.extui %0 : i1 to i32
    %c0_i32_0 = arith.constant 0 : i32
    %2 = arith.cmpi ne, %1, %c0_i32_0 : i32
    scf.if %2 {
      %c0_i32_146 = arith.constant 0 : i32
      %367 = tpu.memref_slice %arg9[%c0_i32_146] : memref<2x!tpu.dma_semaphore, #tpu.memory_space<semaphore_mem>> -> memref<1x!tpu.dma_semaphore, #tpu.memory_space<semaphore_mem>>
      %368 = tpu.memref_squeeze %367 : memref<1x!tpu.dma_semaphore, #tpu.memory_space<semaphore_mem>> -> memref<!tpu.dma_semaphore, #tpu.memory_space<semaphore_mem>>
      tpu.enqueue_dma source(%arg3 : memref<128x512xbf16, #tpu.memory_space<any>>) target(%arg7 : memref<128x512xbf16, #tpu.memory_space<vmem>>) target_semaphore(%368 : memref<!tpu.dma_semaphore, #tpu.memory_space<semaphore_mem>>)
      %c1_i32_147 = arith.constant 1 : i32
      %369 = tpu.memref_slice %arg9[%c1_i32_147] : memref<2x!tpu.dma_semaphore, #tpu.memory_space<semaphore_mem>> -> memref<1x!tpu.dma_semaphore, #tpu.memory_space<semaphore_mem>>
      %370 = tpu.memref_squeeze %369 : memref<1x!tpu.dma_semaphore, #tpu.memory_space<semaphore_mem>> -> memref<!tpu.dma_semaphore, #tpu.memory_space<semaphore_mem>>
      tpu.enqueue_dma source(%arg4 : memref<128x512xbf16, #tpu.memory_space<any>>) target(%arg8 : memref<128x512xbf16, #tpu.memory_space<vmem>>) target_semaphore(%370 : memref<!tpu.dma_semaphore, #tpu.memory_space<semaphore_mem>>)
      %cst_148 = arith.constant 0.000000e+00 : f32
      %371 = vector.broadcast %cst_148 : f32 to vector<8x128xf32>
      %c0_149 = arith.constant 0 : index
      %c0_150 = arith.constant 0 : index
      %372 = vector.load %arg11[%c0_149, %c0_150] : memref<8x128xf32, #tpu.memory_space<vmem>>, vector<8x128xf32>
      tpu.vector_store %arg11[%c0_149, %c0_150], %371 {strides = array<i32>} : memref<8x128xf32, #tpu.memory_space<vmem>>, vector<8x128xf32>,
      %cst_151 = arith.constant 0.000000e+00 : f32
      %373 = vector.broadcast %cst_151 : f32 to vector<8x128xf32>
      %c0_152 = arith.constant 0 : index
      %c0_153 = arith.constant 0 : index
      %374 = vector.load %arg12[%c0_152, %c0_153] : memref<8x128xf32, #tpu.memory_space<vmem>>, vector<8x128xf32>
      tpu.vector_store %arg12[%c0_152, %c0_153], %373 {strides = array<i32>} : memref<8x128xf32, #tpu.memory_space<vmem>>, vector<8x128xf32>,
      %c0_i32_154 = arith.constant 0 : i32
      %375 = tpu.memref_slice %arg9[%c0_i32_154] : memref<2x!tpu.dma_semaphore, #tpu.memory_space<semaphore_mem>> -> memref<1x!tpu.dma_semaphore, #tpu.memory_space<semaphore_mem>>
      %376 = tpu.memref_squeeze %375 : memref<1x!tpu.dma_semaphore, #tpu.memory_space<semaphore_mem>> -> memref<!tpu.dma_semaphore, #tpu.memory_space<semaphore_mem>>
      tpu.wait_dma2 semaphore(%376 : memref<!tpu.dma_semaphore, #tpu.memory_space<semaphore_mem>>) src(%arg3 : memref<128x512xbf16, #tpu.memory_space<any>>) dst(%arg7 : memref<128x512xbf16, #tpu.memory_space<vmem>>)
      %c1_i32_155 = arith.constant 1 : i32
      %377 = tpu.memref_slice %arg9[%c1_i32_155] : memref<2x!tpu.dma_semaphore, #tpu.memory_space<semaphore_mem>> -> memref<1x!tpu.dma_semaphore, #tpu.memory_space<semaphore_mem>>
      %378 = tpu.memref_squeeze %377 : memref<1x!tpu.dma_semaphore, #tpu.memory_space<semaphore_mem>> -> memref<!tpu.dma_semaphore, #tpu.memory_space<semaphore_mem>>
      tpu.wait_dma2 semaphore(%378 : memref<!tpu.dma_semaphore, #tpu.memory_space<semaphore_mem>>) src(%arg4 : memref<128x512xbf16, #tpu.memory_space<any>>) dst(%arg8 : memref<128x512xbf16, #tpu.memory_space<vmem>>)
    } else {
    }
    %c0 = arith.constant 0 : index
    %c0_1 = arith.constant 0 : index
    %c0_2 = arith.constant 0 : index
    %3 = vector.load %arg2[%c0, %c0_1, %c0_2] : memref<8x8x128xbf16, #tpu.memory_space<vmem>>, vector<8x8x128xbf16>
    %4 = vector.shape_cast %3 : vector<8x8x128xbf16> to vector<64x128xbf16>
    %c0_3 = arith.constant 0 : index
    %c0_4 = arith.constant 0 : index
    %5 = vector.load %arg7[%c0_3, %c0_4] : memref<128x512xbf16, #tpu.memory_space<vmem>>, vector<128x512xbf16>
    %cst = arith.constant dense<0.000000e+00> : vector<64x512xf32>
    %6 = tpu.matmul %4, %5, %cst {dimension_numbers = #tpu.dot_dimension_numbers<[1], [0], [0], [1], [0, 0, 1, 1], [], []>} : vector<64x128xbf16>, vector<128x512xbf16>, vector<64x512xf32> -> vector<64x512xf32>
    %c0_5 = arith.constant 0 : index
    %c0_6 = arith.constant 0 : index
    %7 = vector.load %arg5[%c0_5, %c0_6] : memref<1x512xf32, #tpu.memory_space<vmem>>, vector<1x512xf32>
    %8 = vector.broadcast %7 : vector<1x512xf32> to vector<64x512xf32>
    %9 = arith.addf %6, %8 : vector<64x512xf32>
    %c0_7 = arith.constant 0 : index
    %c0_8 = arith.constant 0 : index
    %10 = vector.load %arg10[%c0_7, %c0_8] : memref<64x512xf32, #tpu.memory_space<vmem>>, vector<64x512xf32>
    tpu.vector_store %arg10[%c0_7, %c0_8], %9 {strides = array<i32>} : memref<64x512xf32, #tpu.memory_space<vmem>>, vector<64x512xf32>,
    %c0_9 = arith.constant 0 : index
    %c0_10 = arith.constant 0 : index
    %11 = vector.load %arg11[%c0_9, %c0_10] : memref<8x128xf32, #tpu.memory_space<vmem>>, vector<8x128xf32>
    %c0_11 = arith.constant 0 : index
    %c0_12 = arith.constant 0 : index
    %12 = vector.load %arg12[%c0_11, %c0_12] : memref<8x128xf32, #tpu.memory_space<vmem>>, vector<8x128xf32>
    %c0_i32_13 = arith.constant 0 : i32
    %c8_i32 = arith.constant 8 : i32
    %13 = arith.muli %c0_i32_13, %c8_i32 : i32
    %14 = tpu.assume_multiple %13, 8 : i32
    %15 = arith.index_cast %14 : i32 to index
    %c0_14 = arith.constant 0 : index
    %16 = vector.load %arg10[%15, %c0_14] : memref<64x512xf32, #tpu.memory_space<vmem>>, vector<8x512xf32>
    %17 = arith.truncf %11 : vector<8x128xf32> to vector<8x128xbf16>
    %c0_15 = arith.constant 0 : index
    %c0_16 = arith.constant 0 : index
    %18 = vector.load %arg8[%c0_15, %c0_16] : memref<128x512xbf16, #tpu.memory_space<vmem>>, vector<128x512xbf16>
    %cst_17 = arith.constant dense<0.000000e+00> : vector<8x512xf32>
    %19 = tpu.matmul %17, %18, %cst_17 {dimension_numbers = #tpu.dot_dimension_numbers<[1], [0], [0], [1], [0, 0, 1, 1], [], []>} : vector<8x128xbf16>, vector<128x512xbf16>, vector<8x512xf32> -> vector<8x512xf32>
    %20 = arith.addf %16, %19 : vector<8x512xf32>
    %21 = vector.extract_strided_slice %20 {offsets = [0, 0], sizes = [8, 128], strides = [1, 1]} : vector<8x512xf32> to vector<8x128xf32>
    %cst_18 = arith.constant 5.000000e-01 : f32
    %22 = vector.broadcast %cst_18 : f32 to vector<8x128xf32>
    %23 = arith.mulf %22, %21 : vector<8x128xf32>
    %24 = math.tanh %23 : vector<8x128xf32>
    %cst_19 = arith.constant 1.000000e+00 : f32
    %25 = vector.broadcast %cst_19 : f32 to vector<8x128xf32>
    %26 = arith.addf %24, %25 : vector<8x128xf32>
    %cst_20 = arith.constant 5.000000e-01 : f32
    %27 = vector.broadcast %cst_20 : f32 to vector<8x128xf32>
    %28 = arith.mulf %27, %26 : vector<8x128xf32>
    %29 = vector.extract_strided_slice %20 {offsets = [0, 128], sizes = [8, 128], strides = [1, 1]} : vector<8x512xf32> to vector<8x128xf32>
    %cst_21 = arith.constant 5.000000e-01 : f32
    %30 = vector.broadcast %cst_21 : f32 to vector<8x128xf32>
    %31 = arith.mulf %30, %29 : vector<8x128xf32>
    %32 = math.tanh %31 : vector<8x128xf32>
    %cst_22 = arith.constant 1.000000e+00 : f32
    %33 = vector.broadcast %cst_22 : f32 to vector<8x128xf32>
    %34 = arith.addf %32, %33 : vector<8x128xf32>
    %cst_23 = arith.constant 5.000000e-01 : f32
    %35 = vector.broadcast %cst_23 : f32 to vector<8x128xf32>
    %36 = arith.mulf %35, %34 : vector<8x128xf32>
    %37 = vector.extract_strided_slice %20 {offsets = [0, 256], sizes = [8, 128], strides = [1, 1]} : vector<8x512xf32> to vector<8x128xf32>
    %38 = math.tanh %37 : vector<8x128xf32>
    %39 = vector.extract_strided_slice %20 {offsets = [0, 384], sizes = [8, 128], strides = [1, 1]} : vector<8x512xf32> to vector<8x128xf32>
    %cst_24 = arith.constant 5.000000e-01 : f32
    %40 = vector.broadcast %cst_24 : f32 to vector<8x128xf32>
    %41 = arith.mulf %40, %39 : vector<8x128xf32>
    %42 = math.tanh %41 : vector<8x128xf32>
    %cst_25 = arith.constant 1.000000e+00 : f32
    %43 = vector.broadcast %cst_25 : f32 to vector<8x128xf32>
    %44 = arith.addf %42, %43 : vector<8x128xf32>
    %cst_26 = arith.constant 5.000000e-01 : f32
    %45 = vector.broadcast %cst_26 : f32 to vector<8x128xf32>
    %46 = arith.mulf %45, %44 : vector<8x128xf32>
    %47 = arith.mulf %36, %12 : vector<8x128xf32>
    %48 = arith.mulf %28, %38 : vector<8x128xf32>
    %49 = arith.addf %47, %48 : vector<8x128xf32>
    %50 = math.tanh %49 : vector<8x128xf32>
    %51 = arith.mulf %46, %50 : vector<8x128xf32>
    %52 = arith.truncf %51 : vector<8x128xf32> to vector<8x128xbf16>
    %53 = arith.index_cast %c0_i32_13 : i32 to index
    %c0_27 = arith.constant 0 : index
    %c0_28 = arith.constant 0 : index
    %54 = vector.load %arg6[%53, %c0_27, %c0_28] : memref<8x8x128xbf16, #tpu.memory_space<vmem>>, vector<1x8x128xbf16>
    %55 = vector.shape_cast %54 : vector<1x8x128xbf16> to vector<8x128xbf16>
    %56 = vector.shape_cast %52 : vector<8x128xbf16> to vector<1x8x128xbf16>
    tpu.vector_store %arg6[%53, %c0_27, %c0_28], %56 {strides = array<i32>} : memref<8x8x128xbf16, #tpu.memory_space<vmem>>, vector<1x8x128xbf16>,
    %c1_i32 = arith.constant 1 : i32
    %c8_i32_29 = arith.constant 8 : i32
    %57 = arith.muli %c1_i32, %c8_i32_29 : i32
    %58 = tpu.assume_multiple %57, 8 : i32
    %59 = arith.index_cast %58 : i32 to index
    %c0_30 = arith.constant 0 : index
    %60 = vector.load %arg10[%59, %c0_30] : memref<64x512xf32, #tpu.memory_space<vmem>>, vector<8x512xf32>
    %61 = arith.truncf %51 : vector<8x128xf32> to vector<8x128xbf16>
    %c0_31 = arith.constant 0 : index
    %c0_32 = arith.constant 0 : index
    %62 = vector.load %arg8[%c0_31, %c0_32] : memref<128x512xbf16, #tpu.memory_space<vmem>>, vector<128x512xbf16>
    %cst_33 = arith.constant dense<0.000000e+00> : vector<8x512xf32>
    %63 = tpu.matmul %61, %62, %cst_33 {dimension_numbers = #tpu.dot_dimension_numbers<[1], [0], [0], [1], [0, 0, 1, 1], [], []>} : vector<8x128xbf16>, vector<128x512xbf16>, vector<8x512xf32> -> vector<8x512xf32>
    %64 = arith.addf %60, %63 : vector<8x512xf32>
    %65 = vector.extract_strided_slice %64 {offsets = [0, 0], sizes = [8, 128], strides = [1, 1]} : vector<8x512xf32> to vector<8x128xf32>
    %cst_34 = arith.constant 5.000000e-01 : f32
    %66 = vector.broadcast %cst_34 : f32 to vector<8x128xf32>
    %67 = arith.mulf %66, %65 : vector<8x128xf32>
    %68 = math.tanh %67 : vector<8x128xf32>
    %cst_35 = arith.constant 1.000000e+00 : f32
    %69 = vector.broadcast %cst_35 : f32 to vector<8x128xf32>
    %70 = arith.addf %68, %69 : vector<8x128xf32>
    %cst_36 = arith.constant 5.000000e-01 : f32
    %71 = vector.broadcast %cst_36 : f32 to vector<8x128xf32>
    %72 = arith.mulf %71, %70 : vector<8x128xf32>
    %73 = vector.extract_strided_slice %64 {offsets = [0, 128], sizes = [8, 128], strides = [1, 1]} : vector<8x512xf32> to vector<8x128xf32>
    %cst_37 = arith.constant 5.000000e-01 : f32
    %74 = vector.broadcast %cst_37 : f32 to vector<8x128xf32>
    %75 = arith.mulf %74, %73 : vector<8x128xf32>
    %76 = math.tanh %75 : vector<8x128xf32>
    %cst_38 = arith.constant 1.000000e+00 : f32
    %77 = vector.broadcast %cst_38 : f32 to vector<8x128xf32>
    %78 = arith.addf %76, %77 : vector<8x128xf32>
    %cst_39 = arith.constant 5.000000e-01 : f32
    %79 = vector.broadcast %cst_39 : f32 to vector<8x128xf32>
    %80 = arith.mulf %79, %78 : vector<8x128xf32>
    %81 = vector.extract_strided_slice %64 {offsets = [0, 256], sizes = [8, 128], strides = [1, 1]} : vector<8x512xf32> to vector<8x128xf32>
    %82 = math.tanh %81 : vector<8x128xf32>
    %83 = vector.extract_strided_slice %64 {offsets = [0, 384], sizes = [8, 128], strides = [1, 1]} : vector<8x512xf32> to vector<8x128xf32>
    %cst_40 = arith.constant 5.000000e-01 : f32
    %84 = vector.broadcast %cst_40 : f32 to vector<8x128xf32>
    %85 = arith.mulf %84, %83 : vector<8x128xf32>
    %86 = math.tanh %85 : vector<8x128xf32>
    %cst_41 = arith.constant 1.000000e+00 : f32
    %87 = vector.broadcast %cst_41 : f32 to vector<8x128xf32>
    %88 = arith.addf %86, %87 : vector<8x128xf32>
    %cst_42 = arith.constant 5.000000e-01 : f32
    %89 = vector.broadcast %cst_42 : f32 to vector<8x128xf32>
    %90 = arith.mulf %89, %88 : vector<8x128xf32>
    %91 = arith.mulf %80, %49 : vector<8x128xf32>
    %92 = arith.mulf %72, %82 : vector<8x128xf32>
    %93 = arith.addf %91, %92 : vector<8x128xf32>
    %94 = math.tanh %93 : vector<8x128xf32>
    %95 = arith.mulf %90, %94 : vector<8x128xf32>
    %96 = arith.truncf %95 : vector<8x128xf32> to vector<8x128xbf16>
    %97 = arith.index_cast %c1_i32 : i32 to index
    %c0_43 = arith.constant 0 : index
    %c0_44 = arith.constant 0 : index
    %98 = vector.load %arg6[%97, %c0_43, %c0_44] : memref<8x8x128xbf16, #tpu.memory_space<vmem>>, vector<1x8x128xbf16>
    %99 = vector.shape_cast %98 : vector<1x8x128xbf16> to vector<8x128xbf16>
    %100 = vector.shape_cast %96 : vector<8x128xbf16> to vector<1x8x128xbf16>
    tpu.vector_store %arg6[%97, %c0_43, %c0_44], %100 {strides = array<i32>} : memref<8x8x128xbf16, #tpu.memory_space<vmem>>, vector<1x8x128xbf16>,
    %c2_i32 = arith.constant 2 : i32
    %c8_i32_45 = arith.constant 8 : i32
    %101 = arith.muli %c2_i32, %c8_i32_45 : i32
    %102 = tpu.assume_multiple %101, 8 : i32
    %103 = arith.index_cast %102 : i32 to index
    %c0_46 = arith.constant 0 : index
    %104 = vector.load %arg10[%103, %c0_46] : memref<64x512xf32, #tpu.memory_space<vmem>>, vector<8x512xf32>
    %105 = arith.truncf %95 : vector<8x128xf32> to vector<8x128xbf16>
    %c0_47 = arith.constant 0 : index
    %c0_48 = arith.constant 0 : index
    %106 = vector.load %arg8[%c0_47, %c0_48] : memref<128x512xbf16, #tpu.memory_space<vmem>>, vector<128x512xbf16>
    %cst_49 = arith.constant dense<0.000000e+00> : vector<8x512xf32>
    %107 = tpu.matmul %105, %106, %cst_49 {dimension_numbers = #tpu.dot_dimension_numbers<[1], [0], [0], [1], [0, 0, 1, 1], [], []>} : vector<8x128xbf16>, vector<128x512xbf16>, vector<8x512xf32> -> vector<8x512xf32>
    %108 = arith.addf %104, %107 : vector<8x512xf32>
    %109 = vector.extract_strided_slice %108 {offsets = [0, 0], sizes = [8, 128], strides = [1, 1]} : vector<8x512xf32> to vector<8x128xf32>
    %cst_50 = arith.constant 5.000000e-01 : f32
    %110 = vector.broadcast %cst_50 : f32 to vector<8x128xf32>
    %111 = arith.mulf %110, %109 : vector<8x128xf32>
    %112 = math.tanh %111 : vector<8x128xf32>
    %cst_51 = arith.constant 1.000000e+00 : f32
    %113 = vector.broadcast %cst_51 : f32 to vector<8x128xf32>
    %114 = arith.addf %112, %113 : vector<8x128xf32>
    %cst_52 = arith.constant 5.000000e-01 : f32
    %115 = vector.broadcast %cst_52 : f32 to vector<8x128xf32>
    %116 = arith.mulf %115, %114 : vector<8x128xf32>
    %117 = vector.extract_strided_slice %108 {offsets = [0, 128], sizes = [8, 128], strides = [1, 1]} : vector<8x512xf32> to vector<8x128xf32>
    %cst_53 = arith.constant 5.000000e-01 : f32
    %118 = vector.broadcast %cst_53 : f32 to vector<8x128xf32>
    %119 = arith.mulf %118, %117 : vector<8x128xf32>
    %120 = math.tanh %119 : vector<8x128xf32>
    %cst_54 = arith.constant 1.000000e+00 : f32
    %121 = vector.broadcast %cst_54 : f32 to vector<8x128xf32>
    %122 = arith.addf %120, %121 : vector<8x128xf32>
    %cst_55 = arith.constant 5.000000e-01 : f32
    %123 = vector.broadcast %cst_55 : f32 to vector<8x128xf32>
    %124 = arith.mulf %123, %122 : vector<8x128xf32>
    %125 = vector.extract_strided_slice %108 {offsets = [0, 256], sizes = [8, 128], strides = [1, 1]} : vector<8x512xf32> to vector<8x128xf32>
    %126 = math.tanh %125 : vector<8x128xf32>
    %127 = vector.extract_strided_slice %108 {offsets = [0, 384], sizes = [8, 128], strides = [1, 1]} : vector<8x512xf32> to vector<8x128xf32>
    %cst_56 = arith.constant 5.000000e-01 : f32
    %128 = vector.broadcast %cst_56 : f32 to vector<8x128xf32>
    %129 = arith.mulf %128, %127 : vector<8x128xf32>
    %130 = math.tanh %129 : vector<8x128xf32>
    %cst_57 = arith.constant 1.000000e+00 : f32
    %131 = vector.broadcast %cst_57 : f32 to vector<8x128xf32>
    %132 = arith.addf %130, %131 : vector<8x128xf32>
    %cst_58 = arith.constant 5.000000e-01 : f32
    %133 = vector.broadcast %cst_58 : f32 to vector<8x128xf32>
    %134 = arith.mulf %133, %132 : vector<8x128xf32>
    %135 = arith.mulf %124, %93 : vector<8x128xf32>
    %136 = arith.mulf %116, %126 : vector<8x128xf32>
    %137 = arith.addf %135, %136 : vector<8x128xf32>
    %138 = math.tanh %137 : vector<8x128xf32>
    %139 = arith.mulf %134, %138 : vector<8x128xf32>
    %140 = arith.truncf %139 : vector<8x128xf32> to vector<8x128xbf16>
    %141 = arith.index_cast %c2_i32 : i32 to index
    %c0_59 = arith.constant 0 : index
    %c0_60 = arith.constant 0 : index
    %142 = vector.load %arg6[%141, %c0_59, %c0_60] : memref<8x8x128xbf16, #tpu.memory_space<vmem>>, vector<1x8x128xbf16>
    %143 = vector.shape_cast %142 : vector<1x8x128xbf16> to vector<8x128xbf16>
    %144 = vector.shape_cast %140 : vector<8x128xbf16> to vector<1x8x128xbf16>
    tpu.vector_store %arg6[%141, %c0_59, %c0_60], %144 {strides = array<i32>} : memref<8x8x128xbf16, #tpu.memory_space<vmem>>, vector<1x8x128xbf16>,
    %c3_i32 = arith.constant 3 : i32
    %c8_i32_61 = arith.constant 8 : i32
    %145 = arith.muli %c3_i32, %c8_i32_61 : i32
    %146 = tpu.assume_multiple %145, 8 : i32
    %147 = arith.index_cast %146 : i32 to index
    %c0_62 = arith.constant 0 : index
    %148 = vector.load %arg10[%147, %c0_62] : memref<64x512xf32, #tpu.memory_space<vmem>>, vector<8x512xf32>
    %149 = arith.truncf %139 : vector<8x128xf32> to vector<8x128xbf16>
    %c0_63 = arith.constant 0 : index
    %c0_64 = arith.constant 0 : index
    %150 = vector.load %arg8[%c0_63, %c0_64] : memref<128x512xbf16, #tpu.memory_space<vmem>>, vector<128x512xbf16>
    %cst_65 = arith.constant dense<0.000000e+00> : vector<8x512xf32>
    %151 = tpu.matmul %149, %150, %cst_65 {dimension_numbers = #tpu.dot_dimension_numbers<[1], [0], [0], [1], [0, 0, 1, 1], [], []>} : vector<8x128xbf16>, vector<128x512xbf16>, vector<8x512xf32> -> vector<8x512xf32>
    %152 = arith.addf %148, %151 : vector<8x512xf32>
    %153 = vector.extract_strided_slice %152 {offsets = [0, 0], sizes = [8, 128], strides = [1, 1]} : vector<8x512xf32> to vector<8x128xf32>
    %cst_66 = arith.constant 5.000000e-01 : f32
    %154 = vector.broadcast %cst_66 : f32 to vector<8x128xf32>
    %155 = arith.mulf %154, %153 : vector<8x128xf32>
    %156 = math.tanh %155 : vector<8x128xf32>
    %cst_67 = arith.constant 1.000000e+00 : f32
    %157 = vector.broadcast %cst_67 : f32 to vector<8x128xf32>
    %158 = arith.addf %156, %157 : vector<8x128xf32>
    %cst_68 = arith.constant 5.000000e-01 : f32
    %159 = vector.broadcast %cst_68 : f32 to vector<8x128xf32>
    %160 = arith.mulf %159, %158 : vector<8x128xf32>
    %161 = vector.extract_strided_slice %152 {offsets = [0, 128], sizes = [8, 128], strides = [1, 1]} : vector<8x512xf32> to vector<8x128xf32>
    %cst_69 = arith.constant 5.000000e-01 : f32
    %162 = vector.broadcast %cst_69 : f32 to vector<8x128xf32>
    %163 = arith.mulf %162, %161 : vector<8x128xf32>
    %164 = math.tanh %163 : vector<8x128xf32>
    %cst_70 = arith.constant 1.000000e+00 : f32
    %165 = vector.broadcast %cst_70 : f32 to vector<8x128xf32>
    %166 = arith.addf %164, %165 : vector<8x128xf32>
    %cst_71 = arith.constant 5.000000e-01 : f32
    %167 = vector.broadcast %cst_71 : f32 to vector<8x128xf32>
    %168 = arith.mulf %167, %166 : vector<8x128xf32>
    %169 = vector.extract_strided_slice %152 {offsets = [0, 256], sizes = [8, 128], strides = [1, 1]} : vector<8x512xf32> to vector<8x128xf32>
    %170 = math.tanh %169 : vector<8x128xf32>
    %171 = vector.extract_strided_slice %152 {offsets = [0, 384], sizes = [8, 128], strides = [1, 1]} : vector<8x512xf32> to vector<8x128xf32>
    %cst_72 = arith.constant 5.000000e-01 : f32
    %172 = vector.broadcast %cst_72 : f32 to vector<8x128xf32>
    %173 = arith.mulf %172, %171 : vector<8x128xf32>
    %174 = math.tanh %173 : vector<8x128xf32>
    %cst_73 = arith.constant 1.000000e+00 : f32
    %175 = vector.broadcast %cst_73 : f32 to vector<8x128xf32>
    %176 = arith.addf %174, %175 : vector<8x128xf32>
    %cst_74 = arith.constant 5.000000e-01 : f32
    %177 = vector.broadcast %cst_74 : f32 to vector<8x128xf32>
    %178 = arith.mulf %177, %176 : vector<8x128xf32>
    %179 = arith.mulf %168, %137 : vector<8x128xf32>
    %180 = arith.mulf %160, %170 : vector<8x128xf32>
    %181 = arith.addf %179, %180 : vector<8x128xf32>
    %182 = math.tanh %181 : vector<8x128xf32>
    %183 = arith.mulf %178, %182 : vector<8x128xf32>
    %184 = arith.truncf %183 : vector<8x128xf32> to vector<8x128xbf16>
    %185 = arith.index_cast %c3_i32 : i32 to index
    %c0_75 = arith.constant 0 : index
    %c0_76 = arith.constant 0 : index
    %186 = vector.load %arg6[%185, %c0_75, %c0_76] : memref<8x8x128xbf16, #tpu.memory_space<vmem>>, vector<1x8x128xbf16>
    %187 = vector.shape_cast %186 : vector<1x8x128xbf16> to vector<8x128xbf16>
    %188 = vector.shape_cast %184 : vector<8x128xbf16> to vector<1x8x128xbf16>
    tpu.vector_store %arg6[%185, %c0_75, %c0_76], %188 {strides = array<i32>} : memref<8x8x128xbf16, #tpu.memory_space<vmem>>, vector<1x8x128xbf16>,
    %c4_i32 = arith.constant 4 : i32
    %c8_i32_77 = arith.constant 8 : i32
    %189 = arith.muli %c4_i32, %c8_i32_77 : i32
    %190 = tpu.assume_multiple %189, 8 : i32
    %191 = arith.index_cast %190 : i32 to index
    %c0_78 = arith.constant 0 : index
    %192 = vector.load %arg10[%191, %c0_78] : memref<64x512xf32, #tpu.memory_space<vmem>>, vector<8x512xf32>
    %193 = arith.truncf %183 : vector<8x128xf32> to vector<8x128xbf16>
    %c0_79 = arith.constant 0 : index
    %c0_80 = arith.constant 0 : index
    %194 = vector.load %arg8[%c0_79, %c0_80] : memref<128x512xbf16, #tpu.memory_space<vmem>>, vector<128x512xbf16>
    %cst_81 = arith.constant dense<0.000000e+00> : vector<8x512xf32>
    %195 = tpu.matmul %193, %194, %cst_81 {dimension_numbers = #tpu.dot_dimension_numbers<[1], [0], [0], [1], [0, 0, 1, 1], [], []>} : vector<8x128xbf16>, vector<128x512xbf16>, vector<8x512xf32> -> vector<8x512xf32>
    %196 = arith.addf %192, %195 : vector<8x512xf32>
    %197 = vector.extract_strided_slice %196 {offsets = [0, 0], sizes = [8, 128], strides = [1, 1]} : vector<8x512xf32> to vector<8x128xf32>
    %cst_82 = arith.constant 5.000000e-01 : f32
    %198 = vector.broadcast %cst_82 : f32 to vector<8x128xf32>
    %199 = arith.mulf %198, %197 : vector<8x128xf32>
    %200 = math.tanh %199 : vector<8x128xf32>
    %cst_83 = arith.constant 1.000000e+00 : f32
    %201 = vector.broadcast %cst_83 : f32 to vector<8x128xf32>
    %202 = arith.addf %200, %201 : vector<8x128xf32>
    %cst_84 = arith.constant 5.000000e-01 : f32
    %203 = vector.broadcast %cst_84 : f32 to vector<8x128xf32>
    %204 = arith.mulf %203, %202 : vector<8x128xf32>
    %205 = vector.extract_strided_slice %196 {offsets = [0, 128], sizes = [8, 128], strides = [1, 1]} : vector<8x512xf32> to vector<8x128xf32>
    %cst_85 = arith.constant 5.000000e-01 : f32
    %206 = vector.broadcast %cst_85 : f32 to vector<8x128xf32>
    %207 = arith.mulf %206, %205 : vector<8x128xf32>
    %208 = math.tanh %207 : vector<8x128xf32>
    %cst_86 = arith.constant 1.000000e+00 : f32
    %209 = vector.broadcast %cst_86 : f32 to vector<8x128xf32>
    %210 = arith.addf %208, %209 : vector<8x128xf32>
    %cst_87 = arith.constant 5.000000e-01 : f32
    %211 = vector.broadcast %cst_87 : f32 to vector<8x128xf32>
    %212 = arith.mulf %211, %210 : vector<8x128xf32>
    %213 = vector.extract_strided_slice %196 {offsets = [0, 256], sizes = [8, 128], strides = [1, 1]} : vector<8x512xf32> to vector<8x128xf32>
    %214 = math.tanh %213 : vector<8x128xf32>
    %215 = vector.extract_strided_slice %196 {offsets = [0, 384], sizes = [8, 128], strides = [1, 1]} : vector<8x512xf32> to vector<8x128xf32>
    %cst_88 = arith.constant 5.000000e-01 : f32
    %216 = vector.broadcast %cst_88 : f32 to vector<8x128xf32>
    %217 = arith.mulf %216, %215 : vector<8x128xf32>
    %218 = math.tanh %217 : vector<8x128xf32>
    %cst_89 = arith.constant 1.000000e+00 : f32
    %219 = vector.broadcast %cst_89 : f32 to vector<8x128xf32>
    %220 = arith.addf %218, %219 : vector<8x128xf32>
    %cst_90 = arith.constant 5.000000e-01 : f32
    %221 = vector.broadcast %cst_90 : f32 to vector<8x128xf32>
    %222 = arith.mulf %221, %220 : vector<8x128xf32>
    %223 = arith.mulf %212, %181 : vector<8x128xf32>
    %224 = arith.mulf %204, %214 : vector<8x128xf32>
    %225 = arith.addf %223, %224 : vector<8x128xf32>
    %226 = math.tanh %225 : vector<8x128xf32>
    %227 = arith.mulf %222, %226 : vector<8x128xf32>
    %228 = arith.truncf %227 : vector<8x128xf32> to vector<8x128xbf16>
    %229 = arith.index_cast %c4_i32 : i32 to index
    %c0_91 = arith.constant 0 : index
    %c0_92 = arith.constant 0 : index
    %230 = vector.load %arg6[%229, %c0_91, %c0_92] : memref<8x8x128xbf16, #tpu.memory_space<vmem>>, vector<1x8x128xbf16>
    %231 = vector.shape_cast %230 : vector<1x8x128xbf16> to vector<8x128xbf16>
    %232 = vector.shape_cast %228 : vector<8x128xbf16> to vector<1x8x128xbf16>
    tpu.vector_store %arg6[%229, %c0_91, %c0_92], %232 {strides = array<i32>} : memref<8x8x128xbf16, #tpu.memory_space<vmem>>, vector<1x8x128xbf16>,
    %c5_i32 = arith.constant 5 : i32
    %c8_i32_93 = arith.constant 8 : i32
    %233 = arith.muli %c5_i32, %c8_i32_93 : i32
    %234 = tpu.assume_multiple %233, 8 : i32
    %235 = arith.index_cast %234 : i32 to index
    %c0_94 = arith.constant 0 : index
    %236 = vector.load %arg10[%235, %c0_94] : memref<64x512xf32, #tpu.memory_space<vmem>>, vector<8x512xf32>
    %237 = arith.truncf %227 : vector<8x128xf32> to vector<8x128xbf16>
    %c0_95 = arith.constant 0 : index
    %c0_96 = arith.constant 0 : index
    %238 = vector.load %arg8[%c0_95, %c0_96] : memref<128x512xbf16, #tpu.memory_space<vmem>>, vector<128x512xbf16>
    %cst_97 = arith.constant dense<0.000000e+00> : vector<8x512xf32>
    %239 = tpu.matmul %237, %238, %cst_97 {dimension_numbers = #tpu.dot_dimension_numbers<[1], [0], [0], [1], [0, 0, 1, 1], [], []>} : vector<8x128xbf16>, vector<128x512xbf16>, vector<8x512xf32> -> vector<8x512xf32>
    %240 = arith.addf %236, %239 : vector<8x512xf32>
    %241 = vector.extract_strided_slice %240 {offsets = [0, 0], sizes = [8, 128], strides = [1, 1]} : vector<8x512xf32> to vector<8x128xf32>
    %cst_98 = arith.constant 5.000000e-01 : f32
    %242 = vector.broadcast %cst_98 : f32 to vector<8x128xf32>
    %243 = arith.mulf %242, %241 : vector<8x128xf32>
    %244 = math.tanh %243 : vector<8x128xf32>
    %cst_99 = arith.constant 1.000000e+00 : f32
    %245 = vector.broadcast %cst_99 : f32 to vector<8x128xf32>
    %246 = arith.addf %244, %245 : vector<8x128xf32>
    %cst_100 = arith.constant 5.000000e-01 : f32
    %247 = vector.broadcast %cst_100 : f32 to vector<8x128xf32>
    %248 = arith.mulf %247, %246 : vector<8x128xf32>
    %249 = vector.extract_strided_slice %240 {offsets = [0, 128], sizes = [8, 128], strides = [1, 1]} : vector<8x512xf32> to vector<8x128xf32>
    %cst_101 = arith.constant 5.000000e-01 : f32
    %250 = vector.broadcast %cst_101 : f32 to vector<8x128xf32>
    %251 = arith.mulf %250, %249 : vector<8x128xf32>
    %252 = math.tanh %251 : vector<8x128xf32>
    %cst_102 = arith.constant 1.000000e+00 : f32
    %253 = vector.broadcast %cst_102 : f32 to vector<8x128xf32>
    %254 = arith.addf %252, %253 : vector<8x128xf32>
    %cst_103 = arith.constant 5.000000e-01 : f32
    %255 = vector.broadcast %cst_103 : f32 to vector<8x128xf32>
    %256 = arith.mulf %255, %254 : vector<8x128xf32>
    %257 = vector.extract_strided_slice %240 {offsets = [0, 256], sizes = [8, 128], strides = [1, 1]} : vector<8x512xf32> to vector<8x128xf32>
    %258 = math.tanh %257 : vector<8x128xf32>
    %259 = vector.extract_strided_slice %240 {offsets = [0, 384], sizes = [8, 128], strides = [1, 1]} : vector<8x512xf32> to vector<8x128xf32>
    %cst_104 = arith.constant 5.000000e-01 : f32
    %260 = vector.broadcast %cst_104 : f32 to vector<8x128xf32>
    %261 = arith.mulf %260, %259 : vector<8x128xf32>
    %262 = math.tanh %261 : vector<8x128xf32>
    %cst_105 = arith.constant 1.000000e+00 : f32
    %263 = vector.broadcast %cst_105 : f32 to vector<8x128xf32>
    %264 = arith.addf %262, %263 : vector<8x128xf32>
    %cst_106 = arith.constant 5.000000e-01 : f32
    %265 = vector.broadcast %cst_106 : f32 to vector<8x128xf32>
    %266 = arith.mulf %265, %264 : vector<8x128xf32>
    %267 = arith.mulf %256, %225 : vector<8x128xf32>
    %268 = arith.mulf %248, %258 : vector<8x128xf32>
    %269 = arith.addf %267, %268 : vector<8x128xf32>
    %270 = math.tanh %269 : vector<8x128xf32>
    %271 = arith.mulf %266, %270 : vector<8x128xf32>
    %272 = arith.truncf %271 : vector<8x128xf32> to vector<8x128xbf16>
    %273 = arith.index_cast %c5_i32 : i32 to index
    %c0_107 = arith.constant 0 : index
    %c0_108 = arith.constant 0 : index
    %274 = vector.load %arg6[%273, %c0_107, %c0_108] : memref<8x8x128xbf16, #tpu.memory_space<vmem>>, vector<1x8x128xbf16>
    %275 = vector.shape_cast %274 : vector<1x8x128xbf16> to vector<8x128xbf16>
    %276 = vector.shape_cast %272 : vector<8x128xbf16> to vector<1x8x128xbf16>
    tpu.vector_store %arg6[%273, %c0_107, %c0_108], %276 {strides = array<i32>} : memref<8x8x128xbf16, #tpu.memory_space<vmem>>, vector<1x8x128xbf16>,
    %c6_i32 = arith.constant 6 : i32
    %c8_i32_109 = arith.constant 8 : i32
    %277 = arith.muli %c6_i32, %c8_i32_109 : i32
    %278 = tpu.assume_multiple %277, 8 : i32
    %279 = arith.index_cast %278 : i32 to index
    %c0_110 = arith.constant 0 : index
    %280 = vector.load %arg10[%279, %c0_110] : memref<64x512xf32, #tpu.memory_space<vmem>>, vector<8x512xf32>
    %281 = arith.truncf %271 : vector<8x128xf32> to vector<8x128xbf16>
    %c0_111 = arith.constant 0 : index
    %c0_112 = arith.constant 0 : index
    %282 = vector.load %arg8[%c0_111, %c0_112] : memref<128x512xbf16, #tpu.memory_space<vmem>>, vector<128x512xbf16>
    %cst_113 = arith.constant dense<0.000000e+00> : vector<8x512xf32>
    %283 = tpu.matmul %281, %282, %cst_113 {dimension_numbers = #tpu.dot_dimension_numbers<[1], [0], [0], [1], [0, 0, 1, 1], [], []>} : vector<8x128xbf16>, vector<128x512xbf16>, vector<8x512xf32> -> vector<8x512xf32>
    %284 = arith.addf %280, %283 : vector<8x512xf32>
    %285 = vector.extract_strided_slice %284 {offsets = [0, 0], sizes = [8, 128], strides = [1, 1]} : vector<8x512xf32> to vector<8x128xf32>
    %cst_114 = arith.constant 5.000000e-01 : f32
    %286 = vector.broadcast %cst_114 : f32 to vector<8x128xf32>
    %287 = arith.mulf %286, %285 : vector<8x128xf32>
    %288 = math.tanh %287 : vector<8x128xf32>
    %cst_115 = arith.constant 1.000000e+00 : f32
    %289 = vector.broadcast %cst_115 : f32 to vector<8x128xf32>
    %290 = arith.addf %288, %289 : vector<8x128xf32>
    %cst_116 = arith.constant 5.000000e-01 : f32
    %291 = vector.broadcast %cst_116 : f32 to vector<8x128xf32>
    %292 = arith.mulf %291, %290 : vector<8x128xf32>
    %293 = vector.extract_strided_slice %284 {offsets = [0, 128], sizes = [8, 128], strides = [1, 1]} : vector<8x512xf32> to vector<8x128xf32>
    %cst_117 = arith.constant 5.000000e-01 : f32
    %294 = vector.broadcast %cst_117 : f32 to vector<8x128xf32>
    %295 = arith.mulf %294, %293 : vector<8x128xf32>
    %296 = math.tanh %295 : vector<8x128xf32>
    %cst_118 = arith.constant 1.000000e+00 : f32
    %297 = vector.broadcast %cst_118 : f32 to vector<8x128xf32>
    %298 = arith.addf %296, %297 : vector<8x128xf32>
    %cst_119 = arith.constant 5.000000e-01 : f32
    %299 = vector.broadcast %cst_119 : f32 to vector<8x128xf32>
    %300 = arith.mulf %299, %298 : vector<8x128xf32>
    %301 = vector.extract_strided_slice %284 {offsets = [0, 256], sizes = [8, 128], strides = [1, 1]} : vector<8x512xf32> to vector<8x128xf32>
    %302 = math.tanh %301 : vector<8x128xf32>
    %303 = vector.extract_strided_slice %284 {offsets = [0, 384], sizes = [8, 128], strides = [1, 1]} : vector<8x512xf32> to vector<8x128xf32>
    %cst_120 = arith.constant 5.000000e-01 : f32
    %304 = vector.broadcast %cst_120 : f32 to vector<8x128xf32>
    %305 = arith.mulf %304, %303 : vector<8x128xf32>
    %306 = math.tanh %305 : vector<8x128xf32>
    %cst_121 = arith.constant 1.000000e+00 : f32
    %307 = vector.broadcast %cst_121 : f32 to vector<8x128xf32>
    %308 = arith.addf %306, %307 : vector<8x128xf32>
    %cst_122 = arith.constant 5.000000e-01 : f32
    %309 = vector.broadcast %cst_122 : f32 to vector<8x128xf32>
    %310 = arith.mulf %309, %308 : vector<8x128xf32>
    %311 = arith.mulf %300, %269 : vector<8x128xf32>
    %312 = arith.mulf %292, %302 : vector<8x128xf32>
    %313 = arith.addf %311, %312 : vector<8x128xf32>
    %314 = math.tanh %313 : vector<8x128xf32>
    %315 = arith.mulf %310, %314 : vector<8x128xf32>
    %316 = arith.truncf %315 : vector<8x128xf32> to vector<8x128xbf16>
    %317 = arith.index_cast %c6_i32 : i32 to index
    %c0_123 = arith.constant 0 : index
    %c0_124 = arith.constant 0 : index
    %318 = vector.load %arg6[%317, %c0_123, %c0_124] : memref<8x8x128xbf16, #tpu.memory_space<vmem>>, vector<1x8x128xbf16>
    %319 = vector.shape_cast %318 : vector<1x8x128xbf16> to vector<8x128xbf16>
    %320 = vector.shape_cast %316 : vector<8x128xbf16> to vector<1x8x128xbf16>
    tpu.vector_store %arg6[%317, %c0_123, %c0_124], %320 {strides = array<i32>} : memref<8x8x128xbf16, #tpu.memory_space<vmem>>, vector<1x8x128xbf16>,
    %c7_i32 = arith.constant 7 : i32
    %c8_i32_125 = arith.constant 8 : i32
    %321 = arith.muli %c7_i32, %c8_i32_125 : i32
    %322 = tpu.assume_multiple %321, 8 : i32
    %323 = arith.index_cast %322 : i32 to index
    %c0_126 = arith.constant 0 : index
    %324 = vector.load %arg10[%323, %c0_126] : memref<64x512xf32, #tpu.memory_space<vmem>>, vector<8x512xf32>
    %325 = arith.truncf %315 : vector<8x128xf32> to vector<8x128xbf16>
    %c0_127 = arith.constant 0 : index
    %c0_128 = arith.constant 0 : index
    %326 = vector.load %arg8[%c0_127, %c0_128] : memref<128x512xbf16, #tpu.memory_space<vmem>>, vector<128x512xbf16>
    %cst_129 = arith.constant dense<0.000000e+00> : vector<8x512xf32>
    %327 = tpu.matmul %325, %326, %cst_129 {dimension_numbers = #tpu.dot_dimension_numbers<[1], [0], [0], [1], [0, 0, 1, 1], [], []>} : vector<8x128xbf16>, vector<128x512xbf16>, vector<8x512xf32> -> vector<8x512xf32>
    %328 = arith.addf %324, %327 : vector<8x512xf32>
    %329 = vector.extract_strided_slice %328 {offsets = [0, 0], sizes = [8, 128], strides = [1, 1]} : vector<8x512xf32> to vector<8x128xf32>
    %cst_130 = arith.constant 5.000000e-01 : f32
    %330 = vector.broadcast %cst_130 : f32 to vector<8x128xf32>
    %331 = arith.mulf %330, %329 : vector<8x128xf32>
    %332 = math.tanh %331 : vector<8x128xf32>
    %cst_131 = arith.constant 1.000000e+00 : f32
    %333 = vector.broadcast %cst_131 : f32 to vector<8x128xf32>
    %334 = arith.addf %332, %333 : vector<8x128xf32>
    %cst_132 = arith.constant 5.000000e-01 : f32
    %335 = vector.broadcast %cst_132 : f32 to vector<8x128xf32>
    %336 = arith.mulf %335, %334 : vector<8x128xf32>
    %337 = vector.extract_strided_slice %328 {offsets = [0, 128], sizes = [8, 128], strides = [1, 1]} : vector<8x512xf32> to vector<8x128xf32>
    %cst_133 = arith.constant 5.000000e-01 : f32
    %338 = vector.broadcast %cst_133 : f32 to vector<8x128xf32>
    %339 = arith.mulf %338, %337 : vector<8x128xf32>
    %340 = math.tanh %339 : vector<8x128xf32>
    %cst_134 = arith.constant 1.000000e+00 : f32
    %341 = vector.broadcast %cst_134 : f32 to vector<8x128xf32>
    %342 = arith.addf %340, %341 : vector<8x128xf32>
    %cst_135 = arith.constant 5.000000e-01 : f32
    %343 = vector.broadcast %cst_135 : f32 to vector<8x128xf32>
    %344 = arith.mulf %343, %342 : vector<8x128xf32>
    %345 = vector.extract_strided_slice %328 {offsets = [0, 256], sizes = [8, 128], strides = [1, 1]} : vector<8x512xf32> to vector<8x128xf32>
    %346 = math.tanh %345 : vector<8x128xf32>
    %347 = vector.extract_strided_slice %328 {offsets = [0, 384], sizes = [8, 128], strides = [1, 1]} : vector<8x512xf32> to vector<8x128xf32>
    %cst_136 = arith.constant 5.000000e-01 : f32
    %348 = vector.broadcast %cst_136 : f32 to vector<8x128xf32>
    %349 = arith.mulf %348, %347 : vector<8x128xf32>
    %350 = math.tanh %349 : vector<8x128xf32>
    %cst_137 = arith.constant 1.000000e+00 : f32
    %351 = vector.broadcast %cst_137 : f32 to vector<8x128xf32>
    %352 = arith.addf %350, %351 : vector<8x128xf32>
    %cst_138 = arith.constant 5.000000e-01 : f32
    %353 = vector.broadcast %cst_138 : f32 to vector<8x128xf32>
    %354 = arith.mulf %353, %352 : vector<8x128xf32>
    %355 = arith.mulf %344, %313 : vector<8x128xf32>
    %356 = arith.mulf %336, %346 : vector<8x128xf32>
    %357 = arith.addf %355, %356 : vector<8x128xf32>
    %358 = math.tanh %357 : vector<8x128xf32>
    %359 = arith.mulf %354, %358 : vector<8x128xf32>
    %360 = arith.truncf %359 : vector<8x128xf32> to vector<8x128xbf16>
    %361 = arith.index_cast %c7_i32 : i32 to index
    %c0_139 = arith.constant 0 : index
    %c0_140 = arith.constant 0 : index
    %362 = vector.load %arg6[%361, %c0_139, %c0_140] : memref<8x8x128xbf16, #tpu.memory_space<vmem>>, vector<1x8x128xbf16>
    %363 = vector.shape_cast %362 : vector<1x8x128xbf16> to vector<8x128xbf16>
    %364 = vector.shape_cast %360 : vector<8x128xbf16> to vector<1x8x128xbf16>
    tpu.vector_store %arg6[%361, %c0_139, %c0_140], %364 {strides = array<i32>} : memref<8x8x128xbf16, #tpu.memory_space<vmem>>, vector<1x8x128xbf16>,
    %c8_i32_141 = arith.constant 8 : i32
    %c0_142 = arith.constant 0 : index
    %c0_143 = arith.constant 0 : index
    %365 = vector.load %arg11[%c0_142, %c0_143] : memref<8x128xf32, #tpu.memory_space<vmem>>, vector<8x128xf32>
    tpu.vector_store %arg11[%c0_142, %c0_143], %359 {strides = array<i32>} : memref<8x128xf32, #tpu.memory_space<vmem>>, vector<8x128xf32>,
    %c0_144 = arith.constant 0 : index
    %c0_145 = arith.constant 0 : index
    %366 = vector.load %arg12[%c0_144, %c0_145] : memref<8x128xf32, #tpu.memory_space<vmem>>, vector<8x128xf32>
    tpu.vector_store %arg12[%c0_144, %c0_145], %357 {strides = array<i32>} : memref<8x128xf32, #tpu.memory_space<vmem>>, vector<8x128xf32>,
    return
  }
  func.func @transform_0(%arg0: i32, %arg1: i32) -> (i32, i32, i32) {
    %c0_i32 = arith.constant 0 : i32
    %c0_i32_0 = arith.constant 0 : i32
    return %arg1, %arg0, %c0_i32 : i32, i32, i32
  }
  func.func @transform_3(%arg0: i32, %arg1: i32) -> (i32, i32) {
    %c0_i32 = arith.constant 0 : i32
    %c0_i32_0 = arith.constant 0 : i32
    %c0_i32_1 = arith.constant 0 : i32
    return %c0_i32, %c0_i32_0 : i32, i32
  }
  func.func @transform_4(%arg0: i32, %arg1: i32) -> (i32, i32, i32) {
    %c0_i32 = arith.constant 0 : i32
    %c0_i32_0 = arith.constant 0 : i32
    return %arg1, %arg0, %c0_i32 : i32, i32, i32
  }
}

module attributes {stable_mosaic.version = 11 : i64} {
  func.func @_lstm_last_kernel(%arg0: i32, %arg1: i32, %arg2: memref<8x8x128xbf16, #tpu.memory_space<vmem>>, %arg3: memref<128x512xbf16, #tpu.memory_space<any>>, %arg4: memref<128x512xbf16, #tpu.memory_space<any>>, %arg5: memref<1x512xf32, #tpu.memory_space<vmem>>, %arg6: memref<128x128xbf16, #tpu.memory_space<vmem>>, %arg7: memref<1x128xf32, #tpu.memory_space<vmem>>, %arg8: memref<8x128xf32, #tpu.memory_space<vmem>>, %arg9: memref<128x512xbf16, #tpu.memory_space<vmem>>, %arg10: memref<128x512xbf16, #tpu.memory_space<vmem>>, %arg11: memref<2x!tpu.dma_semaphore, #tpu.memory_space<semaphore_mem>>, %arg12: memref<64x512xf32, #tpu.memory_space<vmem>>, %arg13: memref<8x128xf32, #tpu.memory_space<vmem>>, %arg14: memref<8x128xf32, #tpu.memory_space<vmem>>) attributes {dimension_semantics = [#tpu.dimension_semantics<parallel>, #tpu.dimension_semantics<arbitrary>], iteration_bounds = array<i64: 1, 1>, scalar_prefetch = 0 : i64, scratch_operands = 6 : i64, tpu.core_type = #tpu.core_type<tc>, window_params = [{transform_indices = @transform_0, window_bounds = array<i64: 8, 8, 128>}, {}, {}, {pipeline_mode = #tpu.pipeline_mode<synchronous>, transform_indices = @transform_3, window_bounds = array<i64: 1, 512>}, {pipeline_mode = #tpu.pipeline_mode<synchronous>, transform_indices = @transform_4, window_bounds = array<i64: 128, 128>}, {pipeline_mode = #tpu.pipeline_mode<synchronous>, transform_indices = @transform_5, window_bounds = array<i64: 1, 128>}, {transform_indices = @transform_6, window_bounds = array<i64: 8, 128>}]} {
    %c0_i32 = arith.constant 0 : i32
    %0 = arith.cmpi eq, %arg1, %c0_i32 : i32
    %1 = arith.extui %0 : i1 to i32
    %c0_i32_0 = arith.constant 0 : i32
    %2 = arith.cmpi ne, %1, %c0_i32_0 : i32
    scf.if %2 {
      %c0_i32_132 = arith.constant 0 : i32
      %330 = tpu.memref_slice %arg11[%c0_i32_132] : memref<2x!tpu.dma_semaphore, #tpu.memory_space<semaphore_mem>> -> memref<1x!tpu.dma_semaphore, #tpu.memory_space<semaphore_mem>>
      %331 = tpu.memref_squeeze %330 : memref<1x!tpu.dma_semaphore, #tpu.memory_space<semaphore_mem>> -> memref<!tpu.dma_semaphore, #tpu.memory_space<semaphore_mem>>
      tpu.enqueue_dma source(%arg3 : memref<128x512xbf16, #tpu.memory_space<any>>) target(%arg9 : memref<128x512xbf16, #tpu.memory_space<vmem>>) target_semaphore(%331 : memref<!tpu.dma_semaphore, #tpu.memory_space<semaphore_mem>>)
      %c1_i32_133 = arith.constant 1 : i32
      %332 = tpu.memref_slice %arg11[%c1_i32_133] : memref<2x!tpu.dma_semaphore, #tpu.memory_space<semaphore_mem>> -> memref<1x!tpu.dma_semaphore, #tpu.memory_space<semaphore_mem>>
      %333 = tpu.memref_squeeze %332 : memref<1x!tpu.dma_semaphore, #tpu.memory_space<semaphore_mem>> -> memref<!tpu.dma_semaphore, #tpu.memory_space<semaphore_mem>>
      tpu.enqueue_dma source(%arg4 : memref<128x512xbf16, #tpu.memory_space<any>>) target(%arg10 : memref<128x512xbf16, #tpu.memory_space<vmem>>) target_semaphore(%333 : memref<!tpu.dma_semaphore, #tpu.memory_space<semaphore_mem>>)
      %cst_134 = arith.constant 0.000000e+00 : f32
      %334 = vector.broadcast %cst_134 : f32 to vector<8x128xf32>
      %c0_135 = arith.constant 0 : index
      %c0_136 = arith.constant 0 : index
      %335 = vector.load %arg13[%c0_135, %c0_136] : memref<8x128xf32, #tpu.memory_space<vmem>>, vector<8x128xf32>
      tpu.vector_store %arg13[%c0_135, %c0_136], %334 {strides = array<i32>} : memref<8x128xf32, #tpu.memory_space<vmem>>, vector<8x128xf32>,
      %cst_137 = arith.constant 0.000000e+00 : f32
      %336 = vector.broadcast %cst_137 : f32 to vector<8x128xf32>
      %c0_138 = arith.constant 0 : index
      %c0_139 = arith.constant 0 : index
      %337 = vector.load %arg14[%c0_138, %c0_139] : memref<8x128xf32, #tpu.memory_space<vmem>>, vector<8x128xf32>
      tpu.vector_store %arg14[%c0_138, %c0_139], %336 {strides = array<i32>} : memref<8x128xf32, #tpu.memory_space<vmem>>, vector<8x128xf32>,
      %c0_i32_140 = arith.constant 0 : i32
      %338 = tpu.memref_slice %arg11[%c0_i32_140] : memref<2x!tpu.dma_semaphore, #tpu.memory_space<semaphore_mem>> -> memref<1x!tpu.dma_semaphore, #tpu.memory_space<semaphore_mem>>
      %339 = tpu.memref_squeeze %338 : memref<1x!tpu.dma_semaphore, #tpu.memory_space<semaphore_mem>> -> memref<!tpu.dma_semaphore, #tpu.memory_space<semaphore_mem>>
      tpu.wait_dma2 semaphore(%339 : memref<!tpu.dma_semaphore, #tpu.memory_space<semaphore_mem>>) src(%arg3 : memref<128x512xbf16, #tpu.memory_space<any>>) dst(%arg9 : memref<128x512xbf16, #tpu.memory_space<vmem>>)
      %c1_i32_141 = arith.constant 1 : i32
      %340 = tpu.memref_slice %arg11[%c1_i32_141] : memref<2x!tpu.dma_semaphore, #tpu.memory_space<semaphore_mem>> -> memref<1x!tpu.dma_semaphore, #tpu.memory_space<semaphore_mem>>
      %341 = tpu.memref_squeeze %340 : memref<1x!tpu.dma_semaphore, #tpu.memory_space<semaphore_mem>> -> memref<!tpu.dma_semaphore, #tpu.memory_space<semaphore_mem>>
      tpu.wait_dma2 semaphore(%341 : memref<!tpu.dma_semaphore, #tpu.memory_space<semaphore_mem>>) src(%arg4 : memref<128x512xbf16, #tpu.memory_space<any>>) dst(%arg10 : memref<128x512xbf16, #tpu.memory_space<vmem>>)
    } else {
    }
    %c0 = arith.constant 0 : index
    %c0_1 = arith.constant 0 : index
    %c0_2 = arith.constant 0 : index
    %3 = vector.load %arg2[%c0, %c0_1, %c0_2] : memref<8x8x128xbf16, #tpu.memory_space<vmem>>, vector<8x8x128xbf16>
    %4 = vector.shape_cast %3 : vector<8x8x128xbf16> to vector<64x128xbf16>
    %c0_3 = arith.constant 0 : index
    %c0_4 = arith.constant 0 : index
    %5 = vector.load %arg9[%c0_3, %c0_4] : memref<128x512xbf16, #tpu.memory_space<vmem>>, vector<128x512xbf16>
    %cst = arith.constant dense<0.000000e+00> : vector<64x512xf32>
    %6 = tpu.matmul %4, %5, %cst {dimension_numbers = #tpu.dot_dimension_numbers<[1], [0], [0], [1], [0, 0, 1, 1], [], []>} : vector<64x128xbf16>, vector<128x512xbf16>, vector<64x512xf32> -> vector<64x512xf32>
    %c0_5 = arith.constant 0 : index
    %c0_6 = arith.constant 0 : index
    %7 = vector.load %arg5[%c0_5, %c0_6] : memref<1x512xf32, #tpu.memory_space<vmem>>, vector<1x512xf32>
    %8 = vector.broadcast %7 : vector<1x512xf32> to vector<64x512xf32>
    %9 = arith.addf %6, %8 : vector<64x512xf32>
    %c0_7 = arith.constant 0 : index
    %c0_8 = arith.constant 0 : index
    %10 = vector.load %arg12[%c0_7, %c0_8] : memref<64x512xf32, #tpu.memory_space<vmem>>, vector<64x512xf32>
    tpu.vector_store %arg12[%c0_7, %c0_8], %9 {strides = array<i32>} : memref<64x512xf32, #tpu.memory_space<vmem>>, vector<64x512xf32>,
    %c0_9 = arith.constant 0 : index
    %c0_10 = arith.constant 0 : index
    %11 = vector.load %arg13[%c0_9, %c0_10] : memref<8x128xf32, #tpu.memory_space<vmem>>, vector<8x128xf32>
    %c0_11 = arith.constant 0 : index
    %c0_12 = arith.constant 0 : index
    %12 = vector.load %arg14[%c0_11, %c0_12] : memref<8x128xf32, #tpu.memory_space<vmem>>, vector<8x128xf32>
    %c0_i32_13 = arith.constant 0 : i32
    %c8_i32 = arith.constant 8 : i32
    %13 = arith.muli %c0_i32_13, %c8_i32 : i32
    %14 = tpu.assume_multiple %13, 8 : i32
    %15 = arith.index_cast %14 : i32 to index
    %c0_14 = arith.constant 0 : index
    %16 = vector.load %arg12[%15, %c0_14] : memref<64x512xf32, #tpu.memory_space<vmem>>, vector<8x512xf32>
    %17 = arith.truncf %11 : vector<8x128xf32> to vector<8x128xbf16>
    %c0_15 = arith.constant 0 : index
    %c0_16 = arith.constant 0 : index
    %18 = vector.load %arg10[%c0_15, %c0_16] : memref<128x512xbf16, #tpu.memory_space<vmem>>, vector<128x512xbf16>
    %cst_17 = arith.constant dense<0.000000e+00> : vector<8x512xf32>
    %19 = tpu.matmul %17, %18, %cst_17 {dimension_numbers = #tpu.dot_dimension_numbers<[1], [0], [0], [1], [0, 0, 1, 1], [], []>} : vector<8x128xbf16>, vector<128x512xbf16>, vector<8x512xf32> -> vector<8x512xf32>
    %20 = arith.addf %16, %19 : vector<8x512xf32>
    %21 = vector.extract_strided_slice %20 {offsets = [0, 0], sizes = [8, 128], strides = [1, 1]} : vector<8x512xf32> to vector<8x128xf32>
    %cst_18 = arith.constant 5.000000e-01 : f32
    %22 = vector.broadcast %cst_18 : f32 to vector<8x128xf32>
    %23 = arith.mulf %22, %21 : vector<8x128xf32>
    %24 = math.tanh %23 : vector<8x128xf32>
    %cst_19 = arith.constant 1.000000e+00 : f32
    %25 = vector.broadcast %cst_19 : f32 to vector<8x128xf32>
    %26 = arith.addf %24, %25 : vector<8x128xf32>
    %cst_20 = arith.constant 5.000000e-01 : f32
    %27 = vector.broadcast %cst_20 : f32 to vector<8x128xf32>
    %28 = arith.mulf %27, %26 : vector<8x128xf32>
    %29 = vector.extract_strided_slice %20 {offsets = [0, 128], sizes = [8, 128], strides = [1, 1]} : vector<8x512xf32> to vector<8x128xf32>
    %cst_21 = arith.constant 5.000000e-01 : f32
    %30 = vector.broadcast %cst_21 : f32 to vector<8x128xf32>
    %31 = arith.mulf %30, %29 : vector<8x128xf32>
    %32 = math.tanh %31 : vector<8x128xf32>
    %cst_22 = arith.constant 1.000000e+00 : f32
    %33 = vector.broadcast %cst_22 : f32 to vector<8x128xf32>
    %34 = arith.addf %32, %33 : vector<8x128xf32>
    %cst_23 = arith.constant 5.000000e-01 : f32
    %35 = vector.broadcast %cst_23 : f32 to vector<8x128xf32>
    %36 = arith.mulf %35, %34 : vector<8x128xf32>
    %37 = vector.extract_strided_slice %20 {offsets = [0, 256], sizes = [8, 128], strides = [1, 1]} : vector<8x512xf32> to vector<8x128xf32>
    %38 = math.tanh %37 : vector<8x128xf32>
    %39 = vector.extract_strided_slice %20 {offsets = [0, 384], sizes = [8, 128], strides = [1, 1]} : vector<8x512xf32> to vector<8x128xf32>
    %cst_24 = arith.constant 5.000000e-01 : f32
    %40 = vector.broadcast %cst_24 : f32 to vector<8x128xf32>
    %41 = arith.mulf %40, %39 : vector<8x128xf32>
    %42 = math.tanh %41 : vector<8x128xf32>
    %cst_25 = arith.constant 1.000000e+00 : f32
    %43 = vector.broadcast %cst_25 : f32 to vector<8x128xf32>
    %44 = arith.addf %42, %43 : vector<8x128xf32>
    %cst_26 = arith.constant 5.000000e-01 : f32
    %45 = vector.broadcast %cst_26 : f32 to vector<8x128xf32>
    %46 = arith.mulf %45, %44 : vector<8x128xf32>
    %47 = arith.mulf %36, %12 : vector<8x128xf32>
    %48 = arith.mulf %28, %38 : vector<8x128xf32>
    %49 = arith.addf %47, %48 : vector<8x128xf32>
    %50 = math.tanh %49 : vector<8x128xf32>
    %51 = arith.mulf %46, %50 : vector<8x128xf32>
    %c1_i32 = arith.constant 1 : i32
    %c8_i32_27 = arith.constant 8 : i32
    %52 = arith.muli %c1_i32, %c8_i32_27 : i32
    %53 = tpu.assume_multiple %52, 8 : i32
    %54 = arith.index_cast %53 : i32 to index
    %c0_28 = arith.constant 0 : index
    %55 = vector.load %arg12[%54, %c0_28] : memref<64x512xf32, #tpu.memory_space<vmem>>, vector<8x512xf32>
    %56 = arith.truncf %51 : vector<8x128xf32> to vector<8x128xbf16>
    %c0_29 = arith.constant 0 : index
    %c0_30 = arith.constant 0 : index
    %57 = vector.load %arg10[%c0_29, %c0_30] : memref<128x512xbf16, #tpu.memory_space<vmem>>, vector<128x512xbf16>
    %cst_31 = arith.constant dense<0.000000e+00> : vector<8x512xf32>
    %58 = tpu.matmul %56, %57, %cst_31 {dimension_numbers = #tpu.dot_dimension_numbers<[1], [0], [0], [1], [0, 0, 1, 1], [], []>} : vector<8x128xbf16>, vector<128x512xbf16>, vector<8x512xf32> -> vector<8x512xf32>
    %59 = arith.addf %55, %58 : vector<8x512xf32>
    %60 = vector.extract_strided_slice %59 {offsets = [0, 0], sizes = [8, 128], strides = [1, 1]} : vector<8x512xf32> to vector<8x128xf32>
    %cst_32 = arith.constant 5.000000e-01 : f32
    %61 = vector.broadcast %cst_32 : f32 to vector<8x128xf32>
    %62 = arith.mulf %61, %60 : vector<8x128xf32>
    %63 = math.tanh %62 : vector<8x128xf32>
    %cst_33 = arith.constant 1.000000e+00 : f32
    %64 = vector.broadcast %cst_33 : f32 to vector<8x128xf32>
    %65 = arith.addf %63, %64 : vector<8x128xf32>
    %cst_34 = arith.constant 5.000000e-01 : f32
    %66 = vector.broadcast %cst_34 : f32 to vector<8x128xf32>
    %67 = arith.mulf %66, %65 : vector<8x128xf32>
    %68 = vector.extract_strided_slice %59 {offsets = [0, 128], sizes = [8, 128], strides = [1, 1]} : vector<8x512xf32> to vector<8x128xf32>
    %cst_35 = arith.constant 5.000000e-01 : f32
    %69 = vector.broadcast %cst_35 : f32 to vector<8x128xf32>
    %70 = arith.mulf %69, %68 : vector<8x128xf32>
    %71 = math.tanh %70 : vector<8x128xf32>
    %cst_36 = arith.constant 1.000000e+00 : f32
    %72 = vector.broadcast %cst_36 : f32 to vector<8x128xf32>
    %73 = arith.addf %71, %72 : vector<8x128xf32>
    %cst_37 = arith.constant 5.000000e-01 : f32
    %74 = vector.broadcast %cst_37 : f32 to vector<8x128xf32>
    %75 = arith.mulf %74, %73 : vector<8x128xf32>
    %76 = vector.extract_strided_slice %59 {offsets = [0, 256], sizes = [8, 128], strides = [1, 1]} : vector<8x512xf32> to vector<8x128xf32>
    %77 = math.tanh %76 : vector<8x128xf32>
    %78 = vector.extract_strided_slice %59 {offsets = [0, 384], sizes = [8, 128], strides = [1, 1]} : vector<8x512xf32> to vector<8x128xf32>
    %cst_38 = arith.constant 5.000000e-01 : f32
    %79 = vector.broadcast %cst_38 : f32 to vector<8x128xf32>
    %80 = arith.mulf %79, %78 : vector<8x128xf32>
    %81 = math.tanh %80 : vector<8x128xf32>
    %cst_39 = arith.constant 1.000000e+00 : f32
    %82 = vector.broadcast %cst_39 : f32 to vector<8x128xf32>
    %83 = arith.addf %81, %82 : vector<8x128xf32>
    %cst_40 = arith.constant 5.000000e-01 : f32
    %84 = vector.broadcast %cst_40 : f32 to vector<8x128xf32>
    %85 = arith.mulf %84, %83 : vector<8x128xf32>
    %86 = arith.mulf %75, %49 : vector<8x128xf32>
    %87 = arith.mulf %67, %77 : vector<8x128xf32>
    %88 = arith.addf %86, %87 : vector<8x128xf32>
    %89 = math.tanh %88 : vector<8x128xf32>
    %90 = arith.mulf %85, %89 : vector<8x128xf32>
    %c2_i32 = arith.constant 2 : i32
    %c8_i32_41 = arith.constant 8 : i32
    %91 = arith.muli %c2_i32, %c8_i32_41 : i32
    %92 = tpu.assume_multiple %91, 8 : i32
    %93 = arith.index_cast %92 : i32 to index
    %c0_42 = arith.constant 0 : index
    %94 = vector.load %arg12[%93, %c0_42] : memref<64x512xf32, #tpu.memory_space<vmem>>, vector<8x512xf32>
    %95 = arith.truncf %90 : vector<8x128xf32> to vector<8x128xbf16>
    %c0_43 = arith.constant 0 : index
    %c0_44 = arith.constant 0 : index
    %96 = vector.load %arg10[%c0_43, %c0_44] : memref<128x512xbf16, #tpu.memory_space<vmem>>, vector<128x512xbf16>
    %cst_45 = arith.constant dense<0.000000e+00> : vector<8x512xf32>
    %97 = tpu.matmul %95, %96, %cst_45 {dimension_numbers = #tpu.dot_dimension_numbers<[1], [0], [0], [1], [0, 0, 1, 1], [], []>} : vector<8x128xbf16>, vector<128x512xbf16>, vector<8x512xf32> -> vector<8x512xf32>
    %98 = arith.addf %94, %97 : vector<8x512xf32>
    %99 = vector.extract_strided_slice %98 {offsets = [0, 0], sizes = [8, 128], strides = [1, 1]} : vector<8x512xf32> to vector<8x128xf32>
    %cst_46 = arith.constant 5.000000e-01 : f32
    %100 = vector.broadcast %cst_46 : f32 to vector<8x128xf32>
    %101 = arith.mulf %100, %99 : vector<8x128xf32>
    %102 = math.tanh %101 : vector<8x128xf32>
    %cst_47 = arith.constant 1.000000e+00 : f32
    %103 = vector.broadcast %cst_47 : f32 to vector<8x128xf32>
    %104 = arith.addf %102, %103 : vector<8x128xf32>
    %cst_48 = arith.constant 5.000000e-01 : f32
    %105 = vector.broadcast %cst_48 : f32 to vector<8x128xf32>
    %106 = arith.mulf %105, %104 : vector<8x128xf32>
    %107 = vector.extract_strided_slice %98 {offsets = [0, 128], sizes = [8, 128], strides = [1, 1]} : vector<8x512xf32> to vector<8x128xf32>
    %cst_49 = arith.constant 5.000000e-01 : f32
    %108 = vector.broadcast %cst_49 : f32 to vector<8x128xf32>
    %109 = arith.mulf %108, %107 : vector<8x128xf32>
    %110 = math.tanh %109 : vector<8x128xf32>
    %cst_50 = arith.constant 1.000000e+00 : f32
    %111 = vector.broadcast %cst_50 : f32 to vector<8x128xf32>
    %112 = arith.addf %110, %111 : vector<8x128xf32>
    %cst_51 = arith.constant 5.000000e-01 : f32
    %113 = vector.broadcast %cst_51 : f32 to vector<8x128xf32>
    %114 = arith.mulf %113, %112 : vector<8x128xf32>
    %115 = vector.extract_strided_slice %98 {offsets = [0, 256], sizes = [8, 128], strides = [1, 1]} : vector<8x512xf32> to vector<8x128xf32>
    %116 = math.tanh %115 : vector<8x128xf32>
    %117 = vector.extract_strided_slice %98 {offsets = [0, 384], sizes = [8, 128], strides = [1, 1]} : vector<8x512xf32> to vector<8x128xf32>
    %cst_52 = arith.constant 5.000000e-01 : f32
    %118 = vector.broadcast %cst_52 : f32 to vector<8x128xf32>
    %119 = arith.mulf %118, %117 : vector<8x128xf32>
    %120 = math.tanh %119 : vector<8x128xf32>
    %cst_53 = arith.constant 1.000000e+00 : f32
    %121 = vector.broadcast %cst_53 : f32 to vector<8x128xf32>
    %122 = arith.addf %120, %121 : vector<8x128xf32>
    %cst_54 = arith.constant 5.000000e-01 : f32
    %123 = vector.broadcast %cst_54 : f32 to vector<8x128xf32>
    %124 = arith.mulf %123, %122 : vector<8x128xf32>
    %125 = arith.mulf %114, %88 : vector<8x128xf32>
    %126 = arith.mulf %106, %116 : vector<8x128xf32>
    %127 = arith.addf %125, %126 : vector<8x128xf32>
    %128 = math.tanh %127 : vector<8x128xf32>
    %129 = arith.mulf %124, %128 : vector<8x128xf32>
    %c3_i32 = arith.constant 3 : i32
    %c8_i32_55 = arith.constant 8 : i32
    %130 = arith.muli %c3_i32, %c8_i32_55 : i32
    %131 = tpu.assume_multiple %130, 8 : i32
    %132 = arith.index_cast %131 : i32 to index
    %c0_56 = arith.constant 0 : index
    %133 = vector.load %arg12[%132, %c0_56] : memref<64x512xf32, #tpu.memory_space<vmem>>, vector<8x512xf32>
    %134 = arith.truncf %129 : vector<8x128xf32> to vector<8x128xbf16>
    %c0_57 = arith.constant 0 : index
    %c0_58 = arith.constant 0 : index
    %135 = vector.load %arg10[%c0_57, %c0_58] : memref<128x512xbf16, #tpu.memory_space<vmem>>, vector<128x512xbf16>
    %cst_59 = arith.constant dense<0.000000e+00> : vector<8x512xf32>
    %136 = tpu.matmul %134, %135, %cst_59 {dimension_numbers = #tpu.dot_dimension_numbers<[1], [0], [0], [1], [0, 0, 1, 1], [], []>} : vector<8x128xbf16>, vector<128x512xbf16>, vector<8x512xf32> -> vector<8x512xf32>
    %137 = arith.addf %133, %136 : vector<8x512xf32>
    %138 = vector.extract_strided_slice %137 {offsets = [0, 0], sizes = [8, 128], strides = [1, 1]} : vector<8x512xf32> to vector<8x128xf32>
    %cst_60 = arith.constant 5.000000e-01 : f32
    %139 = vector.broadcast %cst_60 : f32 to vector<8x128xf32>
    %140 = arith.mulf %139, %138 : vector<8x128xf32>
    %141 = math.tanh %140 : vector<8x128xf32>
    %cst_61 = arith.constant 1.000000e+00 : f32
    %142 = vector.broadcast %cst_61 : f32 to vector<8x128xf32>
    %143 = arith.addf %141, %142 : vector<8x128xf32>
    %cst_62 = arith.constant 5.000000e-01 : f32
    %144 = vector.broadcast %cst_62 : f32 to vector<8x128xf32>
    %145 = arith.mulf %144, %143 : vector<8x128xf32>
    %146 = vector.extract_strided_slice %137 {offsets = [0, 128], sizes = [8, 128], strides = [1, 1]} : vector<8x512xf32> to vector<8x128xf32>
    %cst_63 = arith.constant 5.000000e-01 : f32
    %147 = vector.broadcast %cst_63 : f32 to vector<8x128xf32>
    %148 = arith.mulf %147, %146 : vector<8x128xf32>
    %149 = math.tanh %148 : vector<8x128xf32>
    %cst_64 = arith.constant 1.000000e+00 : f32
    %150 = vector.broadcast %cst_64 : f32 to vector<8x128xf32>
    %151 = arith.addf %149, %150 : vector<8x128xf32>
    %cst_65 = arith.constant 5.000000e-01 : f32
    %152 = vector.broadcast %cst_65 : f32 to vector<8x128xf32>
    %153 = arith.mulf %152, %151 : vector<8x128xf32>
    %154 = vector.extract_strided_slice %137 {offsets = [0, 256], sizes = [8, 128], strides = [1, 1]} : vector<8x512xf32> to vector<8x128xf32>
    %155 = math.tanh %154 : vector<8x128xf32>
    %156 = vector.extract_strided_slice %137 {offsets = [0, 384], sizes = [8, 128], strides = [1, 1]} : vector<8x512xf32> to vector<8x128xf32>
    %cst_66 = arith.constant 5.000000e-01 : f32
    %157 = vector.broadcast %cst_66 : f32 to vector<8x128xf32>
    %158 = arith.mulf %157, %156 : vector<8x128xf32>
    %159 = math.tanh %158 : vector<8x128xf32>
    %cst_67 = arith.constant 1.000000e+00 : f32
    %160 = vector.broadcast %cst_67 : f32 to vector<8x128xf32>
    %161 = arith.addf %159, %160 : vector<8x128xf32>
    %cst_68 = arith.constant 5.000000e-01 : f32
    %162 = vector.broadcast %cst_68 : f32 to vector<8x128xf32>
    %163 = arith.mulf %162, %161 : vector<8x128xf32>
    %164 = arith.mulf %153, %127 : vector<8x128xf32>
    %165 = arith.mulf %145, %155 : vector<8x128xf32>
    %166 = arith.addf %164, %165 : vector<8x128xf32>
    %167 = math.tanh %166 : vector<8x128xf32>
    %168 = arith.mulf %163, %167 : vector<8x128xf32>
    %c4_i32 = arith.constant 4 : i32
    %c8_i32_69 = arith.constant 8 : i32
    %169 = arith.muli %c4_i32, %c8_i32_69 : i32
    %170 = tpu.assume_multiple %169, 8 : i32
    %171 = arith.index_cast %170 : i32 to index
    %c0_70 = arith.constant 0 : index
    %172 = vector.load %arg12[%171, %c0_70] : memref<64x512xf32, #tpu.memory_space<vmem>>, vector<8x512xf32>
    %173 = arith.truncf %168 : vector<8x128xf32> to vector<8x128xbf16>
    %c0_71 = arith.constant 0 : index
    %c0_72 = arith.constant 0 : index
    %174 = vector.load %arg10[%c0_71, %c0_72] : memref<128x512xbf16, #tpu.memory_space<vmem>>, vector<128x512xbf16>
    %cst_73 = arith.constant dense<0.000000e+00> : vector<8x512xf32>
    %175 = tpu.matmul %173, %174, %cst_73 {dimension_numbers = #tpu.dot_dimension_numbers<[1], [0], [0], [1], [0, 0, 1, 1], [], []>} : vector<8x128xbf16>, vector<128x512xbf16>, vector<8x512xf32> -> vector<8x512xf32>
    %176 = arith.addf %172, %175 : vector<8x512xf32>
    %177 = vector.extract_strided_slice %176 {offsets = [0, 0], sizes = [8, 128], strides = [1, 1]} : vector<8x512xf32> to vector<8x128xf32>
    %cst_74 = arith.constant 5.000000e-01 : f32
    %178 = vector.broadcast %cst_74 : f32 to vector<8x128xf32>
    %179 = arith.mulf %178, %177 : vector<8x128xf32>
    %180 = math.tanh %179 : vector<8x128xf32>
    %cst_75 = arith.constant 1.000000e+00 : f32
    %181 = vector.broadcast %cst_75 : f32 to vector<8x128xf32>
    %182 = arith.addf %180, %181 : vector<8x128xf32>
    %cst_76 = arith.constant 5.000000e-01 : f32
    %183 = vector.broadcast %cst_76 : f32 to vector<8x128xf32>
    %184 = arith.mulf %183, %182 : vector<8x128xf32>
    %185 = vector.extract_strided_slice %176 {offsets = [0, 128], sizes = [8, 128], strides = [1, 1]} : vector<8x512xf32> to vector<8x128xf32>
    %cst_77 = arith.constant 5.000000e-01 : f32
    %186 = vector.broadcast %cst_77 : f32 to vector<8x128xf32>
    %187 = arith.mulf %186, %185 : vector<8x128xf32>
    %188 = math.tanh %187 : vector<8x128xf32>
    %cst_78 = arith.constant 1.000000e+00 : f32
    %189 = vector.broadcast %cst_78 : f32 to vector<8x128xf32>
    %190 = arith.addf %188, %189 : vector<8x128xf32>
    %cst_79 = arith.constant 5.000000e-01 : f32
    %191 = vector.broadcast %cst_79 : f32 to vector<8x128xf32>
    %192 = arith.mulf %191, %190 : vector<8x128xf32>
    %193 = vector.extract_strided_slice %176 {offsets = [0, 256], sizes = [8, 128], strides = [1, 1]} : vector<8x512xf32> to vector<8x128xf32>
    %194 = math.tanh %193 : vector<8x128xf32>
    %195 = vector.extract_strided_slice %176 {offsets = [0, 384], sizes = [8, 128], strides = [1, 1]} : vector<8x512xf32> to vector<8x128xf32>
    %cst_80 = arith.constant 5.000000e-01 : f32
    %196 = vector.broadcast %cst_80 : f32 to vector<8x128xf32>
    %197 = arith.mulf %196, %195 : vector<8x128xf32>
    %198 = math.tanh %197 : vector<8x128xf32>
    %cst_81 = arith.constant 1.000000e+00 : f32
    %199 = vector.broadcast %cst_81 : f32 to vector<8x128xf32>
    %200 = arith.addf %198, %199 : vector<8x128xf32>
    %cst_82 = arith.constant 5.000000e-01 : f32
    %201 = vector.broadcast %cst_82 : f32 to vector<8x128xf32>
    %202 = arith.mulf %201, %200 : vector<8x128xf32>
    %203 = arith.mulf %192, %166 : vector<8x128xf32>
    %204 = arith.mulf %184, %194 : vector<8x128xf32>
    %205 = arith.addf %203, %204 : vector<8x128xf32>
    %206 = math.tanh %205 : vector<8x128xf32>
    %207 = arith.mulf %202, %206 : vector<8x128xf32>
    %c5_i32 = arith.constant 5 : i32
    %c8_i32_83 = arith.constant 8 : i32
    %208 = arith.muli %c5_i32, %c8_i32_83 : i32
    %209 = tpu.assume_multiple %208, 8 : i32
    %210 = arith.index_cast %209 : i32 to index
    %c0_84 = arith.constant 0 : index
    %211 = vector.load %arg12[%210, %c0_84] : memref<64x512xf32, #tpu.memory_space<vmem>>, vector<8x512xf32>
    %212 = arith.truncf %207 : vector<8x128xf32> to vector<8x128xbf16>
    %c0_85 = arith.constant 0 : index
    %c0_86 = arith.constant 0 : index
    %213 = vector.load %arg10[%c0_85, %c0_86] : memref<128x512xbf16, #tpu.memory_space<vmem>>, vector<128x512xbf16>
    %cst_87 = arith.constant dense<0.000000e+00> : vector<8x512xf32>
    %214 = tpu.matmul %212, %213, %cst_87 {dimension_numbers = #tpu.dot_dimension_numbers<[1], [0], [0], [1], [0, 0, 1, 1], [], []>} : vector<8x128xbf16>, vector<128x512xbf16>, vector<8x512xf32> -> vector<8x512xf32>
    %215 = arith.addf %211, %214 : vector<8x512xf32>
    %216 = vector.extract_strided_slice %215 {offsets = [0, 0], sizes = [8, 128], strides = [1, 1]} : vector<8x512xf32> to vector<8x128xf32>
    %cst_88 = arith.constant 5.000000e-01 : f32
    %217 = vector.broadcast %cst_88 : f32 to vector<8x128xf32>
    %218 = arith.mulf %217, %216 : vector<8x128xf32>
    %219 = math.tanh %218 : vector<8x128xf32>
    %cst_89 = arith.constant 1.000000e+00 : f32
    %220 = vector.broadcast %cst_89 : f32 to vector<8x128xf32>
    %221 = arith.addf %219, %220 : vector<8x128xf32>
    %cst_90 = arith.constant 5.000000e-01 : f32
    %222 = vector.broadcast %cst_90 : f32 to vector<8x128xf32>
    %223 = arith.mulf %222, %221 : vector<8x128xf32>
    %224 = vector.extract_strided_slice %215 {offsets = [0, 128], sizes = [8, 128], strides = [1, 1]} : vector<8x512xf32> to vector<8x128xf32>
    %cst_91 = arith.constant 5.000000e-01 : f32
    %225 = vector.broadcast %cst_91 : f32 to vector<8x128xf32>
    %226 = arith.mulf %225, %224 : vector<8x128xf32>
    %227 = math.tanh %226 : vector<8x128xf32>
    %cst_92 = arith.constant 1.000000e+00 : f32
    %228 = vector.broadcast %cst_92 : f32 to vector<8x128xf32>
    %229 = arith.addf %227, %228 : vector<8x128xf32>
    %cst_93 = arith.constant 5.000000e-01 : f32
    %230 = vector.broadcast %cst_93 : f32 to vector<8x128xf32>
    %231 = arith.mulf %230, %229 : vector<8x128xf32>
    %232 = vector.extract_strided_slice %215 {offsets = [0, 256], sizes = [8, 128], strides = [1, 1]} : vector<8x512xf32> to vector<8x128xf32>
    %233 = math.tanh %232 : vector<8x128xf32>
    %234 = vector.extract_strided_slice %215 {offsets = [0, 384], sizes = [8, 128], strides = [1, 1]} : vector<8x512xf32> to vector<8x128xf32>
    %cst_94 = arith.constant 5.000000e-01 : f32
    %235 = vector.broadcast %cst_94 : f32 to vector<8x128xf32>
    %236 = arith.mulf %235, %234 : vector<8x128xf32>
    %237 = math.tanh %236 : vector<8x128xf32>
    %cst_95 = arith.constant 1.000000e+00 : f32
    %238 = vector.broadcast %cst_95 : f32 to vector<8x128xf32>
    %239 = arith.addf %237, %238 : vector<8x128xf32>
    %cst_96 = arith.constant 5.000000e-01 : f32
    %240 = vector.broadcast %cst_96 : f32 to vector<8x128xf32>
    %241 = arith.mulf %240, %239 : vector<8x128xf32>
    %242 = arith.mulf %231, %205 : vector<8x128xf32>
    %243 = arith.mulf %223, %233 : vector<8x128xf32>
    %244 = arith.addf %242, %243 : vector<8x128xf32>
    %245 = math.tanh %244 : vector<8x128xf32>
    %246 = arith.mulf %241, %245 : vector<8x128xf32>
    %c6_i32 = arith.constant 6 : i32
    %c8_i32_97 = arith.constant 8 : i32
    %247 = arith.muli %c6_i32, %c8_i32_97 : i32
    %248 = tpu.assume_multiple %247, 8 : i32
    %249 = arith.index_cast %248 : i32 to index
    %c0_98 = arith.constant 0 : index
    %250 = vector.load %arg12[%249, %c0_98] : memref<64x512xf32, #tpu.memory_space<vmem>>, vector<8x512xf32>
    %251 = arith.truncf %246 : vector<8x128xf32> to vector<8x128xbf16>
    %c0_99 = arith.constant 0 : index
    %c0_100 = arith.constant 0 : index
    %252 = vector.load %arg10[%c0_99, %c0_100] : memref<128x512xbf16, #tpu.memory_space<vmem>>, vector<128x512xbf16>
    %cst_101 = arith.constant dense<0.000000e+00> : vector<8x512xf32>
    %253 = tpu.matmul %251, %252, %cst_101 {dimension_numbers = #tpu.dot_dimension_numbers<[1], [0], [0], [1], [0, 0, 1, 1], [], []>} : vector<8x128xbf16>, vector<128x512xbf16>, vector<8x512xf32> -> vector<8x512xf32>
    %254 = arith.addf %250, %253 : vector<8x512xf32>
    %255 = vector.extract_strided_slice %254 {offsets = [0, 0], sizes = [8, 128], strides = [1, 1]} : vector<8x512xf32> to vector<8x128xf32>
    %cst_102 = arith.constant 5.000000e-01 : f32
    %256 = vector.broadcast %cst_102 : f32 to vector<8x128xf32>
    %257 = arith.mulf %256, %255 : vector<8x128xf32>
    %258 = math.tanh %257 : vector<8x128xf32>
    %cst_103 = arith.constant 1.000000e+00 : f32
    %259 = vector.broadcast %cst_103 : f32 to vector<8x128xf32>
    %260 = arith.addf %258, %259 : vector<8x128xf32>
    %cst_104 = arith.constant 5.000000e-01 : f32
    %261 = vector.broadcast %cst_104 : f32 to vector<8x128xf32>
    %262 = arith.mulf %261, %260 : vector<8x128xf32>
    %263 = vector.extract_strided_slice %254 {offsets = [0, 128], sizes = [8, 128], strides = [1, 1]} : vector<8x512xf32> to vector<8x128xf32>
    %cst_105 = arith.constant 5.000000e-01 : f32
    %264 = vector.broadcast %cst_105 : f32 to vector<8x128xf32>
    %265 = arith.mulf %264, %263 : vector<8x128xf32>
    %266 = math.tanh %265 : vector<8x128xf32>
    %cst_106 = arith.constant 1.000000e+00 : f32
    %267 = vector.broadcast %cst_106 : f32 to vector<8x128xf32>
    %268 = arith.addf %266, %267 : vector<8x128xf32>
    %cst_107 = arith.constant 5.000000e-01 : f32
    %269 = vector.broadcast %cst_107 : f32 to vector<8x128xf32>
    %270 = arith.mulf %269, %268 : vector<8x128xf32>
    %271 = vector.extract_strided_slice %254 {offsets = [0, 256], sizes = [8, 128], strides = [1, 1]} : vector<8x512xf32> to vector<8x128xf32>
    %272 = math.tanh %271 : vector<8x128xf32>
    %273 = vector.extract_strided_slice %254 {offsets = [0, 384], sizes = [8, 128], strides = [1, 1]} : vector<8x512xf32> to vector<8x128xf32>
    %cst_108 = arith.constant 5.000000e-01 : f32
    %274 = vector.broadcast %cst_108 : f32 to vector<8x128xf32>
    %275 = arith.mulf %274, %273 : vector<8x128xf32>
    %276 = math.tanh %275 : vector<8x128xf32>
    %cst_109 = arith.constant 1.000000e+00 : f32
    %277 = vector.broadcast %cst_109 : f32 to vector<8x128xf32>
    %278 = arith.addf %276, %277 : vector<8x128xf32>
    %cst_110 = arith.constant 5.000000e-01 : f32
    %279 = vector.broadcast %cst_110 : f32 to vector<8x128xf32>
    %280 = arith.mulf %279, %278 : vector<8x128xf32>
    %281 = arith.mulf %270, %244 : vector<8x128xf32>
    %282 = arith.mulf %262, %272 : vector<8x128xf32>
    %283 = arith.addf %281, %282 : vector<8x128xf32>
    %284 = math.tanh %283 : vector<8x128xf32>
    %285 = arith.mulf %280, %284 : vector<8x128xf32>
    %c7_i32 = arith.constant 7 : i32
    %c8_i32_111 = arith.constant 8 : i32
    %286 = arith.muli %c7_i32, %c8_i32_111 : i32
    %287 = tpu.assume_multiple %286, 8 : i32
    %288 = arith.index_cast %287 : i32 to index
    %c0_112 = arith.constant 0 : index
    %289 = vector.load %arg12[%288, %c0_112] : memref<64x512xf32, #tpu.memory_space<vmem>>, vector<8x512xf32>
    %290 = arith.truncf %285 : vector<8x128xf32> to vector<8x128xbf16>
    %c0_113 = arith.constant 0 : index
    %c0_114 = arith.constant 0 : index
    %291 = vector.load %arg10[%c0_113, %c0_114] : memref<128x512xbf16, #tpu.memory_space<vmem>>, vector<128x512xbf16>
    %cst_115 = arith.constant dense<0.000000e+00> : vector<8x512xf32>
    %292 = tpu.matmul %290, %291, %cst_115 {dimension_numbers = #tpu.dot_dimension_numbers<[1], [0], [0], [1], [0, 0, 1, 1], [], []>} : vector<8x128xbf16>, vector<128x512xbf16>, vector<8x512xf32> -> vector<8x512xf32>
    %293 = arith.addf %289, %292 : vector<8x512xf32>
    %294 = vector.extract_strided_slice %293 {offsets = [0, 0], sizes = [8, 128], strides = [1, 1]} : vector<8x512xf32> to vector<8x128xf32>
    %cst_116 = arith.constant 5.000000e-01 : f32
    %295 = vector.broadcast %cst_116 : f32 to vector<8x128xf32>
    %296 = arith.mulf %295, %294 : vector<8x128xf32>
    %297 = math.tanh %296 : vector<8x128xf32>
    %cst_117 = arith.constant 1.000000e+00 : f32
    %298 = vector.broadcast %cst_117 : f32 to vector<8x128xf32>
    %299 = arith.addf %297, %298 : vector<8x128xf32>
    %cst_118 = arith.constant 5.000000e-01 : f32
    %300 = vector.broadcast %cst_118 : f32 to vector<8x128xf32>
    %301 = arith.mulf %300, %299 : vector<8x128xf32>
    %302 = vector.extract_strided_slice %293 {offsets = [0, 128], sizes = [8, 128], strides = [1, 1]} : vector<8x512xf32> to vector<8x128xf32>
    %cst_119 = arith.constant 5.000000e-01 : f32
    %303 = vector.broadcast %cst_119 : f32 to vector<8x128xf32>
    %304 = arith.mulf %303, %302 : vector<8x128xf32>
    %305 = math.tanh %304 : vector<8x128xf32>
    %cst_120 = arith.constant 1.000000e+00 : f32
    %306 = vector.broadcast %cst_120 : f32 to vector<8x128xf32>
    %307 = arith.addf %305, %306 : vector<8x128xf32>
    %cst_121 = arith.constant 5.000000e-01 : f32
    %308 = vector.broadcast %cst_121 : f32 to vector<8x128xf32>
    %309 = arith.mulf %308, %307 : vector<8x128xf32>
    %310 = vector.extract_strided_slice %293 {offsets = [0, 256], sizes = [8, 128], strides = [1, 1]} : vector<8x512xf32> to vector<8x128xf32>
    %311 = math.tanh %310 : vector<8x128xf32>
    %312 = vector.extract_strided_slice %293 {offsets = [0, 384], sizes = [8, 128], strides = [1, 1]} : vector<8x512xf32> to vector<8x128xf32>
    %cst_122 = arith.constant 5.000000e-01 : f32
    %313 = vector.broadcast %cst_122 : f32 to vector<8x128xf32>
    %314 = arith.mulf %313, %312 : vector<8x128xf32>
    %315 = math.tanh %314 : vector<8x128xf32>
    %cst_123 = arith.constant 1.000000e+00 : f32
    %316 = vector.broadcast %cst_123 : f32 to vector<8x128xf32>
    %317 = arith.addf %315, %316 : vector<8x128xf32>
    %cst_124 = arith.constant 5.000000e-01 : f32
    %318 = vector.broadcast %cst_124 : f32 to vector<8x128xf32>
    %319 = arith.mulf %318, %317 : vector<8x128xf32>
    %320 = arith.mulf %309, %283 : vector<8x128xf32>
    %321 = arith.mulf %301, %311 : vector<8x128xf32>
    %322 = arith.addf %320, %321 : vector<8x128xf32>
    %323 = math.tanh %322 : vector<8x128xf32>
    %324 = arith.mulf %319, %323 : vector<8x128xf32>
    %c8_i32_125 = arith.constant 8 : i32
    %c0_126 = arith.constant 0 : index
    %c0_127 = arith.constant 0 : index
    %325 = vector.load %arg13[%c0_126, %c0_127] : memref<8x128xf32, #tpu.memory_space<vmem>>, vector<8x128xf32>
    tpu.vector_store %arg13[%c0_126, %c0_127], %324 {strides = array<i32>} : memref<8x128xf32, #tpu.memory_space<vmem>>, vector<8x128xf32>,
    %c0_128 = arith.constant 0 : index
    %c0_129 = arith.constant 0 : index
    %326 = vector.load %arg14[%c0_128, %c0_129] : memref<8x128xf32, #tpu.memory_space<vmem>>, vector<8x128xf32>
    tpu.vector_store %arg14[%c0_128, %c0_129], %322 {strides = array<i32>} : memref<8x128xf32, #tpu.memory_space<vmem>>, vector<8x128xf32>,
    %c0_i32_130 = arith.constant 0 : i32
    %327 = arith.cmpi eq, %arg1, %c0_i32_130 : i32
    %328 = arith.extui %327 : i1 to i32
    %c0_i32_131 = arith.constant 0 : i32
    %329 = arith.cmpi ne, %328, %c0_i32_131 : i32
    scf.if %329 {
      %c0_132 = arith.constant 0 : index
      %c0_133 = arith.constant 0 : index
      %330 = vector.load %arg13[%c0_132, %c0_133] : memref<8x128xf32, #tpu.memory_space<vmem>>, vector<8x128xf32>
      %331 = arith.truncf %330 : vector<8x128xf32> to vector<8x128xbf16>
      %c0_134 = arith.constant 0 : index
      %c0_135 = arith.constant 0 : index
      %332 = vector.load %arg6[%c0_134, %c0_135] : memref<128x128xbf16, #tpu.memory_space<vmem>>, vector<128x128xbf16>
      %cst_136 = arith.constant dense<0.000000e+00> : vector<8x128xf32>
      %333 = tpu.matmul %331, %332, %cst_136 {dimension_numbers = #tpu.dot_dimension_numbers<[1], [0], [0], [1], [0, 0, 1, 1], [], []>} : vector<8x128xbf16>, vector<128x128xbf16>, vector<8x128xf32> -> vector<8x128xf32>
      %c0_137 = arith.constant 0 : index
      %c0_138 = arith.constant 0 : index
      %334 = vector.load %arg7[%c0_137, %c0_138] : memref<1x128xf32, #tpu.memory_space<vmem>>, vector<1x128xf32>
      %335 = vector.broadcast %334 : vector<1x128xf32> to vector<8x128xf32>
      %336 = arith.addf %333, %335 : vector<8x128xf32>
      %c0_139 = arith.constant 0 : index
      %c0_140 = arith.constant 0 : index
      %337 = vector.load %arg8[%c0_139, %c0_140] : memref<8x128xf32, #tpu.memory_space<vmem>>, vector<8x128xf32>
      tpu.vector_store %arg8[%c0_139, %c0_140], %336 {strides = array<i32>} : memref<8x128xf32, #tpu.memory_space<vmem>>, vector<8x128xf32>,
    } else {
    }
    return
  }
  func.func @transform_0(%arg0: i32, %arg1: i32) -> (i32, i32, i32) {
    %c0_i32 = arith.constant 0 : i32
    %c0_i32_0 = arith.constant 0 : i32
    return %arg1, %arg0, %c0_i32 : i32, i32, i32
  }
  func.func @transform_3(%arg0: i32, %arg1: i32) -> (i32, i32) {
    %c0_i32 = arith.constant 0 : i32
    %c0_i32_0 = arith.constant 0 : i32
    %c0_i32_1 = arith.constant 0 : i32
    return %c0_i32, %c0_i32_0 : i32, i32
  }
  func.func @transform_4(%arg0: i32, %arg1: i32) -> (i32, i32) {
    %c0_i32 = arith.constant 0 : i32
    %c0_i32_0 = arith.constant 0 : i32
    %c0_i32_1 = arith.constant 0 : i32
    return %c0_i32, %c0_i32_0 : i32, i32
  }
  func.func @transform_5(%arg0: i32, %arg1: i32) -> (i32, i32) {
    %c0_i32 = arith.constant 0 : i32
    %c0_i32_0 = arith.constant 0 : i32
    %c0_i32_1 = arith.constant 0 : i32
    return %c0_i32, %c0_i32_0 : i32, i32
  }
  func.func @transform_6(%arg0: i32, %arg1: i32) -> (i32, i32) {
    %c0_i32 = arith.constant 0 : i32
    %c0_i32_0 = arith.constant 0 : i32
    return %arg0, %c0_i32 : i32, i32
  }
}

</mosaic_0001>

<bundles_post_ra>
// kernel: _forward_padded.3
= control target key start
LH: loop header
LB: loop body
LE: loop exit
PB: predicated region body
PF: predicated region fallthrough
CT: control target
= control target key end

     0   :  { %11 = vsyncpa [#allocation9], 0  ;;  %s2554_s0 = inlined_call_operand.vmem [shape: bf16[8,8,128], index: 0, kind: input, shape index: {}]   ;;  %s2555_s1 = inlined_call_operand.hbm [shape: bf16[128,512], index: 1, kind: input, shape index: {}]   ;;  %s2556_s2 = inlined_call_operand.hbm [shape: bf16[128,512], index: 2, kind: input, shape index: {}]   ;;  %s2557_s3 = inlined_call_operand.vmem [shape: f32[1,512], index: 3, kind: input, shape index: {}]   ;;  %s2558_s4 = inlined_call_operand.vmem [shape: bf16[128,128], index: 4, kind: input, shape index: {}]   ;;  %s2559_s5 = inlined_call_operand.hbm [shape: f32[1,128], index: 5, kind: input, shape index: {}]   ;;  %s2560_s6 = inlined_call_operand.hbm [shape: f32[8,128], index: 6, kind: output, shape index: {}]  }
   0x1   :  { %12 = vsyncpa [#allocation10], 0  ;;  %s24_s23 = sshll.u32 %s2559_s5, 4  ;;  %s2003_s24 = smov [#allocation8]   ;;  %s25_s23 = int_to_ptr.hbm [resolvable:$true] %s24_s23 }
   0x2   :  { %s26_s25 = sshll.u32 %s2003_s24, 4  ;;  %s27_s25 = int_to_ptr.vmem [resolvable:$true] %s26_s25 }
   0x3   :  { %29 = dma.hbm_to_vmem [thread:$0]  %s25_s23, 16, %s27_s25, [#allocation9]  }
   0x4   :  { %1995 = dma.done.wait [#allocation9], 16  }
   0x5   :  { %1996 = vsyncadd [#allocation9], 4294967280  ;;  %s45_s28 = sshll.u32 %s2555_s1, 4  ;;  %s2004_s29 = smov [#allocation2]   ;;  %s46_s28 = int_to_ptr.hbm [resolvable:$true] %s45_s28 }
   0x6   :  { %s47_s30 = sshll.u32 %s2004_s29, 4  ;;  %s59_s9 = sshll.u32 %s2556_s2, 4  ;;  %s48_s30 = int_to_ptr.vmem [resolvable:$true] %s47_s30  ;;  %s60_s9 = int_to_ptr.hbm [resolvable:$true] %s59_s9 }
   0x7   :  { %50 = dma.hbm_to_vmem [thread:$0]  %s46_s28, 4096, %s48_s30, [#allocation4] }
   0x8   :  { %s2005_s5 = smov [#allocation3]  }
   0x9   :  { %s61_s10 = sshll.u32 %s2005_s5, 4  ;;  %s62_s10 = int_to_ptr.vmem [resolvable:$true] %s61_s10 }
   0xa   :  { %64 = dma.hbm_to_vmem [thread:$0]  %s60_s9, 4096, %s62_s10, [#allocation4 + $0x1] }
   0xb   :  { %1997 = dma.done.wait [#allocation4], 4096 }
   0xc   :  { %1998 = vsyncadd [#allocation4], 4294963200 }
   0xd   :  { %1999 = dma.done.wait [#allocation4 + $0x1], 4096 }
   0xe   :  { %2000 = vsyncadd [#allocation4 + $0x1], 4294963200  ;;  %v1561_v0 = vld [vmem:[#allocation2 + $0xe0] sm:$0xf]  ;;  %v1771_v1 = vld [vmem:[#allocation2 + $0xec] sm:$0xf0] }
   0xf   :  { %v1769_v2 = vld [vmem:[#allocation2 + $0xe4] sm:$0xf]  ;;  %v1562_v3 = vor.u32 %v1771_v1, %v1561_v0  ;;  %v1563_v4 = vld [vmem:[#allocation2 + $0xf0] sm:$0xf0]  ;;  %v1569_v5 = vld [vmem:[#allocation2 + $0xe8] sm:$0xf] }
  0x10   :  { %v1772_v6 = vld [vmem:[#allocation2 + $0xf4] sm:$0xf0]  ;;  %v1566_v7 = vor.u32 %v1769_v2, %v1563_v4  ;;  %v1770_v9 = vld [vmem:[#allocation2 + $0xec] sm:$0xf]  ;;  %v1571_v10 = vld [vmem:[#allocation2 + $0xf8] sm:$0xf0] }
  0x11   :  { %v1570_v8 = vor.u32 %v1772_v6, %v1569_v5  ;;  %v1545_v11 = vld [vmem:[#allocation2 + $0xc0] sm:$0xf]  ;;  %307 = vmatpush.bf16.msra.mxu0 %v1562_v3  ;;  %v1574_v12 = vor.u32 %v1770_v9, %v1571_v10  ;;  %v1767_v13 = vld [vmem:[#allocation2 + $0xcc] sm:$0xf0]  ;;  %v1765_v14 = vld [vmem:[#allocation2 + $0xc4] sm:$0xf] }
  0x12   :  { %v1547_v15 = vld [vmem:[#allocation2 + $0xd0] sm:$0xf0]  ;;  %336 = vmatpush.bf16.msra.mxu1 %v1566_v7  ;;  %v1546_v16 = vor.u32 %v1767_v13, %v1545_v11  ;;  %v1553_v18 = vld [vmem:[#allocation2 + $0xc8] sm:$0xf]  ;;  %v1768_v19 = vld [vmem:[#allocation2 + $0xd4] sm:$0xf0] }
  0x13   :  { %365 = vmatpush.bf16.msra.mxu2 %v1570_v8  ;;  %v1550_v17 = vor.u32 %v1765_v14, %v1547_v15  ;;  %v1766_v20 = vld [vmem:[#allocation2 + $0xcc] sm:$0xf]  ;;  %394 = vmatpush.bf16.msra.mxu3 %v1574_v12  ;;  %v1554_v21 = vor.u32 %v1768_v19, %v1553_v18  ;;  %v1555_v22 = vld [vmem:[#allocation2 + $0xd8] sm:$0xf0]  ;;  %v1529_v23 = vld [vmem:[#allocation2 + $0xa0] sm:$0xf] }
  0x14   :  { %v1763_v24 = vld [vmem:[#allocation2 + $0xac] sm:$0xf0]  ;;  %v1558_v25 = vor.u32 %v1766_v20, %v1555_v22  ;;  %v1761_v26 = vld [vmem:[#allocation2 + $0xa4] sm:$0xf]  ;;  %v1531_v27 = vld [vmem:[#allocation2 + $0xb0] sm:$0xf0] }
  0x15   :  { %v1537_v28 = vld [vmem:[#allocation2 + $0xa8] sm:$0xf]  ;;  %308 = vmatpush.bf16.msra.mxu0 %v1546_v16  ;;  %v1530_v29 = vor.u32 %v1763_v24, %v1529_v23  ;;  %v1764_v30 = vld [vmem:[#allocation2 + $0xb4] sm:$0xf0]  ;;  %v1762_v31 = vld [vmem:[#allocation2 + $0xac] sm:$0xf]  ;;  %v1534_v33 = vor.u32 %v1761_v26, %v1531_v27 }
  0x16   :  { %v1539_v32 = vld [vmem:[#allocation2 + $0xb8] sm:$0xf0]  ;;  %337 = vmatpush.bf16.msra.mxu1 %v1550_v17  ;;  %v1538_v34 = vor.u32 %v1764_v30, %v1537_v28  ;;  %v1513_v35 = vld [vmem:[#allocation2 + $0x80] sm:$0xf]  ;;  %v1759_v36 = vld [vmem:[#allocation2 + $0x8c] sm:$0xf0] }
  0x17   :  { %366 = vmatpush.bf16.msra.mxu2 %v1554_v21  ;;  %v1757_v37 = vld [vmem:[#allocation2 + $0x84] sm:$0xf]  ;;  %395 = vmatpush.bf16.msra.mxu3 %v1558_v25  ;;  %v1542_v38 = vor.u32 %v1762_v31, %v1539_v32  ;;  %v1515_v39 = vld [vmem:[#allocation2 + $0x90] sm:$0xf0]  ;;  %v1521_v40 = vld [vmem:[#allocation2 + $0x88] sm:$0xf]  ;;  %v1514_v44 = vor.u32 %v1759_v36, %v1513_v35 }
  0x18   :  { %v1760_v41 = vld [vmem:[#allocation2 + $0x94] sm:$0xf0]  ;;  %v1758_v42 = vld [vmem:[#allocation2 + $0x8c] sm:$0xf]  ;;  %v1523_v43 = vld [vmem:[#allocation2 + $0x98] sm:$0xf0]  ;;  %v1518_v45 = vor.u32 %v1757_v37, %v1515_v39 }
  0x19   :  { %309 = vmatpush.bf16.msra.mxu0 %v1530_v29  ;;  %v1522_v46 = vor.u32 %v1760_v41, %v1521_v40  ;;  %v1497_v47 = vld [vmem:[#allocation2 + $0x60] sm:$0xf]  ;;  %v1755_v48 = vld [vmem:[#allocation2 + $0x6c] sm:$0xf0]  ;;  %v1753_v49 = vld [vmem:[#allocation2 + $0x64] sm:$0xf]  ;;  %v1526_v50 = vor.u32 %v1758_v42, %v1523_v43 }
  0x1a   :  { %338 = vmatpush.bf16.msra.mxu1 %v1534_v33  ;;  %v1499_v51 = vld [vmem:[#allocation2 + $0x70] sm:$0xf0]  ;;  %v1505_v52 = vld [vmem:[#allocation2 + $0x68] sm:$0xf]  ;;  %v1756_v53 = vld [vmem:[#allocation2 + $0x74] sm:$0xf0]  ;;  %v1498_v56 = vor.u32 %v1755_v48, %v1497_v47 }
  0x1b   :  { %367 = vmatpush.bf16.msra.mxu2 %v1538_v34  ;;  %396 = vmatpush.bf16.msra.mxu3 %v1542_v38  ;;  %v1754_v54 = vld [vmem:[#allocation2 + $0x6c] sm:$0xf]  ;;  %v1507_v55 = vld [vmem:[#allocation2 + $0x78] sm:$0xf0]  ;;  %v1502_v57 = vor.u32 %v1753_v49, %v1499_v51  ;;  %v1506_v58 = vor.u32 %v1756_v53, %v1505_v52  ;;  %v1481_v59 = vld [vmem:[#allocation2 + $0x40] sm:$0xf] }
  0x1c   :  { %v1751_v60 = vld [vmem:[#allocation2 + $0x4c] sm:$0xf0]  ;;  %v1749_v61 = vld [vmem:[#allocation2 + $0x44] sm:$0xf]  ;;  %v1510_v62 = vor.u32 %v1754_v54, %v1507_v55  ;;  %v1483_v63 = vld [vmem:[#allocation2 + $0x50] sm:$0xf0] }
  0x1d   :  { %310 = vmatpush.bf16.msra.mxu0 %v1514_v44  ;;  %v1489_v0 = vld [vmem:[#allocation2 + $0x48] sm:$0xf]  ;;  %v1752_v1 = vld [vmem:[#allocation2 + $0x54] sm:$0xf0]  ;;  %v1750_v2 = vld [vmem:[#allocation2 + $0x4c] sm:$0xf]  ;;  %v1482_v4 = vor.u32 %v1751_v60, %v1481_v59  ;;  %v1486_v5 = vor.u32 %v1749_v61, %v1483_v63 }
  0x1e   :  { %339 = vmatpush.bf16.msra.mxu1 %v1518_v45  ;;  %v1491_v3 = vld [vmem:[#allocation2 + $0x58] sm:$0xf0]  ;;  %v1490_v6 = vor.u32 %v1752_v1, %v1489_v0  ;;  %v1465_v7 = vld [vmem:[#allocation2 + $0x20] sm:$0xf]  ;;  %v1747_v8 = vld [vmem:[#allocation2 + $0x2c] sm:$0xf0] }
  0x1f   :  { %368 = vmatpush.bf16.msra.mxu2 %v1522_v46  ;;  %397 = vmatpush.bf16.msra.mxu3 %v1526_v50  ;;  %v1745_v9 = vld [vmem:[#allocation2 + $0x24] sm:$0xf]  ;;  %v1494_v10 = vor.u32 %v1750_v2, %v1491_v3  ;;  %v1467_v11 = vld [vmem:[#allocation2 + $0x30] sm:$0xf0]  ;;  %v1473_v12 = vld [vmem:[#allocation2 + $0x28] sm:$0xf]  ;;  %v1466_v16 = vor.u32 %v1747_v8, %v1465_v7 }
  0x20   :  { %v1748_v13 = vld [vmem:[#allocation2 + $0x34] sm:$0xf0]  ;;  %v1746_v14 = vld [vmem:[#allocation2 + $0x2c] sm:$0xf]  ;;  %v1475_v15 = vld [vmem:[#allocation2 + $0x38] sm:$0xf0]  ;;  %v1470_v18 = vor.u32 %v1745_v9, %v1467_v11 }
  0x21   :  { %311 = vmatpush.bf16.msra.mxu0 %v1498_v56  ;;  %v1449_v17 = vld [vmem:[#allocation2] sm:$0xf]  ;;  %v1474_v19 = vor.u32 %v1748_v13, %v1473_v12  ;;  %v1743_v20 = vld [vmem:[#allocation2 + $0xc] sm:$0xf0]  ;;  %v1741_v21 = vld [vmem:[#allocation2 + $0x4] sm:$0xf]  ;;  %v1478_v23 = vor.u32 %v1746_v14, %v1475_v15 }
  0x22   :  { %340 = vmatpush.bf16.msra.mxu1 %v1502_v57  ;;  %v1451_v22 = vld [vmem:[#allocation2 + $0x10] sm:$0xf0]  ;;  %v1457_v24 = vld [vmem:[#allocation2 + $0x8] sm:$0xf]  ;;  %v1744_v25 = vld [vmem:[#allocation2 + $0x14] sm:$0xf0]  ;;  %v1450_v30 = vor.u32 %v1743_v20, %v1449_v17 }
  0x23   :  { %369 = vmatpush.bf16.msra.mxu2 %v1506_v58  ;;  %398 = vmatpush.bf16.msra.mxu3 %v1510_v62  ;;  %v1742_v26 = vld [vmem:[#allocation2 + $0xc] sm:$0xf]  ;;  %v1459_v27 = vld [vmem:[#allocation2 + $0x18] sm:$0xf0]  ;;  %v1689_v28 = vld [vmem:[#allocation3 + $0xe0] sm:$0xf]  ;;  %v1454_v33 = vor.u32 %v1741_v21, %v1451_v22  ;;  %v1458_v34 = vor.u32 %v1744_v25, %v1457_v24 }
  0x24   :  { %v1803_v29 = vld [vmem:[#allocation3 + $0xec] sm:$0xf0]  ;;  %v1801_v31 = vld [vmem:[#allocation3 + $0xe4] sm:$0xf]  ;;  %v1691_v32 = vld [vmem:[#allocation3 + $0xf0] sm:$0xf0]  ;;  %v1462_v36 = vor.u32 %v1742_v26, %v1459_v27 }
  0x25   :  { %312 = vmatpush.bf16.msra.mxu0 %v1482_v4  ;;  %v1737_v35 = vld [vmem:[%s2554_s0] sm:$0xff]  ;;  %v2055_v37 = vor.u32 %v1803_v29, %v1689_v28  ;;  %v1697_v38 = vld [vmem:[#allocation3 + $0xe8] sm:$0xf]  ;;  %v1804_v39 = vld [vmem:[#allocation3 + $0xf4] sm:$0xf0]  ;;  %v2057_v41 = vor.u32 %v1801_v31, %v1691_v32  ;;  %s1401_s1 = sshll.u32 %s2560_s6, 4  ;;  %s1402_s1 = int_to_ptr.hbm [resolvable:$true] %s1401_s1 }
  0x26   :  { %341 = vmatpush.bf16.msra.mxu1 %v1486_v5  ;;  %v1802_v40 = vld [vmem:[#allocation3 + $0xec] sm:$0xf]  ;;  %v1699_v42 = vld [vmem:[#allocation3 + $0xf8] sm:$0xf0]  ;;  %v1673_v43 = vld [vmem:[#allocation3 + $0xc0] sm:$0xf]  ;;  %v2059_v47 = vor.u32 %v1804_v39, %v1697_v38 }
  0x27   :  { %370 = vmatpush.bf16.msra.mxu2 %v1490_v6  ;;  %399 = vmatpush.bf16.msra.mxu3 %v1494_v10  ;;  %v1799_v44 = vld [vmem:[#allocation3 + $0xcc] sm:$0xf0]  ;;  %v1797_v45 = vld [vmem:[#allocation3 + $0xc4] sm:$0xf]  ;;  %v1675_v46 = vld [vmem:[#allocation3 + $0xd0] sm:$0xf0]  ;;  %v2062_v49 = vor.u32 %v1802_v40, %v1699_v42 }
  0x28   :  { %v1681_v48 = vld [vmem:[#allocation3 + $0xc8] sm:$0xf]  ;;  %v2064_v50 = vor.u32 %v1799_v44, %v1673_v43  ;;  %v1800_v51 = vld [vmem:[#allocation3 + $0xd4] sm:$0xf0]  ;;  %v1798_v52 = vld [vmem:[#allocation3 + $0xcc] sm:$0xf]  ;;  %v2067_v53 = vor.u32 %v1797_v45, %v1675_v46 }
  0x29   :  { %313 = vmatpush.bf16.msra.mxu0 %v1466_v16  ;;  %v1683_v54 = vld [vmem:[#allocation3 + $0xd8] sm:$0xf0]  ;;  %v1657_v55 = vld [vmem:[#allocation3 + $0xa0] sm:$0xf]  ;;  %v1795_v56 = vld [vmem:[#allocation3 + $0xac] sm:$0xf0]  ;;  %v2070_v59 = vor.u32 %v1800_v51, %v1681_v48 }
  0x2a   :  { %342 = vmatpush.bf16.msra.mxu1 %v1470_v18  ;;  %v1793_v57 = vld [vmem:[#allocation3 + $0xa4] sm:$0xf]  ;;  %v1659_v58 = vld [vmem:[#allocation3 + $0xb0] sm:$0xf0]  ;;  %v2074_v60 = vor.u32 %v1798_v52, %v1683_v54  ;;  %v2076_v61 = vor.u32 %v1795_v56, %v1657_v55  ;;  %v1665_v62 = vld [vmem:[#allocation3 + $0xa8] sm:$0xf] }
  0x2b   :  { %371 = vmatpush.bf16.msra.mxu2 %v1474_v19  ;;  %400 = vmatpush.bf16.msra.mxu3 %v1478_v23  ;;  %v1796_v63 = vld [vmem:[#allocation3 + $0xb4] sm:$0xf0]  ;;  %v1794_v0 = vld [vmem:[#allocation3 + $0xac] sm:$0xf]  ;;  %v2079_v1 = vor.u32 %v1793_v57, %v1659_v58  ;;  %v1667_v2 = vld [vmem:[#allocation3 + $0xb8] sm:$0xf0] }
  0x2c   :  { %v1641_v3 = vld [vmem:[#allocation3 + $0x80] sm:$0xf]  ;;  %v1791_v4 = vld [vmem:[#allocation3 + $0x8c] sm:$0xf0]  ;;  %v1789_v5 = vld [vmem:[#allocation3 + $0x84] sm:$0xf]  ;;  %v2082_v7 = vor.u32 %v1796_v63, %v1665_v62  ;;  %v2086_v8 = vor.u32 %v1794_v0, %v1667_v2 }
  0x2d   :  { %314 = vmatpush.bf16.msra.mxu0 %v1450_v30  ;;  %v1643_v6 = vld [vmem:[#allocation3 + $0x90] sm:$0xf0]  ;;  %v2088_v9 = vor.u32 %v1791_v4, %v1641_v3  ;;  %v1649_v10 = vld [vmem:[#allocation3 + $0x88] sm:$0xf]  ;;  %v1792_v11 = vld [vmem:[#allocation3 + $0x94] sm:$0xf0] }
  0x2e   :  { %343 = vmatpush.bf16.msra.mxu1 %v1454_v33  ;;  %v1790_v12 = vld [vmem:[#allocation3 + $0x8c] sm:$0xf]  ;;  %v2091_v13 = vor.u32 %v1789_v5, %v1643_v6  ;;  %v1651_v14 = vld [vmem:[#allocation3 + $0x98] sm:$0xf0]  ;;  %v1625_v15 = vld [vmem:[#allocation3 + $0x60] sm:$0xf]  ;;  %v2097_v20 = vor.u32 %v1792_v11, %v1649_v10 }
  0x2f   :  { %372 = vmatpush.bf16.msra.mxu2 %v1458_v34  ;;  %401 = vmatpush.bf16.msra.mxu3 %v1462_v36  ;;  %v1787_v16 = vld [vmem:[#allocation3 + $0x6c] sm:$0xf0]  ;;  %v1785_v17 = vld [vmem:[#allocation3 + $0x64] sm:$0xf]  ;;  %v1627_v18 = vld [vmem:[#allocation3 + $0x70] sm:$0xf0]  ;;  %v2101_v21 = vor.u32 %v1790_v12, %v1651_v14 }
  0x30   :  { %315 = vmatmul.bf16.vlgmr.msra.gmra.mxu0 %v1737_v35  ;;  %v1738_v19 = vld [vmem:[%s2554_s0 + $0x8] sm:$0xff]  ;;  %v2103_v22 = vor.u32 %v1787_v16, %v1625_v15  ;;  %v1788_v24 = vld [vmem:[#allocation3 + $0x74] sm:$0xf0]  ;;  %v2106_v26 = vor.u32 %v1785_v17, %v1627_v18  ;;  %v1635_v27 = vld [vmem:[#allocation3 + $0x78] sm:$0xf0]  ;;  %v2006_v18 = vmov 0.0|0.0  }
  0x31   :  { %657 = vmatpush.bf16.msrb.mxu0 %v2055_v37  ;;  %344 = vmatmul.bf16.vlgmr.msra.gmra.mxu1 %v1737_v35  ;;  %v1633_v23 = vld [vmem:[#allocation3 + $0x68] sm:$0xf]  ;;  %v1786_v25 = vld [vmem:[#allocation3 + $0x6c] sm:$0xf]  ;;  %v1609_v28 = vld [vmem:[#allocation3 + $0x40] sm:$0xf] }
  0x32   :  { %670 = vmatpush.bf16.msrb.mxu1 %v2057_v41  ;;  %373 = vmatmul.bf16.vlgmr.msra.gmra.mxu2 %v1737_v35  ;;  %v1783_v29 = vld [vmem:[#allocation3 + $0x4c] sm:$0xf0]  ;;  %v1781_v30 = vld [vmem:[#allocation3 + $0x44] sm:$0xf]  ;;  %v1611_v31 = vld [vmem:[#allocation3 + $0x50] sm:$0xf0]  ;;  %v2109_v32 = vor.u32 %v1788_v24, %v1633_v23  ;;  %v2113_v33 = vor.u32 %v1786_v25, %v1635_v27 }
  0x33   :  { %402 = vmatmul.bf16.vlgmr.msra.gmra.mxu3 %v1737_v35  ;;  %683 = vmatpush.bf16.msrb.mxu2 %v2059_v47  ;;  %v2115_v34 = vor.u32 %v1783_v29, %v1609_v28  ;;  %v1617_v35 = vld [vmem:[#allocation3 + $0x48] sm:$0xf]  ;;  %v1784_v36 = vld [vmem:[#allocation3 + $0x54] sm:$0xf0]  ;;  %v2118_v38 = vor.u32 %v1781_v30, %v1611_v31  ;;  %v1782_v39 = vld [vmem:[#allocation3 + $0x4c] sm:$0xf] }
  0x34   :  { %696 = vmatpush.bf16.msrb.mxu3 %v2062_v49  ;;  %v1619_v40 = vld [vmem:[#allocation3 + $0x58] sm:$0xf0]  ;;  %v2121_v42 = vor.u32 %v1784_v36, %v1617_v35  ;;  %v1593_v43 = vld [vmem:[#allocation3 + $0x20] sm:$0xf]  ;;  %v1779_v44 = vld [vmem:[#allocation3 + $0x2c] sm:$0xf0] }
  0x35   :  { %658 = vmatpush.bf16.msrb.mxu0 %v2064_v50  ;;  %v1777_v45 = vld [vmem:[#allocation3 + $0x24] sm:$0xf]  ;;  %v2125_v46 = vor.u32 %v1782_v39, %v1619_v40  ;;  %v2127_v48 = vor.u32 %v1779_v44, %v1593_v43  ;;  %v1595_v51 = vld [vmem:[#allocation3 + $0x30] sm:$0xf0]  ;;  %v1601_v52 = vld [vmem:[#allocation3 + $0x28] sm:$0xf] }
  0x36   :  { %671 = vmatpush.bf16.msrb.mxu1 %v2067_v53  ;;  %v1780_v54 = vld [vmem:[#allocation3 + $0x34] sm:$0xf0]  ;;  %v2130_v55 = vor.u32 %v1777_v45, %v1595_v51  ;;  %v1778_v56 = vld [vmem:[#allocation3 + $0x2c] sm:$0xf]  ;;  %v1603_v57 = vld [vmem:[#allocation3 + $0x38] sm:$0xf0] }
  0x37   :  { %684 = vmatpush.bf16.msrb.mxu2 %v2070_v59  ;;  %v1577_v58 = vld [vmem:[#allocation3] sm:$0xf]  ;;  %v1775_v62 = vld [vmem:[#allocation3 + $0xc] sm:$0xf0]  ;;  %v1773_v63 = vld [vmem:[#allocation3 + $0x4] sm:$0xf]  ;;  %v2133_v2 = vor.u32 %v1780_v54, %v1601_v52  ;;  %v2137_v3 = vor.u32 %v1778_v56, %v1603_v57 }
  0x38   :  { %697 = vmatpush.bf16.msrb.mxu3 %v2074_v60  ;;  %v1579_v0 = vld [vmem:[#allocation3 + $0x10] sm:$0xf0]  ;;  %v2139_v4 = vor.u32 %v1775_v62, %v1577_v58  ;;  %v1585_v5 = vld [vmem:[#allocation3 + $0x8] sm:$0xf]  ;;  %v1776_v6 = vld [vmem:[#allocation3 + $0x14] sm:$0xf0] }
  0x39   :  { %659 = vmatpush.bf16.msrb.mxu0 %v2076_v61  ;;  %v2142_v10 = vor.u32 %v1773_v63, %v1579_v0  ;;  %v1774_v11 = vld [vmem:[#allocation3 + $0xc] sm:$0xf]  ;;  %v1587_v12 = vld [vmem:[#allocation3 + $0x18] sm:$0xf0]  ;;  %v2145_v14 = vor.u32 %v1776_v6, %v1585_v5  ;;  %v1739_v16 = vld [vmem:[%s2554_s0 + $0x10] sm:$0xff] }
  0x3a   :  { %672 = vmatpush.bf16.msrb.mxu1 %v2079_v1  ;;  %v2149_v15 = vor.u32 %v1774_v11, %v1587_v12  ;;  %v1740_v17 = vld [vmem:[%s2554_s0 + $0x18] sm:$0xff]  ;;  %v113_v24 = vld [vmem:[%s2557_s3] sm:$0xf] }
  0x3b   :  { %685 = vmatpush.bf16.msrb.mxu2 %v2082_v7  ;;  %v116_v27 = vperm.slane %v113_v24, 1  ;;  %v2235_v35 = vperm.slane %v113_v24, 2  ;;  %v2237_v36 = vperm.slane %v113_v24, 0  ;;  %v2239_v39 = vperm.slane %v113_v24, 3 }
  0x3c   :  { %698 = vmatpush.bf16.msrb.mxu3 %v2086_v8 }
  0x3d   :  { %660 = vmatpush.bf16.msrb.mxu0 %v2088_v9 }
  0x3e   :  { %673 = vmatpush.bf16.msrb.mxu1 %v2091_v13 }
  0x3f   :  { %686 = vmatpush.bf16.msrb.mxu2 %v2097_v20 }
  0x40   :  { %699 = vmatpush.bf16.msrb.mxu3 %v2101_v21  ;;  %320 = vmatmul.bf16.gmra.mxu0 %v1738_v19 }
  0x41   :  { %661 = vmatpush.bf16.msrb.mxu0 %v2103_v22  ;;  %349 = vmatmul.bf16.gmra.mxu1 %v1738_v19 }
  0x42   :  { %674 = vmatpush.bf16.msrb.mxu1 %v2106_v26  ;;  %378 = vmatmul.bf16.gmra.mxu2 %v1738_v19 }
  0x43   :  { %407 = vmatmul.bf16.gmra.mxu3 %v1738_v19  ;;  %687 = vmatpush.bf16.msrb.mxu2 %v2109_v32 }
  0x44   :  { %700 = vmatpush.bf16.msrb.mxu3 %v2113_v33 }
  0x45   :  { %662 = vmatpush.bf16.msrb.mxu0 %v2115_v34 }
  0x46   :  { %675 = vmatpush.bf16.msrb.mxu1 %v2118_v38 }
  0x47   :  { %688 = vmatpush.bf16.msrb.mxu2 %v2121_v42 }
  0x48   :  { %701 = vmatpush.bf16.msrb.mxu3 %v2125_v46 }
  0x49   :  { %663 = vmatpush.bf16.msrb.mxu0 %v2127_v48 }
  0x4a   :  { %676 = vmatpush.bf16.msrb.mxu1 %v2130_v55 }
  0x4b   :  { %689 = vmatpush.bf16.msrb.mxu2 %v2133_v2 }
  0x4c   :  { %702 = vmatpush.bf16.msrb.mxu3 %v2137_v3 }
  0x4d   :  { %664 = vmatpush.bf16.msrb.mxu0 %v2139_v4 }
  0x4e   :  { %677 = vmatpush.bf16.msrb.mxu1 %v2142_v10 }
  0x4f   :  { %690 = vmatpush.bf16.msrb.mxu2 %v2145_v14 }
  0x50   :  { %703 = vmatpush.bf16.msrb.mxu3 %v2149_v15  ;;  %325 = vmatmul.bf16.gmra.mxu0 %v1739_v16 }
  0x51   :  { %739 = vmatpush.bf16.msra.mxu0 %v2055_v37  ;;  %354 = vmatmul.bf16.gmra.mxu1 %v1739_v16 }
  0x52   :  { %752 = vmatpush.bf16.msra.mxu1 %v2057_v41  ;;  %383 = vmatmul.bf16.gmra.mxu2 %v1739_v16 }
  0x53   :  { %765 = vmatpush.bf16.msra.mxu2 %v2059_v47  ;;  %412 = vmatmul.bf16.gmra.mxu3 %v1739_v16 }
  0x54   :  { %778 = vmatpush.bf16.msra.mxu3 %v2062_v49 }
  0x55   :  { %740 = vmatpush.bf16.msra.mxu0 %v2064_v50 }
  0x56   :  { %753 = vmatpush.bf16.msra.mxu1 %v2067_v53 }
  0x57   :  { %766 = vmatpush.bf16.msra.mxu2 %v2070_v59 }
  0x58   :  { %779 = vmatpush.bf16.msra.mxu3 %v2074_v60 }
  0x59   :  { %741 = vmatpush.bf16.msra.mxu0 %v2076_v61 }
  0x5a   :  { %754 = vmatpush.bf16.msra.mxu1 %v2079_v1 }
  0x5b   :  { %767 = vmatpush.bf16.msra.mxu2 %v2082_v7 }
  0x5c   :  { %780 = vmatpush.bf16.msra.mxu3 %v2086_v8 }
  0x5d   :  { %742 = vmatpush.bf16.msra.mxu0 %v2088_v9 }
  0x5e   :  { %755 = vmatpush.bf16.msra.mxu1 %v2091_v13 }
  0x5f   :  { %768 = vmatpush.bf16.msra.mxu2 %v2097_v20 }
  0x60   :  { %781 = vmatpush.bf16.msra.mxu3 %v2101_v21  ;;  %330 = vmatmul.bf16.gmra.mxu0 %v1740_v17 }
  0x61   :  { %743 = vmatpush.bf16.msra.mxu0 %v2103_v22  ;;  %359 = vmatmul.bf16.gmra.mxu1 %v1740_v17 }
  0x62   :  { %756 = vmatpush.bf16.msra.mxu1 %v2106_v26  ;;  %388 = vmatmul.bf16.gmra.mxu2 %v1740_v17 }
  0x63   :  { %769 = vmatpush.bf16.msra.mxu2 %v2109_v32  ;;  %417 = vmatmul.bf16.gmra.mxu3 %v1740_v17 }
  0x64   :  { %782 = vmatpush.bf16.msra.mxu3 %v2113_v33 }
  0x65   :  { %744 = vmatpush.bf16.msra.mxu0 %v2115_v34 }
  0x66   :  { %757 = vmatpush.bf16.msra.mxu1 %v2118_v38 }
  0x67   :  { %770 = vmatpush.bf16.msra.mxu2 %v2121_v42 }
  0x68   :  { %783 = vmatpush.bf16.msra.mxu3 %v2125_v46 }
  0x69   :  { %745 = vmatpush.bf16.msra.mxu0 %v2127_v48 }
  0x6a   :  { %758 = vmatpush.bf16.msra.mxu1 %v2130_v55 }
  0x6b   :  { %771 = vmatpush.bf16.msra.mxu2 %v2133_v2 }
  0x6c   :  { %784 = vmatpush.bf16.msra.mxu3 %v2137_v3 }
  0x6d   :  { %746 = vmatpush.bf16.msra.mxu0 %v2139_v4 }
  0x6e   :  { %759 = vmatpush.bf16.msra.mxu1 %v2142_v10 }
  0x6f   :  { %772 = vmatpush.bf16.msra.mxu2 %v2145_v14 }
  0x70   :  { %785 = vmatpush.bf16.msra.mxu3 %v2149_v15  ;;  %665 = vmatmul.bf16.vlgmr.msrb.gmra.mxu0 %v2006_v18 }
  0x71   :  { %678 = vmatmul.bf16.vlgmr.msrb.gmra.mxu1 %v2006_v18  ;;  %821 = vmatpush.bf16.msrb.mxu0 %v2055_v37 }
  0x72   :  { %691 = vmatmul.bf16.vlgmr.msrb.gmra.mxu2 %v2006_v18  ;;  %834 = vmatpush.bf16.msrb.mxu1 %v2057_v41 }
  0x73   :  { %704 = vmatmul.bf16.vlgmr.msrb.gmra.mxu3 %v2006_v18  ;;  %847 = vmatpush.bf16.msrb.mxu2 %v2059_v47 }
  0x74   :  { %860 = vmatpush.bf16.msrb.mxu3 %v2062_v49 }
  0x75   :  { %822 = vmatpush.bf16.msrb.mxu0 %v2064_v50 }
  0x76   :  { %835 = vmatpush.bf16.msrb.mxu1 %v2067_v53 }
  0x77   :  { %848 = vmatpush.bf16.msrb.mxu2 %v2070_v59 }
  0x78   :  { %861 = vmatpush.bf16.msrb.mxu3 %v2074_v60 }
  0x79   :  { %823 = vmatpush.bf16.msrb.mxu0 %v2076_v61 }
  0x7a   :  { %836 = vmatpush.bf16.msrb.mxu1 %v2079_v1 }
  0x7b   :  { %849 = vmatpush.bf16.msrb.mxu2 %v2082_v7 }
  0x7c   :  { %862 = vmatpush.bf16.msrb.mxu3 %v2086_v8 }
  0x7d   :  { %824 = vmatpush.bf16.msrb.mxu0 %v2088_v9 }
  0x7e   :  { %837 = vmatpush.bf16.msrb.mxu1 %v2091_v13 }
  0x7f   :  { %850 = vmatpush.bf16.msrb.mxu2 %v2097_v20 }
  0x80   :  { %863 = vmatpush.bf16.msrb.mxu3 %v2101_v21 }
  0x81   :  { %825 = vmatpush.bf16.msrb.mxu0 %v2103_v22 }
  0x82   :  { %838 = vmatpush.bf16.msrb.mxu1 %v2106_v26 }
  0x83   :  { %851 = vmatpush.bf16.msrb.mxu2 %v2109_v32 }
  0x84   :  { %864 = vmatpush.bf16.msrb.mxu3 %v2113_v33 }
  0x85   :  { %826 = vmatpush.bf16.msrb.mxu0 %v2115_v34 }
  0x86   :  { %839 = vmatpush.bf16.msrb.mxu1 %v2118_v38 }
  0x87   :  { %852 = vmatpush.bf16.msrb.mxu2 %v2121_v42 }
  0x88   :  { %865 = vmatpush.bf16.msrb.mxu3 %v2125_v46 }
  0x89   :  { %827 = vmatpush.bf16.msrb.mxu0 %v2127_v48 }
  0x8a   :  { %840 = vmatpush.bf16.msrb.mxu1 %v2130_v55 }
  0x8b   :  { %853 = vmatpush.bf16.msrb.mxu2 %v2133_v2 }
  0x8c   :  { %866 = vmatpush.bf16.msrb.mxu3 %v2137_v3 }
  0x8d   :  { %828 = vmatpush.bf16.msrb.mxu0 %v2139_v4 }
  0x8e   :  { %841 = vmatpush.bf16.msrb.mxu1 %v2142_v10 }
  0x8f   :  { %854 = vmatpush.bf16.msrb.mxu2 %v2145_v14 }
  0x90   :  { %867 = vmatpush.bf16.msrb.mxu3 %v2149_v15 }
  0xad   :  { %v316_v19 = vpop.f32.mrf.mxu0 }
  0xae   :  { %v345_v23 = vpop.f32.mrf.mxu1 }
  0xb5   :  { %v2227_v25 = vpop.f32.mrf.mxu2  ;;  %v2231_v29 = vpop.f32.mrf.mxu0 }
  0xb6   :  { %v2229_v28 = vpop.f32.mrf.mxu3  ;;  %v347_v30 = vpop.f32.mrf.mxu1 }
  0xb7   :  { %v2233_v31 = vadd.f32 %v347_v30, %v116_v27 }
  0xbd   :  { %v376_v40 = vpop.f32.mrf.mxu2  ;;  %v321_v45 = vpop.f32.mrf.mxu0 }
  0xbe   :  { %v2242_v43 = vadd.f32 %v376_v40, %v2235_v35  ;;  %v405_v44 = vpop.f32.mrf.mxu3  ;;  %v2248_v52 = vadd.f32 %v321_v45, %v2237_v36  ;;  %v350_v54 = vpop.f32.mrf.mxu1 }
  0xbf   :  { %v2245_v51 = vadd.f32 %v405_v44, %v2239_v39  ;;  %v2250_v56 = vadd.f32 %v350_v54, %v116_v27 }
  0xc5   :  { %v379_v57 = vpop.f32.mrf.mxu2  ;;  %v323_v63 = vpop.f32.mrf.mxu0 }
  0xc6   :  { %v2253_v58 = vadd.f32 %v379_v57, %v2235_v35  ;;  %v408_v62 = vpop.f32.mrf.mxu3  ;;  %v2259_v5 = vadd.f32 %v323_v63, %v2237_v36  ;;  %v352_v6 = vpop.f32.mrf.mxu1 }
  0xc7   :  { %v2256_v0 = vadd.f32 %v408_v62, %v2239_v39  ;;  %v2261_v11 = vadd.f32 %v352_v6, %v116_v27 }
  0xcd   :  { %v381_v12 = vpop.f32.mrf.mxu2  ;;  %v326_v18 = vpop.f32.mrf.mxu0 }
  0xce   :  { %v2264_v16 = vadd.f32 %v381_v12, %v2235_v35  ;;  %v410_v17 = vpop.f32.mrf.mxu3  ;;  %v2270_v30 = vadd.f32 %v326_v18, %v2237_v36  ;;  %v355_v40 = vpop.f32.mrf.mxu1 }
  0xcf   :  { %v2267_v24 = vadd.f32 %v410_v17, %v2239_v39  ;;  %v2272_v44 = vadd.f32 %v355_v40, %v116_v27 }
  0xd0   :  { %2561 = vst [vmem:[#allocation22_spill] sm:$0xff] %v2264_v16 }
  0xd1   :  { %2562 = vst [vmem:[#allocation23_spill] sm:$0xff] %v2267_v24 }
  0xd2   :  { %2563 = vst [vmem:[#allocation24_spill] sm:$0xff] %v2270_v30 }
  0xd3   :  { %2564 = vst [vmem:[#allocation25_spill] sm:$0xff] %v2272_v44 }
  0xd5   :  { %v384_v45 = vpop.f32.mrf.mxu2  ;;  %v328_v62 = vpop.f32.mrf.mxu0 }
  0xd6   :  { %v2275_v54 = vadd.f32 %v384_v45, %v2235_v35  ;;  %v413_v57 = vpop.f32.mrf.mxu3  ;;  %v2281_v6 = vadd.f32 %v328_v62, %v2237_v36  ;;  %v357_v12 = vpop.f32.mrf.mxu1 }
  0xd7   :  { %v2278_v63 = vadd.f32 %v413_v57, %v2239_v39  ;;  %v2283_v17 = vadd.f32 %v357_v12, %v116_v27 }
  0xd8   :  { %2565 = vst [vmem:[#allocation26_spill] sm:$0xff] %v2275_v54 }
  0xd9   :  { %2566 = vst [vmem:[#allocation27_spill] sm:$0xff] %v2278_v63 }
  0xda   :  { %2567 = vst [vmem:[#allocation28_spill] sm:$0xff] %v2281_v6 }
  0xdb   :  { %2568 = vst [vmem:[#allocation29_spill] sm:$0xff] %v2283_v17 }
  0xdd   :  { %v386_v18 = vpop.f32.mrf.mxu2  ;;  %v331_v44 = vpop.f32.mrf.mxu0 }
  0xde   :  { %v2286_v30 = vadd.f32 %v386_v18, %v2235_v35  ;;  %v415_v40 = vpop.f32.mrf.mxu3  ;;  %v2292_v54 = vadd.f32 %v331_v44, %v2237_v36  ;;  %v360_v57 = vpop.f32.mrf.mxu1  ;;  %v317_v44 = vadd.f32 %v316_v19, %v2237_v36  ;;  %v404_v19 = vadd.f32 %v2229_v28, %v2239_v39 }
  0xdf   :  { %v2289_v45 = vadd.f32 %v415_v40, %v2239_v39  ;;  %v2294_v63 = vadd.f32 %v360_v57, %v116_v27  ;;  %v346_v57 = vadd.f32 %v345_v23, %v116_v27 }
  0xe0   :  { %2569 = vst [vmem:[#allocation30_spill] sm:$0xff] %v2286_v30 }
  0xe1   :  { %2570 = vst [vmem:[#allocation31_spill] sm:$0xff] %v2289_v45 }
  0xe2   :  { %2571 = vst [vmem:[#allocation32_spill] sm:$0xff] %v2292_v54 }
  0xe3   :  { %2572 = vst [vmem:[#allocation33_spill] sm:$0xff] %v2294_v63 }
  0xe5   :  { %v389_v62 = vpop.f32.mrf.mxu2  ;;  %v333_v17 = vpop.f32.mrf.mxu0 }
  0xe6   :  { %v2297_v6 = vadd.f32 %v389_v62, %v2235_v35  ;;  %v418_v12 = vpop.f32.mrf.mxu3  ;;  %v2303_v30 = vadd.f32 %v333_v17, %v2237_v36  ;;  %v362_v40 = vpop.f32.mrf.mxu1 }
  0xe7   :  { %v2300_v18 = vadd.f32 %v418_v12, %v2239_v39  ;;  %v2305_v45 = vadd.f32 %v362_v40, %v116_v27  ;;  %v375_v40 = vadd.f32 %v2227_v25, %v2235_v35 }
  0xe8   :  { %2573 = vst [vmem:[#allocation34_spill] sm:$0xff] %v2297_v6 }
  0xe9   :  { %2574 = vst [vmem:[#allocation35_spill] sm:$0xff] %v2300_v18 }
  0xea   :  { %2575 = vst [vmem:[#allocation36_spill] sm:$0xff] %v2303_v30 }
  0xeb   :  { %2576 = vst [vmem:[#allocation37_spill] sm:$0xff] %v2305_v45 }
  0xed   :  { %v391_v54 = vpop.f32.mrf.mxu2  ;;  %v666_v6 = vpop.f32.mrf.mxu0 }
  0xee   :  { %v2309_v63 = vadd.f32 %v391_v54, %v2235_v35  ;;  %v420_v62 = vpop.f32.mrf.mxu3  ;;  %v709_v12 = vadd.f32 %v666_v6, %v317_v44  ;;  %v679_v18 = vpop.f32.mrf.mxu1 }
  0xef   :  { %v2312_v24 = vadd.f32 %v420_v62, %v2239_v39  ;;  %v710_v16 = vadd.f32 %v679_v18, %v346_v57 }
  0xf0   :  { %2577 = vst [vmem:[#allocation38_spill] sm:$0xff] %v2309_v63  ;;  %v713_v17 = vmul.f32 0.5, %v709_v12 }
  0xf1   :  { %2578 = vst [vmem:[#allocation39_spill] sm:$0xff] %v2312_v24  ;;  %v717_v30 = vmul.f32 0.5, %v710_v16 }
  0xf2   :  { %1819 = vtanh.f32 %v713_v17 }
  0xf3   :  { %1821 = vtanh.f32 %v717_v30 }
  0xf5   :  { %v692_v23 = vpop.f32.mrf.mxu2  ;;  %v668_v63 = vpop.f32.mrf.mxu0 }
  0xf6   :  { %v711_v27 = vadd.f32 %v692_v23, %v375_v40  ;;  %v705_v54 = vpop.f32.mrf.mxu3  ;;  %v681_v62 = vpop.f32.mrf.mxu1 }
  0xf7   :  { %v712_v45 = vadd.f32 %v705_v54, %v404_v19 }
  0xf8   :  { %1823 = vtanh.f32 %v711_v27  ;;  %v1820_v6 = vpop.eup %1819 }
  0xf9   :  { %v722_v44 = vmul.f32 0.5, %v712_v45  ;;  %v1822_v18 = vpop.eup %1821  ;;  %v715_v57 = vadd.f32 1.0, %v1820_v6 }
  0xfa   :  { %v719_v16 = vadd.f32 1.0, %v1822_v18 }
  0xfb   :  { %1825 = vtanh.f32 %v722_v44  ;;  %v716_v12 = vmul.f32 0.5, %v715_v57 }
  0xfc   :  { %v720_v17 = vmul.f32 0.5, %v719_v16 }
  0xfd   :  { %v694_v25 = vpop.f32.mrf.mxu2 }
  0xfe   :  { %v1824_v35 = vpop.eup %1823  ;;  %v707_v30 = vpop.f32.mrf.mxu3  ;;  %v726_v24 = vmul.f32 0.0, %v720_v17 }
  0xff   :  { %v727_v28 = vmul.f32 %v1824_v35, %v716_v12 }
 0x101   :  { %v1826_v39 = vpop.eup %1825  ;;  %v2318_v40 = vadd.f32 %v727_v28, %v726_v24  ;;  %v319_v24 = vadd.f32 %v2231_v29, %v2237_v36 }
 0x102   :  { %v724_v63 = vadd.f32 1.0, %v1826_v39 }
 0x103   :  { %1827 = vtanh.f32 %v2318_v40 }
 0x104   :  { %v725_v19 = vmul.f32 0.5, %v724_v63 }
 0x109   :  { %v1828_v23 = vpop.eup %1827 }
 0x10a   :  { %v730_v45 = vmul.f32 %v1828_v23, %v725_v19 }
 0x10c   :  { %v738_v27 = vpack.c.bf16 %v730_v45, %v730_v45 }
 0x10e   :  { %747 = vmatmul.bf16.vlgmr.msra.gmra.mxu0 %v738_v27  ;;  %760 = vmatmul.bf16.vlgmr.msra.gmra.mxu1 %v738_v27 }
 0x10f   :  { %773 = vmatmul.bf16.vlgmr.msra.gmra.mxu2 %v738_v27  ;;  %786 = vmatmul.bf16.vlgmr.msra.gmra.mxu3 %v738_v27 }
 0x110   :  { %903 = vmatpush.bf16.msra.mxu0 %v2055_v37  ;;  %916 = vmatpush.bf16.msra.mxu1 %v2057_v41 }
 0x111   :  { %929 = vmatpush.bf16.msra.mxu2 %v2059_v47  ;;  %942 = vmatpush.bf16.msra.mxu3 %v2062_v49 }
 0x114   :  { %904 = vmatpush.bf16.msra.mxu0 %v2064_v50  ;;  %917 = vmatpush.bf16.msra.mxu1 %v2067_v53 }
 0x115   :  { %930 = vmatpush.bf16.msra.mxu2 %v2070_v59  ;;  %943 = vmatpush.bf16.msra.mxu3 %v2074_v60 }
 0x118   :  { %905 = vmatpush.bf16.msra.mxu0 %v2076_v61  ;;  %918 = vmatpush.bf16.msra.mxu1 %v2079_v1 }
 0x119   :  { %931 = vmatpush.bf16.msra.mxu2 %v2082_v7  ;;  %944 = vmatpush.bf16.msra.mxu3 %v2086_v8 }
 0x11c   :  { %906 = vmatpush.bf16.msra.mxu0 %v2088_v9  ;;  %919 = vmatpush.bf16.msra.mxu1 %v2091_v13 }
 0x11d   :  { %932 = vmatpush.bf16.msra.mxu2 %v2097_v20  ;;  %945 = vmatpush.bf16.msra.mxu3 %v2101_v21 }
 0x120   :  { %907 = vmatpush.bf16.msra.mxu0 %v2103_v22  ;;  %920 = vmatpush.bf16.msra.mxu1 %v2106_v26 }
 0x121   :  { %933 = vmatpush.bf16.msra.mxu2 %v2109_v32  ;;  %946 = vmatpush.bf16.msra.mxu3 %v2113_v33 }
 0x124   :  { %908 = vmatpush.bf16.msra.mxu0 %v2115_v34  ;;  %921 = vmatpush.bf16.msra.mxu1 %v2118_v38 }
 0x125   :  { %934 = vmatpush.bf16.msra.mxu2 %v2121_v42  ;;  %947 = vmatpush.bf16.msra.mxu3 %v2125_v46 }
 0x128   :  { %909 = vmatpush.bf16.msra.mxu0 %v2127_v48  ;;  %922 = vmatpush.bf16.msra.mxu1 %v2130_v55 }
 0x129   :  { %935 = vmatpush.bf16.msra.mxu2 %v2133_v2  ;;  %948 = vmatpush.bf16.msra.mxu3 %v2137_v3 }
 0x12c   :  { %910 = vmatpush.bf16.msra.mxu0 %v2139_v4  ;;  %923 = vmatpush.bf16.msra.mxu1 %v2142_v10 }
 0x12d   :  { %936 = vmatpush.bf16.msra.mxu2 %v2145_v14  ;;  %949 = vmatpush.bf16.msra.mxu3 %v2149_v15 }
 0x18b   :  { %v748_v54 = vpop.f32.mrf.mxu0  ;;  %v761_v62 = vpop.f32.mrf.mxu1 }
 0x18c   :  { %v791_v6 = vadd.f32 %v748_v54, %v319_v24  ;;  %v792_v44 = vadd.f32 %v761_v62, %v2233_v31 }
 0x18e   :  { %v795_v18 = vmul.f32 0.5, %v791_v6  ;;  %v799_v57 = vmul.f32 0.5, %v792_v44 }
 0x190   :  { %1829 = vtanh.f32 %v795_v18 }
 0x191   :  { %1831 = vtanh.f32 %v799_v57 }
 0x192   :  { %v774_v16 = vpop.f32.mrf.mxu2  ;;  %v787_v12 = vpop.f32.mrf.mxu3 }
 0x193   :  { %v793_v17 = vadd.f32 %v774_v16, %v2242_v43  ;;  %v794_v25 = vadd.f32 %v787_v12, %v2245_v51  ;;  %v750_v35 = vpop.f32.mrf.mxu0  ;;  %v763_v30 = vpop.f32.mrf.mxu1 }
 0x195   :  { %1833 = vtanh.f32 %v793_v17  ;;  %v804_v28 = vmul.f32 0.5, %v794_v25 }
 0x196   :  { %v1830_v29 = vpop.eup %1829 }
 0x197   :  { %v1832_v36 = vpop.eup %1831  ;;  %v797_v39 = vadd.f32 1.0, %v1830_v29  ;;  %1835 = vtanh.f32 %v804_v28 }
 0x198   :  { %v801_v63 = vadd.f32 1.0, %v1832_v36 }
 0x199   :  { %v798_v31 = vmul.f32 0.5, %v797_v39 }
 0x19a   :  { %v802_v19 = vmul.f32 0.5, %v801_v63  ;;  %v776_v23 = vpop.f32.mrf.mxu2  ;;  %v789_v45 = vpop.f32.mrf.mxu3 }
 0x19b   :  { %v1834_v27 = vpop.eup %1833 }
 0x19c   :  { %v808_v24 = vmul.f32 %v802_v19, %v2318_v40  ;;  %v809_v54 = vmul.f32 %v1834_v27, %v798_v31 }
 0x19d   :  { %v1836_v43 = vpop.eup %1835 }
 0x19e   :  { %v2359_v62 = vadd.f32 %v809_v54, %v808_v24  ;;  %v806_v51 = vadd.f32 1.0, %v1836_v43 }
 0x1a0   :  { %1837 = vtanh.f32 %v2359_v62  ;;  %v807_v6 = vmul.f32 0.5, %v806_v51 }
 0x1a6   :  { %v1838_v44 = vpop.eup %1837 }
 0x1a7   :  { %v812_v18 = vmul.f32 %v1838_v44, %v807_v6 }
 0x1a9   :  { %v820_v57 = vpack.c.bf16 %v812_v18, %v812_v18 }
 0x1ab   :  { %829 = vmatmul.bf16.vlgmr.msrb.gmra.mxu0 %v820_v57  ;;  %842 = vmatmul.bf16.vlgmr.msrb.gmra.mxu1 %v820_v57 }
 0x1ac   :  { %855 = vmatmul.bf16.vlgmr.msrb.gmra.mxu2 %v820_v57  ;;  %868 = vmatmul.bf16.vlgmr.msrb.gmra.mxu3 %v820_v57 }
 0x1ad   :  { %985 = vmatpush.bf16.msrb.mxu0 %v2055_v37  ;;  %998 = vmatpush.bf16.msrb.mxu1 %v2057_v41 }
 0x1ae   :  { %1011 = vmatpush.bf16.msrb.mxu2 %v2059_v47  ;;  %1024 = vmatpush.bf16.msrb.mxu3 %v2062_v49 }
 0x1b1   :  { %986 = vmatpush.bf16.msrb.mxu0 %v2064_v50  ;;  %999 = vmatpush.bf16.msrb.mxu1 %v2067_v53 }
 0x1b2   :  { %1012 = vmatpush.bf16.msrb.mxu2 %v2070_v59  ;;  %1025 = vmatpush.bf16.msrb.mxu3 %v2074_v60 }
 0x1b5   :  { %987 = vmatpush.bf16.msrb.mxu0 %v2076_v61  ;;  %1000 = vmatpush.bf16.msrb.mxu1 %v2079_v1 }
 0x1b6   :  { %1013 = vmatpush.bf16.msrb.mxu2 %v2082_v7  ;;  %1026 = vmatpush.bf16.msrb.mxu3 %v2086_v8 }
 0x1b9   :  { %988 = vmatpush.bf16.msrb.mxu0 %v2088_v9  ;;  %1001 = vmatpush.bf16.msrb.mxu1 %v2091_v13 }
 0x1ba   :  { %1014 = vmatpush.bf16.msrb.mxu2 %v2097_v20  ;;  %1027 = vmatpush.bf16.msrb.mxu3 %v2101_v21 }
 0x1bd   :  { %989 = vmatpush.bf16.msrb.mxu0 %v2103_v22  ;;  %1002 = vmatpush.bf16.msrb.mxu1 %v2106_v26 }
 0x1be   :  { %1015 = vmatpush.bf16.msrb.mxu2 %v2109_v32  ;;  %1028 = vmatpush.bf16.msrb.mxu3 %v2113_v33 }
 0x1c1   :  { %990 = vmatpush.bf16.msrb.mxu0 %v2115_v34  ;;  %1003 = vmatpush.bf16.msrb.mxu1 %v2118_v38 }
 0x1c2   :  { %1016 = vmatpush.bf16.msrb.mxu2 %v2121_v42  ;;  %1029 = vmatpush.bf16.msrb.mxu3 %v2125_v46 }
 0x1c5   :  { %991 = vmatpush.bf16.msrb.mxu0 %v2127_v48  ;;  %1004 = vmatpush.bf16.msrb.mxu1 %v2130_v55 }
 0x1c6   :  { %1017 = vmatpush.bf16.msrb.mxu2 %v2133_v2  ;;  %1030 = vmatpush.bf16.msrb.mxu3 %v2137_v3 }
 0x1c9   :  { %992 = vmatpush.bf16.msrb.mxu0 %v2139_v4  ;;  %1005 = vmatpush.bf16.msrb.mxu1 %v2142_v10 }
 0x1ca   :  { %1018 = vmatpush.bf16.msrb.mxu2 %v2145_v14  ;;  %1031 = vmatpush.bf16.msrb.mxu3 %v2149_v15 }
 0x228   :  { %v830_v40 = vpop.f32.mrf.mxu0  ;;  %v843_v16 = vpop.f32.mrf.mxu1 }
 0x229   :  { %v873_v12 = vadd.f32 %v830_v40, %v2248_v52  ;;  %v874_v17 = vadd.f32 %v843_v16, %v2250_v56 }
 0x22b   :  { %v877_v25 = vmul.f32 0.5, %v873_v12  ;;  %v881_v35 = vmul.f32 0.5, %v874_v17 }
 0x22d   :  { %1839 = vtanh.f32 %v877_v25 }
 0x22e   :  { %1841 = vtanh.f32 %v881_v35 }
 0x22f   :  { %v856_v30 = vpop.f32.mrf.mxu2  ;;  %v869_v28 = vpop.f32.mrf.mxu3 }
 0x230   :  { %v875_v29 = vadd.f32 %v856_v30, %v2253_v58  ;;  %v876_v36 = vadd.f32 %v869_v28, %v2256_v0  ;;  %v832_v39 = vpop.f32.mrf.mxu0  ;;  %v845_v63 = vpop.f32.mrf.mxu1 }
 0x231   :  { %v2580_v63 = vld [vmem:[#allocation23_spill] sm:$0xff] }
 0x232   :  { %1843 = vtanh.f32 %v875_v29  ;;  %v886_v31 = vmul.f32 0.5, %v876_v36  ;;  %v2579_v36 = vld [vmem:[#allocation22_spill] sm:$0xff] }
 0x233   :  { %v1840_v19 = vpop.eup %1839 }
 0x234   :  { %v1842_v23 = vpop.eup %1841  ;;  %v879_v45 = vadd.f32 1.0, %v1840_v19  ;;  %1845 = vtanh.f32 %v886_v31 }
 0x235   :  { %v883_v52 = vadd.f32 1.0, %v1842_v23 }
 0x236   :  { %v880_v56 = vmul.f32 0.5, %v879_v45 }
 0x237   :  { %v884_v27 = vmul.f32 0.5, %v883_v52  ;;  %v858_v24 = vpop.f32.mrf.mxu2  ;;  %v871_v54 = vpop.f32.mrf.mxu3 }
 0x238   :  { %v1844_v43 = vpop.eup %1843 }
 0x239   :  { %v890_v51 = vmul.f32 %v884_v27, %v2359_v62  ;;  %v891_v6 = vmul.f32 %v1844_v43, %v880_v56 }
 0x23a   :  { %v1846_v58 = vpop.eup %1845 }
 0x23b   :  { %v2399_v44 = vadd.f32 %v891_v6, %v890_v51  ;;  %v888_v0 = vadd.f32 1.0, %v1846_v58 }
 0x23d   :  { %1847 = vtanh.f32 %v2399_v44  ;;  %v889_v18 = vmul.f32 0.5, %v888_v0 }
 0x243   :  { %v1848_v57 = vpop.eup %1847 }
 0x244   :  { %v894_v40 = vmul.f32 %v1848_v57, %v889_v18 }
 0x246   :  { %v902_v16 = vpack.c.bf16 %v894_v40, %v894_v40 }
 0x248   :  { %911 = vmatmul.bf16.vlgmr.msra.gmra.mxu0 %v902_v16  ;;  %924 = vmatmul.bf16.vlgmr.msra.gmra.mxu1 %v902_v16 }
 0x249   :  { %937 = vmatmul.bf16.vlgmr.msra.gmra.mxu2 %v902_v16  ;;  %950 = vmatmul.bf16.vlgmr.msra.gmra.mxu3 %v902_v16 }
 0x24a   :  { %1067 = vmatpush.bf16.msra.mxu0 %v2055_v37  ;;  %1080 = vmatpush.bf16.msra.mxu1 %v2057_v41 }
 0x24b   :  { %1093 = vmatpush.bf16.msra.mxu2 %v2059_v47  ;;  %1106 = vmatpush.bf16.msra.mxu3 %v2062_v49 }
 0x24e   :  { %1068 = vmatpush.bf16.msra.mxu0 %v2064_v50  ;;  %1081 = vmatpush.bf16.msra.mxu1 %v2067_v53 }
 0x24f   :  { %1094 = vmatpush.bf16.msra.mxu2 %v2070_v59  ;;  %1107 = vmatpush.bf16.msra.mxu3 %v2074_v60 }
 0x252   :  { %1069 = vmatpush.bf16.msra.mxu0 %v2076_v61  ;;  %1082 = vmatpush.bf16.msra.mxu1 %v2079_v1 }
 0x253   :  { %1095 = vmatpush.bf16.msra.mxu2 %v2082_v7  ;;  %1108 = vmatpush.bf16.msra.mxu3 %v2086_v8 }
 0x256   :  { %1070 = vmatpush.bf16.msra.mxu0 %v2088_v9  ;;  %1083 = vmatpush.bf16.msra.mxu1 %v2091_v13 }
 0x257   :  { %1096 = vmatpush.bf16.msra.mxu2 %v2097_v20  ;;  %1109 = vmatpush.bf16.msra.mxu3 %v2101_v21 }
 0x25a   :  { %1071 = vmatpush.bf16.msra.mxu0 %v2103_v22  ;;  %1084 = vmatpush.bf16.msra.mxu1 %v2106_v26 }
 0x25b   :  { %1097 = vmatpush.bf16.msra.mxu2 %v2109_v32  ;;  %1110 = vmatpush.bf16.msra.mxu3 %v2113_v33 }
 0x25e   :  { %1072 = vmatpush.bf16.msra.mxu0 %v2115_v34  ;;  %1085 = vmatpush.bf16.msra.mxu1 %v2118_v38 }
 0x25f   :  { %1098 = vmatpush.bf16.msra.mxu2 %v2121_v42  ;;  %1111 = vmatpush.bf16.msra.mxu3 %v2125_v46 }
 0x262   :  { %1073 = vmatpush.bf16.msra.mxu0 %v2127_v48  ;;  %1086 = vmatpush.bf16.msra.mxu1 %v2130_v55 }
 0x263   :  { %1099 = vmatpush.bf16.msra.mxu2 %v2133_v2  ;;  %1112 = vmatpush.bf16.msra.mxu3 %v2137_v3 }
 0x266   :  { %1074 = vmatpush.bf16.msra.mxu0 %v2139_v4  ;;  %1087 = vmatpush.bf16.msra.mxu1 %v2142_v10 }
 0x267   :  { %1100 = vmatpush.bf16.msra.mxu2 %v2145_v14  ;;  %1113 = vmatpush.bf16.msra.mxu3 %v2149_v15 }
 0x2c5   :  { %v912_v62 = vpop.f32.mrf.mxu0  ;;  %v925_v12 = vpop.f32.mrf.mxu1 }
 0x2c6   :  { %v955_v17 = vadd.f32 %v912_v62, %v2259_v5  ;;  %v956_v25 = vadd.f32 %v925_v12, %v2261_v11 }
 0x2c8   :  { %v959_v35 = vmul.f32 0.5, %v955_v17  ;;  %v963_v30 = vmul.f32 0.5, %v956_v25  ;;  %v2581_v25 = vld [vmem:[#allocation24_spill] sm:$0xff] }
 0x2ca   :  { %1849 = vtanh.f32 %v959_v35 }
 0x2cb   :  { %1851 = vtanh.f32 %v963_v30  ;;  %v2582_v30 = vld [vmem:[#allocation25_spill] sm:$0xff] }
 0x2cc   :  { %v938_v28 = vpop.f32.mrf.mxu2  ;;  %v951_v29 = vpop.f32.mrf.mxu3 }
 0x2cd   :  { %v957_v39 = vadd.f32 %v938_v28, %v2579_v36  ;;  %v958_v31 = vadd.f32 %v951_v29, %v2580_v63  ;;  %v914_v19 = vpop.f32.mrf.mxu0  ;;  %v927_v23 = vpop.f32.mrf.mxu1 }
 0x2ce   :  { %v2584_v23 = vld [vmem:[#allocation27_spill] sm:$0xff] }
 0x2cf   :  { %1853 = vtanh.f32 %v957_v39  ;;  %v968_v45 = vmul.f32 0.5, %v958_v31  ;;  %v2583_v31 = vld [vmem:[#allocation26_spill] sm:$0xff] }
 0x2d0   :  { %v1850_v52 = vpop.eup %1849 }
 0x2d1   :  { %v1852_v56 = vpop.eup %1851  ;;  %v961_v27 = vadd.f32 1.0, %v1850_v52  ;;  %1855 = vtanh.f32 %v968_v45 }
 0x2d2   :  { %v965_v5 = vadd.f32 1.0, %v1852_v56 }
 0x2d3   :  { %v962_v11 = vmul.f32 0.5, %v961_v27 }
 0x2d4   :  { %v966_v24 = vmul.f32 0.5, %v965_v5  ;;  %v940_v54 = vpop.f32.mrf.mxu2  ;;  %v953_v43 = vpop.f32.mrf.mxu3 }
 0x2d5   :  { %v1854_v51 = vpop.eup %1853 }
 0x2d6   :  { %v972_v6 = vmul.f32 %v966_v24, %v2399_v44  ;;  %v973_v58 = vmul.f32 %v1854_v51, %v962_v11 }
 0x2d7   :  { %v1856_v0 = vpop.eup %1855 }
 0x2d8   :  { %v2439_v18 = vadd.f32 %v973_v58, %v972_v6  ;;  %v970_v57 = vadd.f32 1.0, %v1856_v0 }
 0x2da   :  { %1857 = vtanh.f32 %v2439_v18  ;;  %v971_v40 = vmul.f32 0.5, %v970_v57 }
 0x2e0   :  { %v1858_v16 = vpop.eup %1857 }
 0x2e1   :  { %v976_v62 = vmul.f32 %v1858_v16, %v971_v40 }
 0x2e3   :  { %v984_v12 = vpack.c.bf16 %v976_v62, %v976_v62 }
 0x2e5   :  { %993 = vmatmul.bf16.vlgmr.msrb.gmra.mxu0 %v984_v12  ;;  %1006 = vmatmul.bf16.vlgmr.msrb.gmra.mxu1 %v984_v12 }
 0x2e6   :  { %1019 = vmatmul.bf16.vlgmr.msrb.gmra.mxu2 %v984_v12  ;;  %1032 = vmatmul.bf16.vlgmr.msrb.gmra.mxu3 %v984_v12 }
 0x2e7   :  { %1149 = vmatpush.bf16.msrb.mxu0 %v2055_v37  ;;  %1162 = vmatpush.bf16.msrb.mxu1 %v2057_v41 }
 0x2e8   :  { %1175 = vmatpush.bf16.msrb.mxu2 %v2059_v47  ;;  %1188 = vmatpush.bf16.msrb.mxu3 %v2062_v49 }
 0x2eb   :  { %1150 = vmatpush.bf16.msrb.mxu0 %v2064_v50  ;;  %1163 = vmatpush.bf16.msrb.mxu1 %v2067_v53 }
 0x2ec   :  { %1176 = vmatpush.bf16.msrb.mxu2 %v2070_v59  ;;  %1189 = vmatpush.bf16.msrb.mxu3 %v2074_v60 }
 0x2ef   :  { %1151 = vmatpush.bf16.msrb.mxu0 %v2076_v61  ;;  %1164 = vmatpush.bf16.msrb.mxu1 %v2079_v1 }
 0x2f0   :  { %1177 = vmatpush.bf16.msrb.mxu2 %v2082_v7  ;;  %1190 = vmatpush.bf16.msrb.mxu3 %v2086_v8 }
 0x2f3   :  { %1152 = vmatpush.bf16.msrb.mxu0 %v2088_v9  ;;  %1165 = vmatpush.bf16.msrb.mxu1 %v2091_v13 }
 0x2f4   :  { %1178 = vmatpush.bf16.msrb.mxu2 %v2097_v20  ;;  %1191 = vmatpush.bf16.msrb.mxu3 %v2101_v21 }
 0x2f7   :  { %1153 = vmatpush.bf16.msrb.mxu0 %v2103_v22  ;;  %1166 = vmatpush.bf16.msrb.mxu1 %v2106_v26 }
 0x2f8   :  { %1179 = vmatpush.bf16.msrb.mxu2 %v2109_v32  ;;  %1192 = vmatpush.bf16.msrb.mxu3 %v2113_v33 }
 0x2fb   :  { %1154 = vmatpush.bf16.msrb.mxu0 %v2115_v34  ;;  %1167 = vmatpush.bf16.msrb.mxu1 %v2118_v38 }
 0x2fc   :  { %1180 = vmatpush.bf16.msrb.mxu2 %v2121_v42  ;;  %1193 = vmatpush.bf16.msrb.mxu3 %v2125_v46 }
 0x2ff   :  { %1155 = vmatpush.bf16.msrb.mxu0 %v2127_v48  ;;  %1168 = vmatpush.bf16.msrb.mxu1 %v2130_v55 }
 0x300   :  { %1181 = vmatpush.bf16.msrb.mxu2 %v2133_v2  ;;  %1194 = vmatpush.bf16.msrb.mxu3 %v2137_v3 }
 0x303   :  { %1156 = vmatpush.bf16.msrb.mxu0 %v2139_v4  ;;  %1169 = vmatpush.bf16.msrb.mxu1 %v2142_v10 }
 0x304   :  { %1182 = vmatpush.bf16.msrb.mxu2 %v2145_v14  ;;  %1195 = vmatpush.bf16.msrb.mxu3 %v2149_v15 }
 0x362   :  { %v994_v44 = vpop.f32.mrf.mxu0  ;;  %v1007_v17 = vpop.f32.mrf.mxu1 }
 0x363   :  { %v1037_v35 = vadd.f32 %v994_v44, %v2581_v25  ;;  %v1038_v28 = vadd.f32 %v1007_v17, %v2582_v30 }
 0x365   :  { %v1041_v29 = vmul.f32 0.5, %v1037_v35  ;;  %v1045_v36 = vmul.f32 0.5, %v1038_v28 }
 0x367   :  { %1859 = vtanh.f32 %v1041_v29 }
 0x368   :  { %1861 = vtanh.f32 %v1045_v36 }
 0x369   :  { %v1020_v39 = vpop.f32.mrf.mxu2  ;;  %v1033_v63 = vpop.f32.mrf.mxu3 }
 0x36a   :  { %v1039_v19 = vadd.f32 %v1020_v39, %v2583_v31  ;;  %v1040_v45 = vadd.f32 %v1033_v63, %v2584_v23  ;;  %v996_v52 = vpop.f32.mrf.mxu0  ;;  %v1009_v56 = vpop.f32.mrf.mxu1  ;;  %v2589_v39 = vld [vmem:[#allocation32_spill] sm:$0xff]  ;;  %v2590_v31 = vld [vmem:[#allocation33_spill] sm:$0xff] }
 0x36c   :  { %1863 = vtanh.f32 %v1039_v19  ;;  %v1050_v27 = vmul.f32 0.5, %v1040_v45 }
 0x36d   :  { %v1860_v5 = vpop.eup %1859 }
 0x36e   :  { %v1862_v11 = vpop.eup %1861  ;;  %v1043_v24 = vadd.f32 1.0, %v1860_v5  ;;  %1865 = vtanh.f32 %v1050_v27  ;;  %v2591_v27 = vld [vmem:[#allocation34_spill] sm:$0xff] }
 0x36f   :  { %v1047_v54 = vadd.f32 1.0, %v1862_v11  ;;  %v2592_v11 = vld [vmem:[#allocation35_spill] sm:$0xff] }
 0x370   :  { %v1044_v43 = vmul.f32 0.5, %v1043_v24 }
 0x371   :  { %v1048_v51 = vmul.f32 0.5, %v1047_v54  ;;  %v1022_v6 = vpop.f32.mrf.mxu2  ;;  %v1035_v58 = vpop.f32.mrf.mxu3 }
 0x372   :  { %v1864_v0 = vpop.eup %1863 }
 0x373   :  { %v1054_v57 = vmul.f32 %v1048_v51, %v2439_v18  ;;  %v1055_v40 = vmul.f32 %v1864_v0, %v1044_v43 }
 0x374   :  { %v1866_v16 = vpop.eup %1865 }
 0x375   :  { %v2479_v62 = vadd.f32 %v1055_v40, %v1054_v57  ;;  %v1052_v12 = vadd.f32 1.0, %v1866_v16 }
 0x377   :  { %1867 = vtanh.f32 %v2479_v62  ;;  %v1053_v44 = vmul.f32 0.5, %v1052_v12 }
 0x37d   :  { %v1868_v17 = vpop.eup %1867 }
 0x37e   :  { %v1058_v25 = vmul.f32 %v1868_v17, %v1053_v44 }
 0x380   :  { %v1066_v35 = vpack.c.bf16 %v1058_v25, %v1058_v25 }
 0x382   :  { %1075 = vmatmul.bf16.vlgmr.msra.gmra.mxu0 %v1066_v35  ;;  %1088 = vmatmul.bf16.vlgmr.msra.gmra.mxu1 %v1066_v35 }
 0x383   :  { %1101 = vmatmul.bf16.vlgmr.msra.gmra.mxu2 %v1066_v35  ;;  %1114 = vmatmul.bf16.vlgmr.msra.gmra.mxu3 %v1066_v35 }
 0x384   :  { %1231 = vmatpush.bf16.msra.mxu0 %v2055_v37  ;;  %1244 = vmatpush.bf16.msra.mxu1 %v2057_v41 }
 0x385   :  { %1257 = vmatpush.bf16.msra.mxu2 %v2059_v47  ;;  %1270 = vmatpush.bf16.msra.mxu3 %v2062_v49  ;;  %v2585_v47 = vld [vmem:[#allocation28_spill] sm:$0xff] }
 0x388   :  { %1232 = vmatpush.bf16.msra.mxu0 %v2064_v50  ;;  %1245 = vmatpush.bf16.msra.mxu1 %v2067_v53  ;;  %v2586_v50 = vld [vmem:[#allocation29_spill] sm:$0xff] }
 0x389   :  { %1258 = vmatpush.bf16.msra.mxu2 %v2070_v59  ;;  %1271 = vmatpush.bf16.msra.mxu3 %v2074_v60 }
 0x38c   :  { %1233 = vmatpush.bf16.msra.mxu0 %v2076_v61  ;;  %1246 = vmatpush.bf16.msra.mxu1 %v2079_v1 }
 0x38d   :  { %1259 = vmatpush.bf16.msra.mxu2 %v2082_v7  ;;  %1272 = vmatpush.bf16.msra.mxu3 %v2086_v8  ;;  %v2587_v7 = vld [vmem:[#allocation30_spill] sm:$0xff] }
 0x390   :  { %1234 = vmatpush.bf16.msra.mxu0 %v2088_v9  ;;  %1247 = vmatpush.bf16.msra.mxu1 %v2091_v13  ;;  %v2588_v9 = vld [vmem:[#allocation31_spill] sm:$0xff] }
 0x391   :  { %1260 = vmatpush.bf16.msra.mxu2 %v2097_v20  ;;  %1273 = vmatpush.bf16.msra.mxu3 %v2101_v21 }
 0x394   :  { %1235 = vmatpush.bf16.msra.mxu0 %v2103_v22  ;;  %1248 = vmatpush.bf16.msra.mxu1 %v2106_v26 }
 0x395   :  { %1261 = vmatpush.bf16.msra.mxu2 %v2109_v32  ;;  %1274 = vmatpush.bf16.msra.mxu3 %v2113_v33 }
 0x398   :  { %1236 = vmatpush.bf16.msra.mxu0 %v2115_v34  ;;  %1249 = vmatpush.bf16.msra.mxu1 %v2118_v38 }
 0x399   :  { %1262 = vmatpush.bf16.msra.mxu2 %v2121_v42  ;;  %1275 = vmatpush.bf16.msra.mxu3 %v2125_v46 }
 0x39c   :  { %1237 = vmatpush.bf16.msra.mxu0 %v2127_v48  ;;  %1250 = vmatpush.bf16.msra.mxu1 %v2130_v55 }
 0x39d   :  { %1263 = vmatpush.bf16.msra.mxu2 %v2133_v2  ;;  %1276 = vmatpush.bf16.msra.mxu3 %v2137_v3 }
 0x3a0   :  { %1238 = vmatpush.bf16.msra.mxu0 %v2139_v4  ;;  %1251 = vmatpush.bf16.msra.mxu1 %v2142_v10 }
 0x3a1   :  { %1264 = vmatpush.bf16.msra.mxu2 %v2145_v14  ;;  %1277 = vmatpush.bf16.msra.mxu3 %v2149_v15 }
 0x3ff   :  { %v1076_v37 = vpop.f32.mrf.mxu0  ;;  %v1089_v41 = vpop.f32.mrf.mxu1 }
 0x400   :  { %v1119_v49 = vadd.f32 %v1076_v37, %v2585_v47  ;;  %v1120_v53 = vadd.f32 %v1089_v41, %v2586_v50 }
 0x402   :  { %v1123_v59 = vmul.f32 0.5, %v1119_v49  ;;  %v1127_v60 = vmul.f32 0.5, %v1120_v53 }
 0x404   :  { %1869 = vtanh.f32 %v1123_v59  ;;  %v1812_v59 = vld [vmem:[%s2558_s4 + $0x38] sm:$0xff] }
 0x405   :  { %1871 = vtanh.f32 %v1127_v60  ;;  %v1811_v60 = vld [vmem:[%s2558_s4 + $0x30] sm:$0xff] }
 0x406   :  { %v1102_v61 = vpop.f32.mrf.mxu2  ;;  %v1115_v1 = vpop.f32.mrf.mxu3 }
 0x407   :  { %v1121_v8 = vadd.f32 %v1102_v61, %v2587_v7  ;;  %v1122_v13 = vadd.f32 %v1115_v1, %v2588_v9  ;;  %v1078_v20 = vpop.f32.mrf.mxu0  ;;  %v1091_v21 = vpop.f32.mrf.mxu1  ;;  %v1810_v61 = vld [vmem:[%s2558_s4 + $0x28] sm:$0xff]  ;;  %v1809_v1 = vld [vmem:[%s2558_s4 + $0x20] sm:$0xff]  ;;  %v1808_v7 = vld [vmem:[%s2558_s4 + $0x18] sm:$0xff] }
 0x408   :  { %v1806_v9 = vld [vmem:[%s2558_s4 + $0x8] sm:$0xff] }
 0x409   :  { %1873 = vtanh.f32 %v1121_v8  ;;  %v1132_v22 = vmul.f32 0.5, %v1122_v13  ;;  %v1807_v8 = vld [vmem:[%s2558_s4 + $0x10] sm:$0xff]  ;;  %v1805_v13 = vld [vmem:[%s2558_s4] sm:$0xff]  ;;  %s2007_s4 = smov [#allocation11]  }
 0x40a   :  { %v1870_v26 = vpop.eup %1869  ;;  %s1399_s9 = sshll.u32 %s2007_s4, 4  ;;  %s1400_s9 = int_to_ptr.vmem [resolvable:$true] %s1399_s9 }
 0x40b   :  { %v1872_v32 = vpop.eup %1871  ;;  %v1125_v33 = vadd.f32 1.0, %v1870_v26  ;;  %1875 = vtanh.f32 %v1132_v22  ;;  %v2593_v22 = vld [vmem:[#allocation36_spill] sm:$0xff] }
 0x40c   :  { %v1129_v34 = vadd.f32 1.0, %v1872_v32  ;;  %v2594_v32 = vld [vmem:[#allocation37_spill] sm:$0xff] }
 0x40d   :  { %v1126_v38 = vmul.f32 0.5, %v1125_v33 }
 0x40e   :  { %v1130_v42 = vmul.f32 0.5, %v1129_v34  ;;  %v1104_v46 = vpop.f32.mrf.mxu2  ;;  %v1117_v48 = vpop.f32.mrf.mxu3 }
 0x40f   :  { %v1874_v55 = vpop.eup %1873  ;;  %v2595_v48 = vld [vmem:[#allocation38_spill] sm:$0xff] }
 0x410   :  { %v1136_v2 = vmul.f32 %v1130_v42, %v2479_v62  ;;  %v1137_v3 = vmul.f32 %v1874_v55, %v1126_v38 }
 0x411   :  { %v1876_v4 = vpop.eup %1875 }
 0x412   :  { %v1138_v10 = vadd.f32 %v1137_v3, %v1136_v2  ;;  %v1134_v14 = vadd.f32 1.0, %v1876_v4  ;;  %v2596_v2 = vld [vmem:[#allocation39_spill] sm:$0xff] }
 0x414   :  { %1877 = vtanh.f32 %v1138_v10  ;;  %v1135_v15 = vmul.f32 0.5, %v1134_v14 }
 0x41a   :  { %v1878_v18 = vpop.eup %1877 }
 0x41b   :  { %v1140_v30 = vmul.f32 %v1878_v18, %v1135_v15 }
 0x41d   :  { %v1148_v28 = vpack.c.bf16 %v1140_v30, %v1140_v30 }
 0x41f   :  { %1157 = vmatmul.bf16.vlgmr.msrb.gmra.mxu0 %v1148_v28  ;;  %1170 = vmatmul.bf16.vlgmr.msrb.gmra.mxu1 %v1148_v28 }
 0x420   :  { %1183 = vmatmul.bf16.vlgmr.msrb.gmra.mxu2 %v1148_v28  ;;  %1196 = vmatmul.bf16.vlgmr.msrb.gmra.mxu3 %v1148_v28 }
 0x421   :  { %1380 = vmatpush.bf16.msrb.mxu0 %v1812_v59 }
 0x425   :  { %1381 = vmatpush.bf16.msrb.mxu0 %v1811_v60 }
 0x429   :  { %1382 = vmatpush.bf16.msrb.mxu0 %v1810_v61 }
 0x42d   :  { %1383 = vmatpush.bf16.msrb.mxu0 %v1809_v1 }
 0x431   :  { %1384 = vmatpush.bf16.msrb.mxu0 %v1808_v7 }
 0x435   :  { %1385 = vmatpush.bf16.msrb.mxu0 %v1807_v8 }
 0x439   :  { %1386 = vmatpush.bf16.msrb.mxu0 %v1806_v9 }
 0x43d   :  { %1387 = vmatpush.bf16.msrb.mxu0 %v1805_v13 }
 0x49c   :  { %v1158_v29 = vpop.f32.mrf.mxu0  ;;  %v1171_v36 = vpop.f32.mrf.mxu1 }
 0x49d   :  { %v1201_v63 = vadd.f32 %v1158_v29, %v2589_v39  ;;  %v1202_v19 = vadd.f32 %v1171_v36, %v2590_v31 }
 0x49f   :  { %v1205_v23 = vmul.f32 0.5, %v1201_v63  ;;  %v1209_v45 = vmul.f32 0.5, %v1202_v19 }
 0x4a1   :  { %1879 = vtanh.f32 %v1205_v23 }
 0x4a2   :  { %1881 = vtanh.f32 %v1209_v45 }
 0x4a3   :  { %v1184_v52 = vpop.f32.mrf.mxu2  ;;  %v1197_v56 = vpop.f32.mrf.mxu3 }
 0x4a4   :  { %v1203_v5 = vadd.f32 %v1184_v52, %v2591_v27  ;;  %v1204_v24 = vadd.f32 %v1197_v56, %v2592_v11  ;;  %v1160_v54 = vpop.f32.mrf.mxu0  ;;  %v1173_v43 = vpop.f32.mrf.mxu1 }
 0x4a5   :  { %v1818_v54 = vld [vmem:[#allocation8] ss:$0 sm:$0xff] }
 0x4a6   :  { %1883 = vtanh.f32 %v1203_v5  ;;  %v1214_v51 = vmul.f32 0.5, %v1204_v24 }
 0x4a7   :  { %v1880_v6 = vpop.eup %1879 }
 0x4a8   :  { %v1882_v58 = vpop.eup %1881  ;;  %v1207_v0 = vadd.f32 1.0, %v1880_v6  ;;  %1885 = vtanh.f32 %v1214_v51 }
 0x4a9   :  { %v1211_v57 = vadd.f32 1.0, %v1882_v58 }
 0x4aa   :  { %v1208_v40 = vmul.f32 0.5, %v1207_v0 }
 0x4ab   :  { %v1212_v16 = vmul.f32 0.5, %v1211_v57  ;;  %v1186_v62 = vpop.f32.mrf.mxu2  ;;  %v1199_v12 = vpop.f32.mrf.mxu3 }
 0x4ac   :  { %v1884_v44 = vpop.eup %1883 }
 0x4ad   :  { %v1218_v17 = vmul.f32 %v1212_v16, %v1138_v10  ;;  %v1219_v25 = vmul.f32 %v1884_v44, %v1208_v40 }
 0x4ae   :  { %v1886_v35 = vpop.eup %1885 }
 0x4af   :  { %v1220_v37 = vadd.f32 %v1219_v25, %v1218_v17  ;;  %v1216_v41 = vadd.f32 1.0, %v1886_v35 }
 0x4b1   :  { %1887 = vtanh.f32 %v1220_v37  ;;  %v1217_v47 = vmul.f32 0.5, %v1216_v41 }
 0x4b7   :  { %v1888_v49 = vpop.eup %1887 }
 0x4b8   :  { %v1222_v50 = vmul.f32 %v1888_v49, %v1217_v47 }
 0x4ba   :  { %v1230_v53 = vpack.c.bf16 %v1222_v50, %v1222_v50 }
 0x4bc   :  { %1239 = vmatmul.bf16.vlgmr.msra.gmra.mxu0 %v1230_v53  ;;  %1252 = vmatmul.bf16.vlgmr.msra.gmra.mxu1 %v1230_v53 }
 0x4bd   :  { %1265 = vmatmul.bf16.vlgmr.msra.gmra.mxu2 %v1230_v53  ;;  %1278 = vmatmul.bf16.vlgmr.msra.gmra.mxu3 %v1230_v53 }
 0x539   :  { %v1240_v20 = vpop.f32.mrf.mxu0  ;;  %v1253_v21 = vpop.f32.mrf.mxu1 }
 0x53a   :  { %v1283_v26 = vadd.f32 %v1240_v20, %v2593_v22  ;;  %v1284_v33 = vadd.f32 %v1253_v21, %v2594_v32 }
 0x53c   :  { %v1287_v34 = vmul.f32 0.5, %v1283_v26  ;;  %v1291_v38 = vmul.f32 0.5, %v1284_v33 }
 0x53e   :  { %1889 = vtanh.f32 %v1287_v34 }
 0x53f   :  { %1891 = vtanh.f32 %v1291_v38 }
 0x540   :  { %v1266_v42 = vpop.f32.mrf.mxu2  ;;  %v1279_v46 = vpop.f32.mrf.mxu3 }
 0x541   :  { %v1285_v55 = vadd.f32 %v1266_v42, %v2595_v48  ;;  %v1286_v3 = vadd.f32 %v1279_v46, %v2596_v2  ;;  %v1242_v4 = vpop.f32.mrf.mxu0  ;;  %v1255_v10 = vpop.f32.mrf.mxu1 }
 0x543   :  { %1893 = vtanh.f32 %v1285_v55  ;;  %v1296_v14 = vmul.f32 0.5, %v1286_v3 }
 0x544   :  { %v1890_v15 = vpop.eup %1889 }
 0x545   :  { %v1892_v18 = vpop.eup %1891  ;;  %v1289_v30 = vadd.f32 1.0, %v1890_v15  ;;  %1895 = vtanh.f32 %v1296_v14 }
 0x546   :  { %v1293_v28 = vadd.f32 1.0, %v1892_v18 }
 0x547   :  { %v1290_v29 = vmul.f32 0.5, %v1289_v30 }
 0x548   :  { %v1294_v36 = vmul.f32 0.5, %v1293_v28  ;;  %v1268_v39 = vpop.f32.mrf.mxu2  ;;  %v1281_v63 = vpop.f32.mrf.mxu3 }
 0x549   :  { %v1894_v31 = vpop.eup %1893 }
 0x54a   :  { %v1300_v19 = vmul.f32 %v1294_v36, %v1220_v37  ;;  %v1301_v23 = vmul.f32 %v1894_v31, %v1290_v29 }
 0x54b   :  { %v1896_v45 = vpop.eup %1895 }
 0x54c   :  { %v1302_v52 = vadd.f32 %v1301_v23, %v1300_v19  ;;  %v1298_v56 = vadd.f32 1.0, %v1896_v45 }
 0x54e   :  { %1897 = vtanh.f32 %v1302_v52  ;;  %v1299_v27 = vmul.f32 0.5, %v1298_v56 }
 0x554   :  { %v1898_v5 = vpop.eup %1897 }
 0x555   :  { %v1304_v11 = vmul.f32 %v1898_v5, %v1299_v27 }
 0x557   :  { %v1311_v24 = vpack.c.bf16 %v1304_v11, %v1304_v11 }
 0x559   :  { %1388 = vmatmul.bf16.vlgmr.msrb.gmra.mxu0 %v1311_v24 }
 0x5d6   :  { %v1389_v43 = vpop.f32.mrf.mxu0 }
 0x5d7   :  { %v1390_v51 = vadd.f32 %v1818_v54, %v1389_v43 }
 0x5d9   :  { %1393 = vst [vmem:[#allocation11] sm:$0xff] %v1390_v51 }
 0x5da   :  { %1404 = dma.vmem_to_hbm [thread:$0]  %s1400_s9, 128, %s1402_s1, [#allocation10]  }
 0x5de   :  { %v1391_v6 = vpop.f32.mrf.mxu0 }
 0x5df   :  { %2001 = dma.done.wait [#allocation10], 128  }
 0x5e0   :  { %2002 = vsyncadd [#allocation10], 4294967168 }
 0x5e1   :  { %1409 = vsyncpa [#allocation9], 1 }
 0x5e2   :  { %1410 = vsyncpa [#allocation10], 1 }
 0x5e3   :  { %1411 = vsyncmov [#allocation4] }
 0x5e6   :  { %s1412_s2 = vpop.sfrf %1411 }
 0x5e7   :  { %p1735_p0 = scmp.ne.s32.totalorder %s1412_s2, 0 }
 0x5e9   :  { %1416 = shalt.err (%p1735_p0)  }
 0x5ea   :  { %1418 = vsyncmov [#allocation4 + $0x1] }
 0x5ed   :  { %s1419_s11 = vpop.sfrf %1418 }
 0x5ee   :  { %p1736_p1 = scmp.ne.s32.totalorder %s1419_s11, 0 }
 0x5f0   :  { %1423 = shalt.err (%p1736_p1)  }

// kernel: _forward_padded.2
= control target key start
LH: loop header
LB: loop body
LE: loop exit
PB: predicated region body
PF: predicated region fallthrough
CT: control target
= control target key end

     0   :  { %s4274_s18 = smov [#allocation2]   ;;  %s4275_s23 = smov [#allocation3]   ;;  %s4507_s0 = inlined_call_operand.vmem [shape: bf16[8,8,128], index: 0, kind: input, shape index: {}]   ;;  %s4508_s1 = inlined_call_operand.hbm [shape: bf16[128,512], index: 1, kind: input, shape index: {}]   ;;  %s4509_s3 = inlined_call_operand.vmem [shape: f32[1,512], index: 3, kind: input, shape index: {}]   ;;  %s4510_s4 = inlined_call_operand.vmem [shape: bf16[8,8,128], index: 4, kind: output, shape index: {}]   ;;  %s4511_s2 = inlined_call_operand.hbm [shape: bf16[128,512], index: 2, kind: input, shape index: {}]  }
   0x1   :  { %s24_s17 = sshll.u32 %s4508_s1, 4  ;;  %s26_s19 = sshll.u32 %s4274_s18, 4  ;;  %s25_s17 = int_to_ptr.hbm [resolvable:$true] %s24_s17  ;;  %s27_s19 = int_to_ptr.vmem [resolvable:$true] %s26_s19 }
   0x2   :  { %29 = dma.hbm_to_vmem [thread:$0]  %s25_s17, 4096, %s27_s19, [#allocation4] }
   0x3   :  { %s38_s22 = sshll.u32 %s4511_s2, 4  ;;  %s40_s24 = sshll.u32 %s4275_s23, 4  ;;  %s39_s22 = int_to_ptr.hbm [resolvable:$true] %s38_s22  ;;  %s41_s24 = int_to_ptr.vmem [resolvable:$true] %s40_s24 }
   0x4   :  { %43 = dma.hbm_to_vmem [thread:$0]  %s39_s22, 4096, %s41_s24, [#allocation4 + $0x1] }
   0x5   :  { %4270 = dma.done.wait [#allocation4], 4096 }
   0x6   :  { %4271 = vsyncadd [#allocation4], 4294963200 }
   0x7   :  { %4272 = dma.done.wait [#allocation4 + $0x1], 4096 }
   0x8   :  { %4273 = vsyncadd [#allocation4 + $0x1], 4294963200  ;;  %v2800_v0 = vld [vmem:[#allocation2 + $0xe0] sm:$0xf]  ;;  %v3881_v1 = vld [vmem:[#allocation2 + $0xec] sm:$0xf0] }
   0x9   :  { %v3879_v2 = vld [vmem:[#allocation2 + $0xe4] sm:$0xf]  ;;  %v2801_v3 = vor.u32 %v3881_v1, %v2800_v0  ;;  %v2802_v4 = vld [vmem:[#allocation2 + $0xf0] sm:$0xf0]  ;;  %v2808_v5 = vld [vmem:[#allocation2 + $0xe8] sm:$0xf] }
   0xa   :  { %v3882_v6 = vld [vmem:[#allocation2 + $0xf4] sm:$0xf0]  ;;  %v2805_v7 = vor.u32 %v3879_v2, %v2802_v4  ;;  %v3880_v9 = vld [vmem:[#allocation2 + $0xec] sm:$0xf]  ;;  %v2810_v10 = vld [vmem:[#allocation2 + $0xf8] sm:$0xf0] }
   0xb   :  { %v2809_v8 = vor.u32 %v3882_v6, %v2808_v5  ;;  %v2784_v11 = vld [vmem:[#allocation2 + $0xc0] sm:$0xf]  ;;  %286 = vmatpush.bf16.msra.mxu0 %v2801_v3  ;;  %v2813_v12 = vor.u32 %v3880_v9, %v2810_v10  ;;  %v3877_v13 = vld [vmem:[#allocation2 + $0xcc] sm:$0xf0]  ;;  %v3875_v14 = vld [vmem:[#allocation2 + $0xc4] sm:$0xf] }
   0xc   :  { %v2786_v15 = vld [vmem:[#allocation2 + $0xd0] sm:$0xf0]  ;;  %315 = vmatpush.bf16.msra.mxu1 %v2805_v7  ;;  %v2785_v16 = vor.u32 %v3877_v13, %v2784_v11  ;;  %v2792_v18 = vld [vmem:[#allocation2 + $0xc8] sm:$0xf]  ;;  %v3878_v19 = vld [vmem:[#allocation2 + $0xd4] sm:$0xf0] }
   0xd   :  { %344 = vmatpush.bf16.msra.mxu2 %v2809_v8  ;;  %v2789_v17 = vor.u32 %v3875_v14, %v2786_v15  ;;  %v3876_v20 = vld [vmem:[#allocation2 + $0xcc] sm:$0xf]  ;;  %373 = vmatpush.bf16.msra.mxu3 %v2813_v12  ;;  %v2793_v21 = vor.u32 %v3878_v19, %v2792_v18  ;;  %v2794_v22 = vld [vmem:[#allocation2 + $0xd8] sm:$0xf0]  ;;  %v2768_v23 = vld [vmem:[#allocation2 + $0xa0] sm:$0xf] }
   0xe   :  { %v3873_v24 = vld [vmem:[#allocation2 + $0xac] sm:$0xf0]  ;;  %v2797_v25 = vor.u32 %v3876_v20, %v2794_v22  ;;  %v3871_v26 = vld [vmem:[#allocation2 + $0xa4] sm:$0xf]  ;;  %v2770_v27 = vld [vmem:[#allocation2 + $0xb0] sm:$0xf0] }
   0xf   :  { %v2776_v28 = vld [vmem:[#allocation2 + $0xa8] sm:$0xf]  ;;  %287 = vmatpush.bf16.msra.mxu0 %v2785_v16  ;;  %v2769_v29 = vor.u32 %v3873_v24, %v2768_v23  ;;  %v3874_v30 = vld [vmem:[#allocation2 + $0xb4] sm:$0xf0]  ;;  %v3872_v31 = vld [vmem:[#allocation2 + $0xac] sm:$0xf]  ;;  %v2773_v33 = vor.u32 %v3871_v26, %v2770_v27 }
  0x10   :  { %v2778_v32 = vld [vmem:[#allocation2 + $0xb8] sm:$0xf0]  ;;  %316 = vmatpush.bf16.msra.mxu1 %v2789_v17  ;;  %v2777_v34 = vor.u32 %v3874_v30, %v2776_v28  ;;  %v2752_v35 = vld [vmem:[#allocation2 + $0x80] sm:$0xf]  ;;  %v3869_v36 = vld [vmem:[#allocation2 + $0x8c] sm:$0xf0] }
  0x11   :  { %345 = vmatpush.bf16.msra.mxu2 %v2793_v21  ;;  %v3867_v37 = vld [vmem:[#allocation2 + $0x84] sm:$0xf]  ;;  %374 = vmatpush.bf16.msra.mxu3 %v2797_v25  ;;  %v2781_v38 = vor.u32 %v3872_v31, %v2778_v32  ;;  %v2754_v39 = vld [vmem:[#allocation2 + $0x90] sm:$0xf0]  ;;  %v2760_v40 = vld [vmem:[#allocation2 + $0x88] sm:$0xf]  ;;  %v2753_v44 = vor.u32 %v3869_v36, %v2752_v35 }
  0x12   :  { %v3870_v41 = vld [vmem:[#allocation2 + $0x94] sm:$0xf0]  ;;  %v3868_v42 = vld [vmem:[#allocation2 + $0x8c] sm:$0xf]  ;;  %v2762_v43 = vld [vmem:[#allocation2 + $0x98] sm:$0xf0]  ;;  %v2757_v45 = vor.u32 %v3867_v37, %v2754_v39 }
  0x13   :  { %288 = vmatpush.bf16.msra.mxu0 %v2769_v29  ;;  %v2761_v46 = vor.u32 %v3870_v41, %v2760_v40  ;;  %v2736_v47 = vld [vmem:[#allocation2 + $0x60] sm:$0xf]  ;;  %v3865_v48 = vld [vmem:[#allocation2 + $0x6c] sm:$0xf0]  ;;  %v3863_v49 = vld [vmem:[#allocation2 + $0x64] sm:$0xf]  ;;  %v2765_v50 = vor.u32 %v3868_v42, %v2762_v43 }
  0x14   :  { %317 = vmatpush.bf16.msra.mxu1 %v2773_v33  ;;  %v2738_v51 = vld [vmem:[#allocation2 + $0x70] sm:$0xf0]  ;;  %v2744_v52 = vld [vmem:[#allocation2 + $0x68] sm:$0xf]  ;;  %v3866_v53 = vld [vmem:[#allocation2 + $0x74] sm:$0xf0]  ;;  %v2737_v56 = vor.u32 %v3865_v48, %v2736_v47 }
  0x15   :  { %346 = vmatpush.bf16.msra.mxu2 %v2777_v34  ;;  %375 = vmatpush.bf16.msra.mxu3 %v2781_v38  ;;  %v3864_v54 = vld [vmem:[#allocation2 + $0x6c] sm:$0xf]  ;;  %v2746_v55 = vld [vmem:[#allocation2 + $0x78] sm:$0xf0]  ;;  %v2741_v57 = vor.u32 %v3863_v49, %v2738_v51  ;;  %v2745_v58 = vor.u32 %v3866_v53, %v2744_v52  ;;  %v2720_v59 = vld [vmem:[#allocation2 + $0x40] sm:$0xf] }
  0x16   :  { %v3861_v60 = vld [vmem:[#allocation2 + $0x4c] sm:$0xf0]  ;;  %v3859_v61 = vld [vmem:[#allocation2 + $0x44] sm:$0xf]  ;;  %v2749_v62 = vor.u32 %v3864_v54, %v2746_v55  ;;  %v2722_v63 = vld [vmem:[#allocation2 + $0x50] sm:$0xf0] }
  0x17   :  { %289 = vmatpush.bf16.msra.mxu0 %v2753_v44  ;;  %v2728_v0 = vld [vmem:[#allocation2 + $0x48] sm:$0xf]  ;;  %v3862_v1 = vld [vmem:[#allocation2 + $0x54] sm:$0xf0]  ;;  %v3860_v2 = vld [vmem:[#allocation2 + $0x4c] sm:$0xf]  ;;  %v2721_v4 = vor.u32 %v3861_v60, %v2720_v59  ;;  %v2725_v5 = vor.u32 %v3859_v61, %v2722_v63 }
  0x18   :  { %318 = vmatpush.bf16.msra.mxu1 %v2757_v45  ;;  %v2730_v3 = vld [vmem:[#allocation2 + $0x58] sm:$0xf0]  ;;  %v2729_v6 = vor.u32 %v3862_v1, %v2728_v0  ;;  %v2704_v7 = vld [vmem:[#allocation2 + $0x20] sm:$0xf]  ;;  %v3857_v8 = vld [vmem:[#allocation2 + $0x2c] sm:$0xf0] }
  0x19   :  { %347 = vmatpush.bf16.msra.mxu2 %v2761_v46  ;;  %376 = vmatpush.bf16.msra.mxu3 %v2765_v50  ;;  %v3855_v9 = vld [vmem:[#allocation2 + $0x24] sm:$0xf]  ;;  %v2733_v10 = vor.u32 %v3860_v2, %v2730_v3  ;;  %v2706_v11 = vld [vmem:[#allocation2 + $0x30] sm:$0xf0]  ;;  %v2712_v12 = vld [vmem:[#allocation2 + $0x28] sm:$0xf]  ;;  %v2705_v16 = vor.u32 %v3857_v8, %v2704_v7 }
  0x1a   :  { %v3858_v13 = vld [vmem:[#allocation2 + $0x34] sm:$0xf0]  ;;  %v3856_v14 = vld [vmem:[#allocation2 + $0x2c] sm:$0xf]  ;;  %v2714_v15 = vld [vmem:[#allocation2 + $0x38] sm:$0xf0]  ;;  %v2709_v18 = vor.u32 %v3855_v9, %v2706_v11 }
  0x1b   :  { %290 = vmatpush.bf16.msra.mxu0 %v2737_v56  ;;  %v2688_v17 = vld [vmem:[#allocation2] sm:$0xf]  ;;  %v2713_v19 = vor.u32 %v3858_v13, %v2712_v12  ;;  %v3853_v20 = vld [vmem:[#allocation2 + $0xc] sm:$0xf0]  ;;  %v3851_v21 = vld [vmem:[#allocation2 + $0x4] sm:$0xf]  ;;  %v2717_v23 = vor.u32 %v3856_v14, %v2714_v15 }
  0x1c   :  { %319 = vmatpush.bf16.msra.mxu1 %v2741_v57  ;;  %v2690_v22 = vld [vmem:[#allocation2 + $0x10] sm:$0xf0]  ;;  %v2696_v24 = vld [vmem:[#allocation2 + $0x8] sm:$0xf]  ;;  %v3854_v25 = vld [vmem:[#allocation2 + $0x14] sm:$0xf0]  ;;  %v2689_v30 = vor.u32 %v3853_v20, %v2688_v17 }
  0x1d   :  { %348 = vmatpush.bf16.msra.mxu2 %v2745_v58  ;;  %377 = vmatpush.bf16.msra.mxu3 %v2749_v62  ;;  %v3852_v26 = vld [vmem:[#allocation2 + $0xc] sm:$0xf]  ;;  %v2698_v27 = vld [vmem:[#allocation2 + $0x18] sm:$0xf0]  ;;  %v2928_v28 = vld [vmem:[#allocation3 + $0xe0] sm:$0xf]  ;;  %v2693_v33 = vor.u32 %v3851_v21, %v2690_v22  ;;  %v2697_v34 = vor.u32 %v3854_v25, %v2696_v24 }
  0x1e   :  { %v3913_v29 = vld [vmem:[#allocation3 + $0xec] sm:$0xf0]  ;;  %v3911_v31 = vld [vmem:[#allocation3 + $0xe4] sm:$0xf]  ;;  %v2930_v32 = vld [vmem:[#allocation3 + $0xf0] sm:$0xf0]  ;;  %v2701_v36 = vor.u32 %v3852_v26, %v2698_v27 }
  0x1f   :  { %291 = vmatpush.bf16.msra.mxu0 %v2721_v4  ;;  %v3847_v35 = vld [vmem:[%s4507_s0] sm:$0xff]  ;;  %v2929_v37 = vor.u32 %v3913_v29, %v2928_v28  ;;  %v2936_v38 = vld [vmem:[#allocation3 + $0xe8] sm:$0xf]  ;;  %v3914_v39 = vld [vmem:[#allocation3 + $0xf4] sm:$0xf0]  ;;  %v2933_v41 = vor.u32 %v3911_v31, %v2930_v32 }
  0x20   :  { %320 = vmatpush.bf16.msra.mxu1 %v2725_v5  ;;  %v3912_v40 = vld [vmem:[#allocation3 + $0xec] sm:$0xf]  ;;  %v2938_v42 = vld [vmem:[#allocation3 + $0xf8] sm:$0xf0]  ;;  %v2912_v43 = vld [vmem:[#allocation3 + $0xc0] sm:$0xf]  ;;  %v2937_v47 = vor.u32 %v3914_v39, %v2936_v38 }
  0x21   :  { %349 = vmatpush.bf16.msra.mxu2 %v2729_v6  ;;  %378 = vmatpush.bf16.msra.mxu3 %v2733_v10  ;;  %v3909_v44 = vld [vmem:[#allocation3 + $0xcc] sm:$0xf0]  ;;  %v3907_v45 = vld [vmem:[#allocation3 + $0xc4] sm:$0xf]  ;;  %v2914_v46 = vld [vmem:[#allocation3 + $0xd0] sm:$0xf0]  ;;  %v2941_v48 = vor.u32 %v3912_v40, %v2938_v42 }
  0x22   :  { %v2913_v49 = vor.u32 %v3909_v44, %v2912_v43  ;;  %v2920_v50 = vld [vmem:[#allocation3 + $0xc8] sm:$0xf]  ;;  %v3910_v51 = vld [vmem:[#allocation3 + $0xd4] sm:$0xf0]  ;;  %v3908_v52 = vld [vmem:[#allocation3 + $0xcc] sm:$0xf]  ;;  %v2917_v53 = vor.u32 %v3907_v45, %v2914_v46 }
  0x23   :  { %292 = vmatpush.bf16.msra.mxu0 %v2705_v16  ;;  %v2922_v54 = vld [vmem:[#allocation3 + $0xd8] sm:$0xf0]  ;;  %v2896_v55 = vld [vmem:[#allocation3 + $0xa0] sm:$0xf]  ;;  %v3905_v56 = vld [vmem:[#allocation3 + $0xac] sm:$0xf0]  ;;  %v2921_v59 = vor.u32 %v3910_v51, %v2920_v50 }
  0x24   :  { %321 = vmatpush.bf16.msra.mxu1 %v2709_v18  ;;  %v3903_v57 = vld [vmem:[#allocation3 + $0xa4] sm:$0xf]  ;;  %v2898_v58 = vld [vmem:[#allocation3 + $0xb0] sm:$0xf0]  ;;  %v2925_v60 = vor.u32 %v3908_v52, %v2922_v54  ;;  %v2897_v61 = vor.u32 %v3905_v56, %v2896_v55  ;;  %v2904_v62 = vld [vmem:[#allocation3 + $0xa8] sm:$0xf] }
  0x25   :  { %350 = vmatpush.bf16.msra.mxu2 %v2713_v19  ;;  %379 = vmatpush.bf16.msra.mxu3 %v2717_v23  ;;  %v3906_v63 = vld [vmem:[#allocation3 + $0xb4] sm:$0xf0]  ;;  %v3904_v0 = vld [vmem:[#allocation3 + $0xac] sm:$0xf]  ;;  %v2901_v1 = vor.u32 %v3903_v57, %v2898_v58  ;;  %v2906_v2 = vld [vmem:[#allocation3 + $0xb8] sm:$0xf0] }
  0x26   :  { %v2880_v3 = vld [vmem:[#allocation3 + $0x80] sm:$0xf]  ;;  %v3901_v4 = vld [vmem:[#allocation3 + $0x8c] sm:$0xf0]  ;;  %v3899_v5 = vld [vmem:[#allocation3 + $0x84] sm:$0xf]  ;;  %v2905_v7 = vor.u32 %v3906_v63, %v2904_v62  ;;  %v2909_v8 = vor.u32 %v3904_v0, %v2906_v2 }
  0x27   :  { %293 = vmatpush.bf16.msra.mxu0 %v2689_v30  ;;  %v2882_v6 = vld [vmem:[#allocation3 + $0x90] sm:$0xf0]  ;;  %v2881_v9 = vor.u32 %v3901_v4, %v2880_v3  ;;  %v2888_v10 = vld [vmem:[#allocation3 + $0x88] sm:$0xf]  ;;  %v3902_v11 = vld [vmem:[#allocation3 + $0x94] sm:$0xf0] }
  0x28   :  { %322 = vmatpush.bf16.msra.mxu1 %v2693_v33  ;;  %v3900_v12 = vld [vmem:[#allocation3 + $0x8c] sm:$0xf]  ;;  %v2885_v13 = vor.u32 %v3899_v5, %v2882_v6  ;;  %v2890_v14 = vld [vmem:[#allocation3 + $0x98] sm:$0xf0]  ;;  %v2864_v15 = vld [vmem:[#allocation3 + $0x60] sm:$0xf]  ;;  %v2889_v20 = vor.u32 %v3902_v11, %v2888_v10 }
  0x29   :  { %351 = vmatpush.bf16.msra.mxu2 %v2697_v34  ;;  %380 = vmatpush.bf16.msra.mxu3 %v2701_v36  ;;  %v3897_v16 = vld [vmem:[#allocation3 + $0x6c] sm:$0xf0]  ;;  %v3895_v17 = vld [vmem:[#allocation3 + $0x64] sm:$0xf]  ;;  %v2866_v18 = vld [vmem:[#allocation3 + $0x70] sm:$0xf0]  ;;  %v2893_v21 = vor.u32 %v3900_v12, %v2890_v14 }
  0x2a   :  { %294 = vmatmul.bf16.vlgmr.msra.gmra.mxu0 %v3847_v35  ;;  %v3848_v19 = vld [vmem:[%s4507_s0 + $0x8] sm:$0xff]  ;;  %v2865_v22 = vor.u32 %v3897_v16, %v2864_v15  ;;  %v3898_v24 = vld [vmem:[#allocation3 + $0x74] sm:$0xf0]  ;;  %v2869_v26 = vor.u32 %v3895_v17, %v2866_v18  ;;  %v2874_v27 = vld [vmem:[#allocation3 + $0x78] sm:$0xf0]  ;;  %v4276_v4 = vmov 0.0|0.0  }
  0x2b   :  { %636 = vmatpush.bf16.msrb.mxu0 %v2929_v37  ;;  %323 = vmatmul.bf16.vlgmr.msra.gmra.mxu1 %v3847_v35  ;;  %v2872_v23 = vld [vmem:[#allocation3 + $0x68] sm:$0xf]  ;;  %v3896_v25 = vld [vmem:[#allocation3 + $0x6c] sm:$0xf]  ;;  %v2848_v28 = vld [vmem:[#allocation3 + $0x40] sm:$0xf] }
  0x2c   :  { %649 = vmatpush.bf16.msrb.mxu1 %v2933_v41  ;;  %352 = vmatmul.bf16.vlgmr.msra.gmra.mxu2 %v3847_v35  ;;  %v3893_v29 = vld [vmem:[#allocation3 + $0x4c] sm:$0xf0]  ;;  %v3891_v30 = vld [vmem:[#allocation3 + $0x44] sm:$0xf]  ;;  %v2850_v31 = vld [vmem:[#allocation3 + $0x50] sm:$0xf0]  ;;  %v2873_v32 = vor.u32 %v3898_v24, %v2872_v23  ;;  %v2877_v33 = vor.u32 %v3896_v25, %v2874_v27 }
  0x2d   :  { %381 = vmatmul.bf16.vlgmr.msra.gmra.mxu3 %v3847_v35  ;;  %662 = vmatpush.bf16.msrb.mxu2 %v2937_v47  ;;  %v2849_v34 = vor.u32 %v3893_v29, %v2848_v28  ;;  %v2856_v35 = vld [vmem:[#allocation3 + $0x48] sm:$0xf]  ;;  %v3894_v36 = vld [vmem:[#allocation3 + $0x54] sm:$0xf0]  ;;  %v2853_v37 = vor.u32 %v3891_v30, %v2850_v31  ;;  %v3892_v38 = vld [vmem:[#allocation3 + $0x4c] sm:$0xf] }
  0x2e   :  { %675 = vmatpush.bf16.msrb.mxu3 %v2941_v48  ;;  %v2858_v39 = vld [vmem:[#allocation3 + $0x58] sm:$0xf0]  ;;  %v2857_v40 = vor.u32 %v3894_v36, %v2856_v35  ;;  %v2832_v41 = vld [vmem:[#allocation3 + $0x20] sm:$0xf]  ;;  %v3889_v42 = vld [vmem:[#allocation3 + $0x2c] sm:$0xf0] }
  0x2f   :  { %637 = vmatpush.bf16.msrb.mxu0 %v2913_v49  ;;  %v3887_v43 = vld [vmem:[#allocation3 + $0x24] sm:$0xf]  ;;  %v2861_v44 = vor.u32 %v3892_v38, %v2858_v39  ;;  %v2833_v45 = vor.u32 %v3889_v42, %v2832_v41  ;;  %v2834_v46 = vld [vmem:[#allocation3 + $0x30] sm:$0xf0]  ;;  %v2840_v47 = vld [vmem:[#allocation3 + $0x28] sm:$0xf] }
  0x30   :  { %650 = vmatpush.bf16.msrb.mxu1 %v2917_v53  ;;  %v3890_v48 = vld [vmem:[#allocation3 + $0x34] sm:$0xf0]  ;;  %v2837_v49 = vor.u32 %v3887_v43, %v2834_v46  ;;  %v3888_v50 = vld [vmem:[#allocation3 + $0x2c] sm:$0xf]  ;;  %v2842_v51 = vld [vmem:[#allocation3 + $0x38] sm:$0xf0] }
  0x31   :  { %663 = vmatpush.bf16.msrb.mxu2 %v2921_v59  ;;  %v2816_v52 = vld [vmem:[#allocation3] sm:$0xf]  ;;  %v3885_v53 = vld [vmem:[#allocation3 + $0xc] sm:$0xf0]  ;;  %v3883_v54 = vld [vmem:[#allocation3 + $0x4] sm:$0xf]  ;;  %v2841_v56 = vor.u32 %v3890_v48, %v2840_v47  ;;  %v2845_v57 = vor.u32 %v3888_v50, %v2842_v51 }
  0x32   :  { %676 = vmatpush.bf16.msrb.mxu3 %v2925_v60  ;;  %v2818_v55 = vld [vmem:[#allocation3 + $0x10] sm:$0xf0]  ;;  %v2817_v58 = vor.u32 %v3885_v53, %v2816_v52  ;;  %v2824_v59 = vld [vmem:[#allocation3 + $0x8] sm:$0xf]  ;;  %v3886_v60 = vld [vmem:[#allocation3 + $0x14] sm:$0xf0] }
  0x33   :  { %638 = vmatpush.bf16.msrb.mxu0 %v2897_v61  ;;  %v2821_v61 = vor.u32 %v3883_v54, %v2818_v55  ;;  %v3884_v62 = vld [vmem:[#allocation3 + $0xc] sm:$0xf]  ;;  %v2826_v63 = vld [vmem:[#allocation3 + $0x18] sm:$0xf0]  ;;  %v2825_v0 = vor.u32 %v3886_v60, %v2824_v59  ;;  %v3849_v2 = vld [vmem:[%s4507_s0 + $0x10] sm:$0xff] }
  0x34   :  { %651 = vmatpush.bf16.msrb.mxu1 %v2901_v1  ;;  %v2829_v1 = vor.u32 %v3884_v62, %v2826_v63  ;;  %v3850_v3 = vld [vmem:[%s4507_s0 + $0x18] sm:$0xff]  ;;  %v3056_v35 = vld [vmem:[#allocation3 + $0xe0] sm:$0xf]  ;;  %v3945_v36 = vld [vmem:[#allocation3 + $0xec] sm:$0xf0] }
  0x35   :  { %664 = vmatpush.bf16.msrb.mxu2 %v2905_v7  ;;  %v92_v7 = vld [vmem:[%s4509_s3] sm:$0xf]  ;;  %v3057_v41 = vor.u32 %v3945_v36, %v3056_v35  ;;  %v3058_v42 = vld [vmem:[#allocation3 + $0xf0] sm:$0xf0]  ;;  %v3064_v43 = vld [vmem:[#allocation3 + $0xe8] sm:$0xf] }
  0x36   :  { %677 = vmatpush.bf16.msrb.mxu3 %v2909_v8  ;;  %v4327_v8 = vperm.slane %v92_v7, 0  ;;  %v4331_v10 = vperm.slane %v92_v7, 1  ;;  %v4341_v16 = vperm.slane %v92_v7, 2  ;;  %v4343_v17 = vperm.slane %v92_v7, 3  ;;  %v3944_v50 = vld [vmem:[#allocation3 + $0xec] sm:$0xf] }
  0x37   :  { %639 = vmatpush.bf16.msrb.mxu0 %v2881_v9  ;;  %v3066_v51 = vld [vmem:[#allocation3 + $0xf8] sm:$0xf0]  ;;  %v3040_v54 = vld [vmem:[#allocation3 + $0xc0] sm:$0xf]  ;;  %v3941_v55 = vld [vmem:[#allocation3 + $0xcc] sm:$0xf0] }
  0x38   :  { %652 = vmatpush.bf16.msrb.mxu1 %v2885_v13  ;;  %v3069_v53 = vor.u32 %v3944_v50, %v3066_v51  ;;  %v3048_v59 = vld [vmem:[#allocation3 + $0xc8] sm:$0xf]  ;;  %v3942_v60 = vld [vmem:[#allocation3 + $0xd4] sm:$0xf0]  ;;  %v3940_v63 = vld [vmem:[#allocation3 + $0xcc] sm:$0xf] }
  0x39   :  { %665 = vmatpush.bf16.msrb.mxu2 %v2889_v20  ;;  %v3049_v62 = vor.u32 %v3942_v60, %v3048_v59  ;;  %v3935_v7 = vld [vmem:[#allocation3 + $0xa4] sm:$0xf]  ;;  %v3936_v36 = vld [vmem:[#allocation3 + $0xac] sm:$0xf] }
  0x3a   :  { %678 = vmatpush.bf16.msrb.mxu3 %v2893_v21  ;;  %299 = vmatmul.bf16.gmra.mxu0 %v3848_v19  ;;  %v3927_v59 = vld [vmem:[#allocation3 + $0x64] sm:$0xf] }
  0x3b   :  { %640 = vmatpush.bf16.msrb.mxu0 %v2865_v22  ;;  %328 = vmatmul.bf16.gmra.mxu1 %v3848_v19 }
  0x3c   :  { %653 = vmatpush.bf16.msrb.mxu1 %v2869_v26  ;;  %357 = vmatmul.bf16.gmra.mxu2 %v3848_v19 }
  0x3d   :  { %386 = vmatmul.bf16.gmra.mxu3 %v3848_v19  ;;  %666 = vmatpush.bf16.msrb.mxu2 %v2873_v32 }
  0x3e   :  { %679 = vmatpush.bf16.msrb.mxu3 %v2877_v33 }
  0x3f   :  { %641 = vmatpush.bf16.msrb.mxu0 %v2849_v34 }
  0x40   :  { %654 = vmatpush.bf16.msrb.mxu1 %v2853_v37  ;;  %v3943_v37 = vld [vmem:[#allocation3 + $0xe4] sm:$0xf] }
  0x41   :  { %667 = vmatpush.bf16.msrb.mxu2 %v2857_v40  ;;  %v3061_v48 = vor.u32 %v3943_v37, %v3058_v42  ;;  %v3034_v37 = vld [vmem:[#allocation3 + $0xb8] sm:$0xf0]  ;;  %v3933_v42 = vld [vmem:[#allocation3 + $0x8c] sm:$0xf0] }
  0x42   :  { %680 = vmatpush.bf16.msrb.mxu3 %v2861_v44  ;;  %v3946_v44 = vld [vmem:[#allocation3 + $0xf4] sm:$0xf0] }
  0x43   :  { %642 = vmatpush.bf16.msrb.mxu0 %v2833_v45 }
  0x44   :  { %655 = vmatpush.bf16.msrb.mxu1 %v2837_v49  ;;  %v3065_v49 = vor.u32 %v3946_v44, %v3064_v43  ;;  %v3931_v43 = vld [vmem:[#allocation3 + $0x84] sm:$0xf] }
  0x45   :  { %668 = vmatpush.bf16.msrb.mxu2 %v2841_v56  ;;  %v3939_v56 = vld [vmem:[#allocation3 + $0xc4] sm:$0xf] }
  0x46   :  { %681 = vmatpush.bf16.msrb.mxu3 %v2845_v57  ;;  %v3041_v57 = vor.u32 %v3941_v55, %v3040_v54  ;;  %v3018_v54 = vld [vmem:[#allocation3 + $0x98] sm:$0xf0] }
  0x47   :  { %643 = vmatpush.bf16.msrb.mxu0 %v2817_v58  ;;  %v3042_v58 = vld [vmem:[#allocation3 + $0xd0] sm:$0xf0] }
  0x48   :  { %656 = vmatpush.bf16.msrb.mxu1 %v2821_v61  ;;  %v3045_v61 = vor.u32 %v3939_v56, %v3042_v58  ;;  %v3929_v58 = vld [vmem:[#allocation3 + $0x6c] sm:$0xf0] }
  0x49   :  { %669 = vmatpush.bf16.msrb.mxu2 %v2825_v0  ;;  %v3050_v0 = vld [vmem:[#allocation3 + $0xd8] sm:$0xf0] }
  0x4a   :  { %682 = vmatpush.bf16.msrb.mxu3 %v2829_v1  ;;  %304 = vmatmul.bf16.gmra.mxu0 %v3849_v2  ;;  %v3053_v1 = vor.u32 %v3940_v63, %v3050_v0  ;;  %v2994_v0 = vld [vmem:[#allocation3 + $0x70] sm:$0xf0] }
  0x4b   :  { %333 = vmatmul.bf16.gmra.mxu1 %v3849_v2  ;;  %911 = vmatpush.bf16.msra.mxu0 %v3057_v41  ;;  %v3008_v41 = vld [vmem:[#allocation3 + $0x80] sm:$0xf] }
  0x4c   :  { %362 = vmatmul.bf16.gmra.mxu2 %v3849_v2  ;;  %924 = vmatpush.bf16.msra.mxu1 %v3061_v48  ;;  %v3009_v44 = vor.u32 %v3933_v42, %v3008_v41  ;;  %v3016_v48 = vld [vmem:[#allocation3 + $0x88] sm:$0xf]  ;;  %v3926_v41 = vld [vmem:[#allocation3 + $0x54] sm:$0xf0] }
  0x4d   :  { %391 = vmatmul.bf16.gmra.mxu3 %v3849_v2  ;;  %937 = vmatpush.bf16.msra.mxu2 %v3065_v49  ;;  %v3934_v49 = vld [vmem:[#allocation3 + $0x94] sm:$0xf0] }
  0x4e   :  { %950 = vmatpush.bf16.msra.mxu3 %v3069_v53  ;;  %v3017_v51 = vor.u32 %v3934_v49, %v3016_v48  ;;  %v3932_v53 = vld [vmem:[#allocation3 + $0x8c] sm:$0xf] }
  0x4f   :  { %912 = vmatpush.bf16.msra.mxu0 %v3041_v57  ;;  %v3021_v55 = vor.u32 %v3932_v53, %v3018_v54  ;;  %v2992_v57 = vld [vmem:[#allocation3 + $0x60] sm:$0xf]  ;;  %v3919_v53 = vld [vmem:[#allocation3 + $0x24] sm:$0xf] }
  0x50   :  { %925 = vmatpush.bf16.msra.mxu1 %v3045_v61  ;;  %v2993_v63 = vor.u32 %v3929_v58, %v2992_v57  ;;  %v2962_v58 = vld [vmem:[#allocation3 + $0x30] sm:$0xf0] }
  0x51   :  { %938 = vmatpush.bf16.msra.mxu2 %v3049_v62 }
  0x52   :  { %951 = vmatpush.bf16.msra.mxu3 %v3053_v1  ;;  %v3000_v1 = vld [vmem:[#allocation3 + $0x68] sm:$0xf] }
  0x5a   :  { %309 = vmatmul.bf16.gmra.mxu0 %v3850_v3 }
  0x5b   :  { %338 = vmatmul.bf16.gmra.mxu1 %v3850_v3 }
  0x5c   :  { %367 = vmatmul.bf16.gmra.mxu2 %v3850_v3 }
  0x5d   :  { %396 = vmatmul.bf16.gmra.mxu3 %v3850_v3  ;;  %v3024_v3 = vld [vmem:[#allocation3 + $0xa0] sm:$0xf] }
  0x6a   :  { %644 = vmatmul.bf16.vlgmr.msrb.gmra.mxu0 %v4276_v4 }
  0x6b   :  { %657 = vmatmul.bf16.vlgmr.msrb.gmra.mxu1 %v4276_v4 }
  0x6c   :  { %670 = vmatmul.bf16.vlgmr.msrb.gmra.mxu2 %v4276_v4 }
  0x6d   :  { %683 = vmatmul.bf16.vlgmr.msrb.gmra.mxu3 %v4276_v4  ;;  %v3937_v4 = vld [vmem:[#allocation3 + $0xac] sm:$0xf0] }
  0xa7   :  { %v4320_v5 = vpop.f32.mrf.mxu0 }
  0xa8   :  { %v4322_v6 = vpop.f32.mrf.mxu1 }
  0xaf   :  { %v4329_v9 = vpop.f32.mrf.mxu2  ;;  %v297_v12 = vpop.f32.mrf.mxu0 }
  0xb0   :  { %v4333_v11 = vpop.f32.mrf.mxu3  ;;  %v4336_v13 = vadd.f32 %v297_v12, %v4327_v8  ;;  %v326_v14 = vpop.f32.mrf.mxu1 }
  0xb1   :  { %v4339_v15 = vadd.f32 %v326_v14, %v4331_v10 }
  0xb7   :  { %v355_v18 = vpop.f32.mrf.mxu2  ;;  %v300_v21 = vpop.f32.mrf.mxu0 }
  0xb8   :  { %v4346_v19 = vadd.f32 %v355_v18, %v4341_v16  ;;  %v384_v20 = vpop.f32.mrf.mxu3  ;;  %v4352_v23 = vadd.f32 %v300_v21, %v4327_v8  ;;  %v329_v24 = vpop.f32.mrf.mxu1  ;;  %v3026_v21 = vld [vmem:[#allocation3 + $0xb0] sm:$0xf0] }
  0xb9   :  { %v4349_v22 = vadd.f32 %v384_v20, %v4343_v17  ;;  %v4355_v25 = vadd.f32 %v329_v24, %v4331_v10  ;;  %v3025_v20 = vor.u32 %v3937_v4, %v3024_v3  ;;  %v3032_v24 = vld [vmem:[#allocation3 + $0xa8] sm:$0xf] }
  0xbb   :  { %913 = vmatpush.bf16.msra.mxu0 %v3025_v20  ;;  %v3928_v20 = vld [vmem:[#allocation3 + $0x6c] sm:$0xf] }
  0xbf   :  { %v358_v26 = vpop.f32.mrf.mxu2  ;;  %v302_v29 = vpop.f32.mrf.mxu0  ;;  %914 = vmatpush.bf16.msra.mxu0 %v3009_v44  ;;  %v3924_v44 = vld [vmem:[#allocation3 + $0x4c] sm:$0xf] }
  0xc0   :  { %v4358_v27 = vadd.f32 %v358_v26, %v4341_v16  ;;  %v387_v28 = vpop.f32.mrf.mxu3  ;;  %v4364_v31 = vadd.f32 %v302_v29, %v4327_v8  ;;  %v331_v32 = vpop.f32.mrf.mxu1  ;;  %v3938_v26 = vld [vmem:[#allocation3 + $0xb4] sm:$0xf0] }
  0xc1   :  { %v4361_v30 = vadd.f32 %v387_v28, %v4343_v17  ;;  %v4367_v33 = vadd.f32 %v331_v32, %v4331_v10  ;;  %v3033_v35 = vor.u32 %v3938_v26, %v3032_v24 }
  0xc3   :  { %939 = vmatpush.bf16.msra.mxu2 %v3033_v35  ;;  %915 = vmatpush.bf16.msra.mxu0 %v2993_v63  ;;  %v3923_v35 = vld [vmem:[#allocation3 + $0x44] sm:$0xf] }
  0xc7   :  { %v360_v34 = vpop.f32.mrf.mxu2  ;;  %v305_v40 = vpop.f32.mrf.mxu0  ;;  %940 = vmatpush.bf16.msra.mxu2 %v3017_v51  ;;  %v3921_v51 = vld [vmem:[#allocation3 + $0x2c] sm:$0xf0] }
  0xc8   :  { %v4370_v38 = vadd.f32 %v360_v34, %v4341_v16  ;;  %v389_v39 = vpop.f32.mrf.mxu3  ;;  %v4376_v46 = vadd.f32 %v305_v40, %v4327_v8  ;;  %v334_v47 = vpop.f32.mrf.mxu1  ;;  %v3029_v34 = vor.u32 %v3935_v7, %v3026_v21  ;;  %v3037_v40 = vor.u32 %v3936_v36, %v3034_v37  ;;  %v3002_v21 = vld [vmem:[#allocation3 + $0x78] sm:$0xf0]  ;;  %v2978_v37 = vld [vmem:[#allocation3 + $0x50] sm:$0xf0] }
  0xc9   :  { %v4373_v45 = vadd.f32 %v389_v39, %v4343_v17  ;;  %v4379_v52 = vadd.f32 %v334_v47, %v4331_v10  ;;  %v3010_v47 = vld [vmem:[#allocation3 + $0x90] sm:$0xf0]  ;;  %v3005_v26 = vor.u32 %v3928_v20, %v3002_v21  ;;  %v2981_v42 = vor.u32 %v3923_v35, %v2978_v37  ;;  %v2944_v21 = vld [vmem:[#allocation3] sm:$0xf]  ;;  %v3918_v37 = vld [vmem:[#allocation3 + $0x14] sm:$0xf0] }
  0xca   :  { %926 = vmatpush.bf16.msra.mxu1 %v3029_v34  ;;  %952 = vmatpush.bf16.msra.mxu3 %v3037_v40  ;;  %v3013_v50 = vor.u32 %v3931_v43, %v3010_v47  ;;  %v3925_v34 = vld [vmem:[#allocation3 + $0x4c] sm:$0xf0]  ;;  %v2984_v40 = vld [vmem:[#allocation3 + $0x48] sm:$0xf]  ;;  %v2986_v47 = vld [vmem:[#allocation3 + $0x58] sm:$0xf0] }
  0xcb   :  { %v2985_v43 = vor.u32 %v3926_v41, %v2984_v40  ;;  %v2989_v48 = vor.u32 %v3924_v44, %v2986_v47  ;;  %v2946_v35 = vld [vmem:[#allocation3 + $0x10] sm:$0xf0]  ;;  %v296_v47 = vadd.f32 %v4320_v5, %v4327_v8 }
  0xce   :  { %927 = vmatpush.bf16.msra.mxu1 %v3013_v50  ;;  %953 = vmatpush.bf16.msra.mxu3 %v3021_v55  ;;  %v2960_v50 = vld [vmem:[#allocation3 + $0x20] sm:$0xf] }
  0xcf   :  { %v363_v2 = vpop.f32.mrf.mxu2  ;;  %v307_v18 = vpop.f32.mrf.mxu0  ;;  %v2961_v57 = vor.u32 %v3921_v51, %v2960_v50 }
  0xd0   :  { %v4382_v12 = vadd.f32 %v363_v2, %v4341_v16  ;;  %v392_v14 = vpop.f32.mrf.mxu3  ;;  %v4388_v29 = vadd.f32 %v307_v18, %v4327_v8  ;;  %v336_v32 = vpop.f32.mrf.mxu1  ;;  %v3930_v2 = vld [vmem:[#allocation3 + $0x74] sm:$0xf0] }
  0xd1   :  { %v4385_v28 = vadd.f32 %v392_v14, %v4343_v17  ;;  %v4391_v39 = vadd.f32 %v336_v32, %v4331_v10  ;;  %v2997_v14 = vor.u32 %v3927_v59, %v2994_v0  ;;  %v3001_v18 = vor.u32 %v3930_v2, %v3000_v1  ;;  %v2976_v32 = vld [vmem:[#allocation3 + $0x40] sm:$0xf]  ;;  %v2968_v59 = vld [vmem:[#allocation3 + $0x28] sm:$0xf] }
  0xd2   :  { %954 = vmatpush.bf16.msra.mxu3 %v3005_v26  ;;  %v2977_v36 = vor.u32 %v3925_v34, %v2976_v32  ;;  %v2965_v1 = vor.u32 %v3919_v53, %v2962_v58  ;;  %v3917_v26 = vld [vmem:[#allocation3 + $0xc] sm:$0xf0]  ;;  %v3915_v32 = vld [vmem:[#allocation3 + $0x4] sm:$0xf] }
  0xd3   :  { %928 = vmatpush.bf16.msra.mxu1 %v2997_v14  ;;  %941 = vmatpush.bf16.msra.mxu2 %v3001_v18  ;;  %v2970_v14 = vld [vmem:[#allocation3 + $0x38] sm:$0xf0]  ;;  %v2945_v34 = vor.u32 %v3917_v26, %v2944_v21  ;;  %v2949_v40 = vor.u32 %v3915_v32, %v2946_v35 }
  0xd4   :  { %916 = vmatpush.bf16.msra.mxu0 %v2977_v36  ;;  %v2952_v36 = vld [vmem:[#allocation3 + $0x8] sm:$0xf] }
  0xd5   :  { %v2953_v41 = vor.u32 %v3918_v37, %v2952_v36 }
  0xd6   :  { %955 = vmatpush.bf16.msra.mxu3 %v2989_v48 }
  0xd7   :  { %v365_v56 = vpop.f32.mrf.mxu2  ;;  %v310_v62 = vpop.f32.mrf.mxu0  ;;  %929 = vmatpush.bf16.msra.mxu1 %v2981_v42  ;;  %942 = vmatpush.bf16.msra.mxu2 %v2985_v43  ;;  %v3916_v42 = vld [vmem:[#allocation3 + $0xc] sm:$0xf]  ;;  %v2954_v43 = vld [vmem:[#allocation3 + $0x18] sm:$0xf0] }
  0xd8   :  { %v4394_v60 = vadd.f32 %v365_v56, %v4341_v16  ;;  %v394_v61 = vpop.f32.mrf.mxu3  ;;  %v4400_v4 = vadd.f32 %v310_v62, %v4327_v8  ;;  %v339_v7 = vpop.f32.mrf.mxu1  ;;  %917 = vmatpush.bf16.msra.mxu0 %v2961_v57  ;;  %v2957_v44 = vor.u32 %v3916_v42, %v2954_v43 }
  0xd9   :  { %v4397_v3 = vadd.f32 %v394_v61, %v4343_v17  ;;  %v4403_v24 = vadd.f32 %v339_v7, %v4331_v10  ;;  %v3922_v61 = vld [vmem:[#allocation3 + $0x34] sm:$0xf0]  ;;  %v3920_v7 = vld [vmem:[#allocation3 + $0x2c] sm:$0xf] }
  0xda   :  { %v2969_v2 = vor.u32 %v3922_v61, %v2968_v59  ;;  %v2973_v20 = vor.u32 %v3920_v7, %v2970_v14 }
  0xdb   :  { %930 = vmatpush.bf16.msra.mxu1 %v2965_v1 }
  0xdc   :  { %943 = vmatpush.bf16.msra.mxu2 %v2969_v2  ;;  %956 = vmatpush.bf16.msra.mxu3 %v2973_v20 }
  0xdd   :  { %918 = vmatpush.bf16.msra.mxu0 %v2945_v34 }
  0xdf   :  { %v368_v49 = vpop.f32.mrf.mxu2  ;;  %v312_v56 = vpop.f32.mrf.mxu0  ;;  %931 = vmatpush.bf16.msra.mxu1 %v2949_v40 }
  0xe0   :  { %v4406_v54 = vadd.f32 %v368_v49, %v4341_v16  ;;  %v397_v55 = vpop.f32.mrf.mxu3  ;;  %v4412_v63 = vadd.f32 %v312_v56, %v4327_v8  ;;  %v341_v0 = vpop.f32.mrf.mxu1  ;;  %944 = vmatpush.bf16.msra.mxu2 %v2953_v41  ;;  %v325_v49 = vadd.f32 %v4322_v6, %v4331_v10  ;;  %957 = vmatpush.bf16.msra.mxu3 %v2957_v44 }
  0xe1   :  { %v4409_v62 = vadd.f32 %v397_v55, %v4343_v17  ;;  %v4415_v18 = vadd.f32 %v341_v0, %v4331_v10  ;;  %v354_v8 = vadd.f32 %v4329_v9, %v4341_v16  ;;  %v383_v6 = vadd.f32 %v4333_v11, %v4343_v17 }
  0xe7   :  { %v370_v48 = vpop.f32.mrf.mxu2  ;;  %v645_v53 = vpop.f32.mrf.mxu0 }
  0xe8   :  { %v4422_v50 = vadd.f32 %v370_v48, %v4341_v16  ;;  %v399_v51 = vpop.f32.mrf.mxu3  ;;  %v688_v56 = vadd.f32 %v645_v53, %v296_v47  ;;  %v658_v57 = vpop.f32.mrf.mxu1  ;;  %v3185_v48 = vld [vmem:[#allocation3 + $0xe0] sm:$0xf] }
  0xe9   :  { %v4425_v55 = vadd.f32 %v399_v51, %v4343_v17  ;;  %v689_v58 = vadd.f32 %v658_v57, %v325_v49  ;;  %v3977_v49 = vld [vmem:[#allocation3 + $0xec] sm:$0xf0]  ;;  %v3975_v51 = vld [vmem:[#allocation3 + $0xe4] sm:$0xf]  ;;  %v3193_v57 = vld [vmem:[#allocation3 + $0xe8] sm:$0xf] }
  0xea   :  { %v692_v59 = vmul.f32 0.5, %v688_v56  ;;  %v3186_v53 = vor.u32 %v3977_v49, %v3185_v48  ;;  %v3187_v56 = vld [vmem:[#allocation3 + $0xf0] sm:$0xf0]  ;;  %v3137_v49 = vld [vmem:[#allocation3 + $0x80] sm:$0xf] }
  0xeb   :  { %v696_v5 = vmul.f32 0.5, %v689_v58  ;;  %v3978_v58 = vld [vmem:[#allocation3 + $0xf4] sm:$0xf0] }
  0xec   :  { %4142 = vtanh.f32 %v692_v59  ;;  %v3190_v59 = vor.u32 %v3975_v51, %v3187_v56  ;;  %1187 = vmatpush.bf16.msrb.mxu0 %v3186_v53  ;;  %v3965_v51 = vld [vmem:[#allocation3 + $0x8c] sm:$0xf0]  ;;  %v3963_v53 = vld [vmem:[#allocation3 + $0x84] sm:$0xf] }
  0xed   :  { %4144 = vtanh.f32 %v696_v5  ;;  %v3194_v5 = vor.u32 %v3978_v58, %v3193_v57  ;;  %v3138_v56 = vor.u32 %v3965_v51, %v3137_v49  ;;  %v3139_v57 = vld [vmem:[#allocation3 + $0x90] sm:$0xf0]  ;;  %v3145_v58 = vld [vmem:[#allocation3 + $0x88] sm:$0xf]  ;;  %v3089_v51 = vld [vmem:[#allocation3 + $0x20] sm:$0xf] }
  0xee   :  { %1200 = vmatpush.bf16.msrb.mxu1 %v3190_v59  ;;  %v3966_v59 = vld [vmem:[#allocation3 + $0x94] sm:$0xf0] }
  0xef   :  { %v671_v10 = vpop.f32.mrf.mxu2  ;;  %v647_v1 = vpop.f32.mrf.mxu0  ;;  %1213 = vmatpush.bf16.msrb.mxu2 %v3194_v5  ;;  %v3142_v5 = vor.u32 %v3963_v53, %v3139_v57  ;;  %v3953_v53 = vld [vmem:[#allocation3 + $0x2c] sm:$0xf0] }
  0xf0   :  { %v690_v61 = vadd.f32 %v671_v10, %v354_v8  ;;  %v684_v0 = vpop.f32.mrf.mxu3  ;;  %v660_v7 = vpop.f32.mrf.mxu1  ;;  %v3976_v8 = vld [vmem:[#allocation3 + $0xec] sm:$0xf]  ;;  %v3971_v1 = vld [vmem:[#allocation3 + $0xc4] sm:$0xf]  ;;  %v3090_v57 = vor.u32 %v3953_v53, %v3089_v51 }
  0xf1   :  { %v691_v2 = vadd.f32 %v684_v0, %v383_v6  ;;  %v3195_v6 = vld [vmem:[#allocation3 + $0xf8] sm:$0xf0]  ;;  %v3973_v0 = vld [vmem:[#allocation3 + $0xcc] sm:$0xf0]  ;;  %v3171_v7 = vld [vmem:[#allocation3 + $0xd0] sm:$0xf0] }
  0xf2   :  { %4146 = vtanh.f32 %v690_v61  ;;  %v4143_v14 = vpop.eup %4142  ;;  %v3198_v10 = vor.u32 %v3976_v8, %v3195_v6  ;;  %v3169_v61 = vld [vmem:[#allocation3 + $0xc0] sm:$0xf]  ;;  %v3146_v8 = vor.u32 %v3966_v59, %v3145_v58  ;;  %v3964_v6 = vld [vmem:[#allocation3 + $0x8c] sm:$0xf]  ;;  %v3091_v58 = vld [vmem:[#allocation3 + $0x30] sm:$0xf0] }
  0xf3   :  { %v701_v20 = vmul.f32 0.5, %v691_v2  ;;  %v4145_v21 = vpop.eup %4144  ;;  %v694_v26 = vadd.f32 1.0, %v4143_v14  ;;  %v3170_v2 = vor.u32 %v3973_v0, %v3169_v61  ;;  %v3177_v14 = vld [vmem:[#allocation3 + $0xc8] sm:$0xf]  ;;  %v3121_v0 = vld [vmem:[#allocation3 + $0x60] sm:$0xf] }
  0xf4   :  { %v698_v32 = vadd.f32 1.0, %v4145_v21  ;;  %1226 = vmatpush.bf16.msrb.mxu3 %v3198_v10  ;;  %v3174_v21 = vor.u32 %v3971_v1, %v3171_v7  ;;  %v3147_v10 = vld [vmem:[#allocation3 + $0x98] sm:$0xf0]  ;;  %v3961_v1 = vld [vmem:[#allocation3 + $0x6c] sm:$0xf0] }
  0xf5   :  { %4148 = vtanh.f32 %v701_v20  ;;  %v695_v34 = vmul.f32 0.5, %v694_v26  ;;  %v3974_v20 = vld [vmem:[#allocation3 + $0xd4] sm:$0xf0]  ;;  %1188 = vmatpush.bf16.msrb.mxu0 %v3170_v2  ;;  %v3150_v61 = vor.u32 %v3964_v6, %v3147_v10  ;;  %v3959_v2 = vld [vmem:[#allocation3 + $0x64] sm:$0xf]  ;;  %v3122_v7 = vor.u32 %v3961_v1, %v3121_v0 }
  0xf6   :  { %v699_v35 = vmul.f32 0.5, %v698_v32  ;;  %v3178_v26 = vor.u32 %v3974_v20, %v3177_v14  ;;  %v3972_v32 = vld [vmem:[#allocation3 + $0xcc] sm:$0xf]  ;;  %1201 = vmatpush.bf16.msrb.mxu1 %v3174_v21  ;;  %v3123_v14 = vld [vmem:[#allocation3 + $0x70] sm:$0xf0] }
  0xf7   :  { %v673_v9 = vpop.f32.mrf.mxu2  ;;  %v3129_v20 = vld [vmem:[#allocation3 + $0x68] sm:$0xf]  ;;  %v3962_v21 = vld [vmem:[#allocation3 + $0x74] sm:$0xf0]  ;;  %v3952_v10 = vld [vmem:[#allocation3 + $0x2c] sm:$0xf] }
  0xf8   :  { %v4147_v16 = vpop.eup %4146  ;;  %v686_v36 = vpop.f32.mrf.mxu3  ;;  %v705_v37 = vmul.f32 0.0, %v699_v35  ;;  %1214 = vmatpush.bf16.msrb.mxu2 %v3178_v26  ;;  %v3153_v9 = vld [vmem:[#allocation3 + $0xa0] sm:$0xf]  ;;  %v3126_v26 = vor.u32 %v3959_v2, %v3123_v14  ;;  %v3097_v59 = vld [vmem:[#allocation3 + $0x28] sm:$0xf] }
  0xf9   :  { %v706_v11 = vmul.f32 %v4147_v16, %v695_v34  ;;  %v3179_v34 = vld [vmem:[#allocation3 + $0xd8] sm:$0xf0]  ;;  %v3969_v16 = vld [vmem:[#allocation3 + $0xac] sm:$0xf0]  ;;  %v3967_v36 = vld [vmem:[#allocation3 + $0xa4] sm:$0xf] }
  0xfa   :  { %v3182_v35 = vor.u32 %v3972_v32, %v3179_v34  ;;  %v3130_v32 = vor.u32 %v3962_v21, %v3129_v20  ;;  %v3960_v34 = vld [vmem:[#allocation3 + $0x6c] sm:$0xf]  ;;  %v3073_v1 = vld [vmem:[#allocation3] sm:$0xf]  ;;  %v3949_v2 = vld [vmem:[#allocation3 + $0xc] sm:$0xf0] }
  0xfb   :  { %v4149_v17 = vpop.eup %4148  ;;  %v4431_v40 = vadd.f32 %v706_v11, %v705_v37  ;;  %v3154_v37 = vor.u32 %v3969_v16, %v3153_v9  ;;  %v3155_v11 = vld [vmem:[#allocation3 + $0xb0] sm:$0xf0]  ;;  %v3105_v16 = vld [vmem:[#allocation3 + $0x40] sm:$0xf]  ;;  %v3074_v14 = vor.u32 %v3949_v2, %v3073_v1  ;;  %v3081_v21 = vld [vmem:[#allocation3 + $0x8] sm:$0xf] }
  0xfc   :  { %v703_v41 = vadd.f32 1.0, %v4149_v17  ;;  %1227 = vmatpush.bf16.msrb.mxu3 %v3182_v35  ;;  %v3161_v17 = vld [vmem:[#allocation3 + $0xa8] sm:$0xf]  ;;  %v3131_v35 = vld [vmem:[#allocation3 + $0x78] sm:$0xf0] }
  0xfd   :  { %4150 = vtanh.f32 %v4431_v40  ;;  %1189 = vmatpush.bf16.msrb.mxu0 %v3154_v37  ;;  %v3134_v9 = vor.u32 %v3960_v34, %v3131_v35  ;;  %v3955_v37 = vld [vmem:[#allocation3 + $0x44] sm:$0xf]  ;;  %v3075_v20 = vld [vmem:[#allocation3 + $0x10] sm:$0xf0]  ;;  %v3948_v35 = vld [vmem:[#allocation3 + $0xc] sm:$0xf] }
  0xfe   :  { %v704_v42 = vmul.f32 0.5, %v703_v41  ;;  %v3970_v41 = vld [vmem:[#allocation3 + $0xb4] sm:$0xf0] }
 0x101   :  { %1190 = vmatpush.bf16.msrb.mxu0 %v3138_v56  ;;  %v3951_v56 = vld [vmem:[#allocation3 + $0x24] sm:$0xf] }
 0x103   :  { %v4151_v43 = vpop.eup %4150 }
 0x104   :  { %v709_v44 = vmul.f32 %v4151_v43, %v704_v42  ;;  %v3158_v42 = vor.u32 %v3967_v36, %v3155_v11  ;;  %v3162_v43 = vor.u32 %v3970_v41, %v3161_v17  ;;  %v3957_v36 = vld [vmem:[#allocation3 + $0x4c] sm:$0xf0]  ;;  %v3107_v17 = vld [vmem:[#allocation3 + $0x50] sm:$0xf0]  ;;  %v3113_v41 = vld [vmem:[#allocation3 + $0x48] sm:$0xf] }
 0x105   :  { %1191 = vmatpush.bf16.msrb.mxu0 %v3122_v7  ;;  %v3106_v11 = vor.u32 %v3957_v36, %v3105_v16  ;;  %v3947_v7 = vld [vmem:[#allocation3 + $0x4] sm:$0xf] }
 0x106   :  { %v710_v47 = vpack.c.bf16 %v709_v44, %v709_v44  ;;  %v3968_v44 = vld [vmem:[#allocation3 + $0xac] sm:$0xf]  ;;  %1202 = vmatpush.bf16.msrb.mxu1 %v3158_v42  ;;  %1215 = vmatpush.bf16.msrb.mxu2 %v3162_v43  ;;  %v3958_v42 = vld [vmem:[#allocation3 + $0x54] sm:$0xf0]  ;;  %v3110_v43 = vor.u32 %v3955_v37, %v3107_v17 }
 0x108   :  { %711 = vst [vmem:[%s4510_s4] sm:$0xf] %v710_v47  ;;  %919 = vmatmul.bf16.vlgmr.msra.gmra.mxu0 %v710_v47  ;;  %932 = vmatmul.bf16.vlgmr.msra.gmra.mxu1 %v710_v47 }
 0x109   :  { %945 = vmatmul.bf16.vlgmr.msra.gmra.mxu2 %v710_v47  ;;  %958 = vmatmul.bf16.vlgmr.msra.gmra.mxu3 %v710_v47  ;;  %v3163_v47 = vld [vmem:[#allocation3 + $0xb8] sm:$0xf0] }
 0x10a   :  { %v3166_v48 = vor.u32 %v3968_v44, %v3163_v47  ;;  %1203 = vmatpush.bf16.msrb.mxu1 %v3142_v5  ;;  %1216 = vmatpush.bf16.msrb.mxu2 %v3146_v8  ;;  %v3114_v44 = vor.u32 %v3958_v42, %v3113_v41  ;;  %v3956_v47 = vld [vmem:[#allocation3 + $0x4c] sm:$0xf]  ;;  %v3954_v5 = vld [vmem:[#allocation3 + $0x34] sm:$0xf0]  ;;  %v3094_v8 = vor.u32 %v3951_v56, %v3091_v58 }
 0x10b   :  { %1192 = vmatpush.bf16.msrb.mxu0 %v3106_v11  ;;  %v3098_v6 = vor.u32 %v3954_v5, %v3097_v59 }
 0x10c   :  { %1228 = vmatpush.bf16.msrb.mxu3 %v3166_v48  ;;  %v3115_v48 = vld [vmem:[#allocation3 + $0x58] sm:$0xf0] }
 0x10d   :  { %v3118_v49 = vor.u32 %v3956_v47, %v3115_v48 }
 0x10e   :  { %1204 = vmatpush.bf16.msrb.mxu1 %v3126_v26  ;;  %1217 = vmatpush.bf16.msrb.mxu2 %v3130_v32  ;;  %v3950_v26 = vld [vmem:[#allocation3 + $0x14] sm:$0xf0]  ;;  %v3078_v32 = vor.u32 %v3947_v7, %v3075_v20  ;;  %v4009_v20 = vld [vmem:[#allocation3 + $0xec] sm:$0xf0] }
 0x10f   :  { %1193 = vmatpush.bf16.msrb.mxu0 %v3090_v57  ;;  %v3082_v34 = vor.u32 %v3950_v26, %v3081_v21  ;;  %v4007_v21 = vld [vmem:[#allocation3 + $0xe4] sm:$0xf] }
 0x110   :  { %1229 = vmatpush.bf16.msrb.mxu3 %v3150_v61  ;;  %v3099_v61 = vld [vmem:[#allocation3 + $0x38] sm:$0xf0] }
 0x111   :  { %v3102_v0 = vor.u32 %v3952_v10, %v3099_v61 }
 0x112   :  { %1205 = vmatpush.bf16.msrb.mxu1 %v3110_v43  ;;  %1218 = vmatpush.bf16.msrb.mxu2 %v3114_v44 }
 0x113   :  { %1194 = vmatpush.bf16.msrb.mxu0 %v3074_v14 }
 0x114   :  { %1230 = vmatpush.bf16.msrb.mxu3 %v3134_v9  ;;  %v3083_v9 = vld [vmem:[#allocation3 + $0x18] sm:$0xf0] }
 0x115   :  { %v3086_v16 = vor.u32 %v3948_v35, %v3083_v9  ;;  %v4010_v35 = vld [vmem:[#allocation3 + $0xf4] sm:$0xf0] }
 0x116   :  { %1206 = vmatpush.bf16.msrb.mxu1 %v3094_v8  ;;  %1219 = vmatpush.bf16.msrb.mxu2 %v3098_v6 }
 0x118   :  { %1231 = vmatpush.bf16.msrb.mxu3 %v3118_v49 }
 0x11a   :  { %1207 = vmatpush.bf16.msrb.mxu1 %v3078_v32  ;;  %1220 = vmatpush.bf16.msrb.mxu2 %v3082_v34  ;;  %v3316_v32 = vld [vmem:[#allocation3 + $0xf0] sm:$0xf0]  ;;  %v3322_v34 = vld [vmem:[#allocation3 + $0xe8] sm:$0xf] }
 0x11b   :  { %v3319_v9 = vor.u32 %v4007_v21, %v3316_v32  ;;  %v3274_v21 = vld [vmem:[#allocation3 + $0x88] sm:$0xf] }
 0x11c   :  { %1232 = vmatpush.bf16.msrb.mxu3 %v3102_v0 }
 0x11e   :  { %1476 = vmatpush.bf16.msra.mxu1 %v3319_v9  ;;  %v3276_v9 = vld [vmem:[#allocation3 + $0x98] sm:$0xf0] }
 0x120   :  { %1233 = vmatpush.bf16.msrb.mxu3 %v3086_v16  ;;  %v3323_v16 = vor.u32 %v4010_v35, %v3322_v34  ;;  %v3996_v35 = vld [vmem:[#allocation3 + $0x8c] sm:$0xf] }
 0x122   :  { %1489 = vmatpush.bf16.msra.mxu2 %v3323_v16  ;;  %v3279_v16 = vor.u32 %v3996_v35, %v3276_v9  ;;  %v3202_v35 = vld [vmem:[#allocation3] sm:$0xf]  ;;  %v3981_v9 = vld [vmem:[#allocation3 + $0xc] sm:$0xf0] }
 0x185   :  { %v920_v36 = vpop.f32.mrf.mxu0  ;;  %v933_v37 = vpop.f32.mrf.mxu1 }
 0x186   :  { %v963_v11 = vadd.f32 %v920_v36, %v4336_v13  ;;  %v964_v17 = vadd.f32 %v933_v37, %v4339_v15  ;;  %v4008_v36 = vld [vmem:[#allocation3 + $0xec] sm:$0xf]  ;;  %v3324_v37 = vld [vmem:[#allocation3 + $0xf8] sm:$0xf0] }
 0x188   :  { %v967_v41 = vmul.f32 0.5, %v963_v11  ;;  %v971_v42 = vmul.f32 0.5, %v964_v17  ;;  %v3327_v11 = vor.u32 %v4008_v36, %v3324_v37  ;;  %v3298_v17 = vld [vmem:[#allocation3 + $0xc0] sm:$0xf]  ;;  %v3993_v37 = vld [vmem:[#allocation3 + $0x6c] sm:$0xf0] }
 0x189   :  { %v3250_v36 = vld [vmem:[#allocation3 + $0x60] sm:$0xf] }
 0x18a   :  { %4152 = vtanh.f32 %v967_v41  ;;  %v4005_v41 = vld [vmem:[#allocation3 + $0xcc] sm:$0xf0]  ;;  %1502 = vmatpush.bf16.msra.mxu3 %v3327_v11  ;;  %v3991_v11 = vld [vmem:[#allocation3 + $0x64] sm:$0xf] }
 0x18b   :  { %4154 = vtanh.f32 %v971_v42  ;;  %v4003_v42 = vld [vmem:[#allocation3 + $0xc4] sm:$0xf] }
 0x18c   :  { %v946_v43 = vpop.f32.mrf.mxu2  ;;  %v959_v44 = vpop.f32.mrf.mxu3 }
 0x18d   :  { %v965_v47 = vadd.f32 %v946_v43, %v4346_v19  ;;  %v966_v48 = vadd.f32 %v959_v44, %v4349_v22  ;;  %v922_v49 = vpop.f32.mrf.mxu0  ;;  %v935_v51 = vpop.f32.mrf.mxu1  ;;  %v3299_v43 = vor.u32 %v4005_v41, %v3298_v17  ;;  %v3300_v44 = vld [vmem:[#allocation3 + $0xd0] sm:$0xf0]  ;;  %v3251_v17 = vor.u32 %v3993_v37, %v3250_v36 }
 0x18e   :  { %v3303_v49 = vor.u32 %v4003_v42, %v3300_v44  ;;  %v3252_v41 = vld [vmem:[#allocation3 + $0x70] sm:$0xf0]  ;;  %v3258_v42 = vld [vmem:[#allocation3 + $0x68] sm:$0xf]  ;;  %v3203_v36 = vor.u32 %v3981_v9, %v3202_v35  ;;  %v4041_v35 = vld [vmem:[#allocation3 + $0xec] sm:$0xf0] }
 0x18f   :  { %4156 = vtanh.f32 %v965_v47  ;;  %v976_v53 = vmul.f32 0.5, %v966_v48  ;;  %v3306_v47 = vld [vmem:[#allocation3 + $0xc8] sm:$0xf]  ;;  %v4006_v48 = vld [vmem:[#allocation3 + $0xd4] sm:$0xf0]  ;;  %v3255_v44 = vor.u32 %v3991_v11, %v3252_v41 }
 0x190   :  { %v4153_v56 = vpop.eup %4152  ;;  %v3307_v51 = vor.u32 %v4006_v48, %v3306_v47  ;;  %1477 = vmatpush.bf16.msra.mxu1 %v3303_v49  ;;  %v3992_v48 = vld [vmem:[#allocation3 + $0x6c] sm:$0xf]  ;;  %v3260_v49 = vld [vmem:[#allocation3 + $0x78] sm:$0xf0]  ;;  %v3204_v37 = vld [vmem:[#allocation3 + $0x10] sm:$0xf0] }
 0x191   :  { %v4155_v57 = vpop.eup %4154  ;;  %v969_v58 = vadd.f32 1.0, %v4153_v56  ;;  %4158 = vtanh.f32 %v976_v53  ;;  %v4004_v53 = vld [vmem:[#allocation3 + $0xcc] sm:$0xf]  ;;  %v3308_v56 = vld [vmem:[#allocation3 + $0xd8] sm:$0xf0] }
 0x192   :  { %v973_v13 = vadd.f32 1.0, %v4155_v57  ;;  %v3311_v57 = vor.u32 %v4004_v53, %v3308_v56  ;;  %1490 = vmatpush.bf16.msra.mxu2 %v3307_v51  ;;  %v3263_v51 = vor.u32 %v3992_v48, %v3260_v49  ;;  %v3234_v53 = vld [vmem:[#allocation3 + $0x40] sm:$0xf]  ;;  %v3989_v56 = vld [vmem:[#allocation3 + $0x4c] sm:$0xf0] }
 0x193   :  { %v970_v15 = vmul.f32 0.5, %v969_v58  ;;  %v3282_v58 = vld [vmem:[#allocation3 + $0xa0] sm:$0xf]  ;;  %v3210_v11 = vld [vmem:[#allocation3 + $0x8] sm:$0xf] }
 0x194   :  { %v974_v59 = vmul.f32 0.5, %v973_v13  ;;  %v948_v5 = vpop.f32.mrf.mxu2  ;;  %v961_v8 = vpop.f32.mrf.mxu3  ;;  %v4001_v13 = vld [vmem:[#allocation3 + $0xac] sm:$0xf0]  ;;  %1503 = vmatpush.bf16.msra.mxu3 %v3311_v57  ;;  %v3987_v57 = vld [vmem:[#allocation3 + $0x44] sm:$0xf] }
 0x195   :  { %v4157_v6 = vpop.eup %4156  ;;  %v3284_v5 = vld [vmem:[#allocation3 + $0xb0] sm:$0xf0]  ;;  %v3290_v8 = vld [vmem:[#allocation3 + $0xa8] sm:$0xf]  ;;  %v4039_v9 = vld [vmem:[#allocation3 + $0xe4] sm:$0xf] }
 0x196   :  { %v980_v10 = vmul.f32 %v974_v59, %v4431_v40  ;;  %v981_v61 = vmul.f32 %v4157_v6, %v970_v15  ;;  %v3314_v40 = vld [vmem:[#allocation3 + $0xe0] sm:$0xf]  ;;  %v3999_v15 = vld [vmem:[#allocation3 + $0xa4] sm:$0xf]  ;;  %v3283_v59 = vor.u32 %v4001_v13, %v3282_v58  ;;  %v4002_v6 = vld [vmem:[#allocation3 + $0xb4] sm:$0xf0]  ;;  %v3235_v58 = vor.u32 %v3989_v56, %v3234_v53 }
 0x197   :  { %v4159_v19 = vpop.eup %4158  ;;  %v3315_v26 = vor.u32 %v4009_v20, %v3314_v40  ;;  %v3268_v20 = vld [vmem:[#allocation3 + $0x90] sm:$0xf0] }
 0x198   :  { %v4442_v0 = vadd.f32 %v981_v61, %v980_v10  ;;  %v978_v22 = vadd.f32 1.0, %v4159_v19  ;;  %v3287_v10 = vor.u32 %v3999_v15, %v3284_v5  ;;  %v3291_v61 = vor.u32 %v4002_v6, %v3290_v8  ;;  %v4000_v19 = vld [vmem:[#allocation3 + $0xac] sm:$0xf]  ;;  %v3236_v13 = vld [vmem:[#allocation3 + $0x50] sm:$0xf0] }
 0x199   :  { %1463 = vmatpush.bf16.msra.mxu0 %v3315_v26  ;;  %v3998_v26 = vld [vmem:[#allocation3 + $0x94] sm:$0xf0]  ;;  %v3242_v15 = vld [vmem:[#allocation3 + $0x48] sm:$0xf]  ;;  %v3239_v5 = vor.u32 %v3987_v57, %v3236_v13  ;;  %v3988_v6 = vld [vmem:[#allocation3 + $0x4c] sm:$0xf] }
 0x19a   :  { %4160 = vtanh.f32 %v4442_v0  ;;  %v979_v1 = vmul.f32 0.5, %v978_v22  ;;  %v3292_v22 = vld [vmem:[#allocation3 + $0xb8] sm:$0xf0]  ;;  %1478 = vmatpush.bf16.msra.mxu1 %v3287_v10  ;;  %1491 = vmatpush.bf16.msra.mxu2 %v3291_v61  ;;  %v3275_v34 = vor.u32 %v3998_v26, %v3274_v21  ;;  %v3984_v26 = vld [vmem:[#allocation3 + $0x2c] sm:$0xf] }
 0x19b   :  { %v3244_v10 = vld [vmem:[#allocation3 + $0x58] sm:$0xf0] }
 0x19c   :  { %v3247_v61 = vor.u32 %v3988_v6, %v3244_v10 }
 0x19d   :  { %1464 = vmatpush.bf16.msra.mxu0 %v3299_v43  ;;  %v3994_v43 = vld [vmem:[#allocation3 + $0x74] sm:$0xf0] }
 0x19e   :  { %1492 = vmatpush.bf16.msra.mxu2 %v3275_v34  ;;  %v3259_v47 = vor.u32 %v3994_v43, %v3258_v42  ;;  %v3980_v43 = vld [vmem:[#allocation3 + $0xc] sm:$0xf] }
 0x1a0   :  { %v4161_v2 = vpop.eup %4160 }
 0x1a1   :  { %v984_v7 = vmul.f32 %v4161_v2, %v979_v1  ;;  %1465 = vmatpush.bf16.msra.mxu0 %v3283_v59  ;;  %v3295_v1 = vor.u32 %v4000_v19, %v3292_v22  ;;  %v3266_v2 = vld [vmem:[#allocation3 + $0x80] sm:$0xf]  ;;  %v3990_v59 = vld [vmem:[#allocation3 + $0x54] sm:$0xf0]  ;;  %v3985_v22 = vld [vmem:[#allocation3 + $0x2c] sm:$0xf0] }
 0x1a2   :  { %1493 = vmatpush.bf16.msra.mxu2 %v3259_v47  ;;  %v3243_v8 = vor.u32 %v3990_v59, %v3242_v15  ;;  %v3218_v19 = vld [vmem:[#allocation3 + $0x20] sm:$0xf] }
 0x1a3   :  { %v985_v14 = vpack.c.bf16 %v984_v7, %v984_v7  ;;  %v3997_v7 = vld [vmem:[#allocation3 + $0x8c] sm:$0xf0]  ;;  %1504 = vmatpush.bf16.msra.mxu3 %v3295_v1  ;;  %v3983_v1 = vld [vmem:[#allocation3 + $0x24] sm:$0xf] }
 0x1a4   :  { %v3267_v40 = vor.u32 %v3997_v7, %v3266_v2  ;;  %v3219_v2 = vor.u32 %v3985_v22, %v3218_v19  ;;  %v3220_v7 = vld [vmem:[#allocation3 + $0x30] sm:$0xf0] }
 0x1a5   :  { %3070 = vst [vmem:[%s4510_s4 + $0x4] sm:$0xf] %v985_v14  ;;  %1195 = vmatmul.bf16.vlgmr.msrb.gmra.mxu0 %v985_v14  ;;  %1208 = vmatmul.bf16.vlgmr.msrb.gmra.mxu1 %v985_v14 }
 0x1a6   :  { %1221 = vmatmul.bf16.vlgmr.msrb.gmra.mxu2 %v985_v14  ;;  %1234 = vmatmul.bf16.vlgmr.msrb.gmra.mxu3 %v985_v14  ;;  %v3995_v14 = vld [vmem:[#allocation3 + $0x84] sm:$0xf] }
 0x1a7   :  { %v3271_v32 = vor.u32 %v3995_v14, %v3268_v20  ;;  %1466 = vmatpush.bf16.msra.mxu0 %v3267_v40  ;;  %1505 = vmatpush.bf16.msra.mxu3 %v3279_v16  ;;  %v3226_v14 = vld [vmem:[#allocation3 + $0x28] sm:$0xf]  ;;  %v3986_v40 = vld [vmem:[#allocation3 + $0x34] sm:$0xf0]  ;;  %v3223_v20 = vor.u32 %v3983_v1, %v3220_v7  ;;  %v3979_v16 = vld [vmem:[#allocation3 + $0x4] sm:$0xf] }
 0x1a8   :  { %1494 = vmatpush.bf16.msra.mxu2 %v3243_v8  ;;  %v3227_v21 = vor.u32 %v3986_v40, %v3226_v14  ;;  %v3207_v41 = vor.u32 %v3979_v16, %v3204_v37  ;;  %v3451_v37 = vld [vmem:[#allocation3 + $0xe8] sm:$0xf] }
 0x1a9   :  { %1479 = vmatpush.bf16.msra.mxu1 %v3271_v32  ;;  %v3228_v32 = vld [vmem:[#allocation3 + $0x38] sm:$0xf0] }
 0x1aa   :  { %v3231_v34 = vor.u32 %v3984_v26, %v3228_v32 }
 0x1ab   :  { %1467 = vmatpush.bf16.msra.mxu0 %v3251_v17  ;;  %1506 = vmatpush.bf16.msra.mxu3 %v3263_v51  ;;  %v3982_v17 = vld [vmem:[#allocation3 + $0x14] sm:$0xf0] }
 0x1ac   :  { %1495 = vmatpush.bf16.msra.mxu2 %v3227_v21  ;;  %v3211_v42 = vor.u32 %v3982_v17, %v3210_v11  ;;  %v4042_v11 = vld [vmem:[#allocation3 + $0xf4] sm:$0xf0] }
 0x1ad   :  { %1480 = vmatpush.bf16.msra.mxu1 %v3255_v44  ;;  %v3212_v44 = vld [vmem:[#allocation3 + $0x18] sm:$0xf0] }
 0x1ae   :  { %v3215_v47 = vor.u32 %v3980_v43, %v3212_v44  ;;  %v3453_v43 = vld [vmem:[#allocation3 + $0xf8] sm:$0xf0] }
 0x1af   :  { %1468 = vmatpush.bf16.msra.mxu0 %v3235_v58  ;;  %1507 = vmatpush.bf16.msra.mxu3 %v3247_v61 }
 0x1b0   :  { %1496 = vmatpush.bf16.msra.mxu2 %v3211_v42  ;;  %v4040_v42 = vld [vmem:[#allocation3 + $0xec] sm:$0xf] }
 0x1b1   :  { %1481 = vmatpush.bf16.msra.mxu1 %v3239_v5  ;;  %v3456_v44 = vor.u32 %v4040_v42, %v3453_v43  ;;  %v3381_v42 = vld [vmem:[#allocation3 + $0x70] sm:$0xf0]  ;;  %v3387_v43 = vld [vmem:[#allocation3 + $0x68] sm:$0xf] }
 0x1b3   :  { %1469 = vmatpush.bf16.msra.mxu0 %v3219_v2  ;;  %1508 = vmatpush.bf16.msra.mxu3 %v3231_v34 }
 0x1b5   :  { %1482 = vmatpush.bf16.msra.mxu1 %v3223_v20 }
 0x1b7   :  { %1470 = vmatpush.bf16.msra.mxu0 %v3203_v36  ;;  %1509 = vmatpush.bf16.msra.mxu3 %v3215_v47  ;;  %v3445_v36 = vld [vmem:[#allocation3 + $0xf0] sm:$0xf0]  ;;  %v3427_v47 = vld [vmem:[#allocation3 + $0xc0] sm:$0xf] }
 0x1b8   :  { %v3448_v17 = vor.u32 %v4039_v9, %v3445_v36  ;;  %v4028_v9 = vld [vmem:[#allocation3 + $0x8c] sm:$0xf] }
 0x1b9   :  { %1483 = vmatpush.bf16.msra.mxu1 %v3207_v41  ;;  %v3452_v41 = vor.u32 %v4042_v11, %v3451_v37  ;;  %v3379_v37 = vld [vmem:[#allocation3 + $0x60] sm:$0xf]  ;;  %v4025_v11 = vld [vmem:[#allocation3 + $0x6c] sm:$0xf0] }
 0x1bb   :  { %1765 = vmatpush.bf16.msrb.mxu2 %v3452_v41  ;;  %1778 = vmatpush.bf16.msrb.mxu3 %v3456_v44  ;;  %v3380_v41 = vor.u32 %v4025_v11, %v3379_v37  ;;  %v4026_v44 = vld [vmem:[#allocation3 + $0x74] sm:$0xf0] }
 0x1bd   :  { %1752 = vmatpush.bf16.msrb.mxu1 %v3448_v17  ;;  %v4023_v17 = vld [vmem:[#allocation3 + $0x64] sm:$0xf] }
 0x222   :  { %v1196_v48 = vpop.f32.mrf.mxu0  ;;  %v1209_v49 = vpop.f32.mrf.mxu1 }
 0x223   :  { %v1239_v51 = vadd.f32 %v1196_v48, %v4352_v23  ;;  %v1240_v53 = vadd.f32 %v1209_v49, %v4355_v25  ;;  %v4037_v48 = vld [vmem:[#allocation3 + $0xcc] sm:$0xf0]  ;;  %v4035_v49 = vld [vmem:[#allocation3 + $0xc4] sm:$0xf] }
 0x225   :  { %v1243_v56 = vmul.f32 0.5, %v1239_v51  ;;  %v1247_v57 = vmul.f32 0.5, %v1240_v53  ;;  %v3428_v51 = vor.u32 %v4037_v48, %v3427_v47  ;;  %v3429_v53 = vld [vmem:[#allocation3 + $0xd0] sm:$0xf0]  ;;  %v3384_v47 = vor.u32 %v4023_v17, %v3381_v42  ;;  %v4012_v17 = vld [vmem:[#allocation3 + $0xc] sm:$0xf] }
 0x226   :  { %v3388_v48 = vor.u32 %v4026_v44, %v3387_v43 }
 0x227   :  { %4162 = vtanh.f32 %v1243_v56  ;;  %v3435_v56 = vld [vmem:[#allocation3 + $0xc8] sm:$0xf] }
 0x228   :  { %4164 = vtanh.f32 %v1247_v57  ;;  %v4038_v57 = vld [vmem:[#allocation3 + $0xd4] sm:$0xf0] }
 0x229   :  { %v1222_v58 = vpop.f32.mrf.mxu2  ;;  %v1235_v13 = vpop.f32.mrf.mxu3 }
 0x22a   :  { %v1241_v15 = vadd.f32 %v1222_v58, %v4358_v27  ;;  %v1242_v59 = vadd.f32 %v1235_v13, %v4361_v30  ;;  %v1198_v5 = vpop.f32.mrf.mxu0  ;;  %v1211_v8 = vpop.f32.mrf.mxu1  ;;  %v3432_v58 = vor.u32 %v4035_v49, %v3429_v53  ;;  %v3436_v13 = vor.u32 %v4038_v57, %v3435_v56  ;;  %v4024_v49 = vld [vmem:[#allocation3 + $0x6c] sm:$0xf]  ;;  %v3363_v56 = vld [vmem:[#allocation3 + $0x40] sm:$0xf]  ;;  %v4021_v57 = vld [vmem:[#allocation3 + $0x4c] sm:$0xf0] }
 0x22b   :  { %v3411_v8 = vld [vmem:[#allocation3 + $0xa0] sm:$0xf] }
 0x22c   :  { %4166 = vtanh.f32 %v1241_v15  ;;  %v1252_v6 = vmul.f32 0.5, %v1242_v59  ;;  %v4036_v15 = vld [vmem:[#allocation3 + $0xcc] sm:$0xf]  ;;  %v3437_v59 = vld [vmem:[#allocation3 + $0xd8] sm:$0xf0]  ;;  %1753 = vmatpush.bf16.msrb.mxu1 %v3432_v58  ;;  %1766 = vmatpush.bf16.msrb.mxu2 %v3436_v13  ;;  %v3364_v13 = vor.u32 %v4021_v57, %v3363_v56 }
 0x22d   :  { %v4163_v10 = vpop.eup %4162  ;;  %v3440_v5 = vor.u32 %v4036_v15, %v3437_v59  ;;  %v4019_v58 = vld [vmem:[#allocation3 + $0x44] sm:$0xf]  ;;  %v3365_v15 = vld [vmem:[#allocation3 + $0x50] sm:$0xf0]  ;;  %v3371_v59 = vld [vmem:[#allocation3 + $0x48] sm:$0xf] }
 0x22e   :  { %v4165_v61 = vpop.eup %4164  ;;  %v1245_v19 = vadd.f32 1.0, %v4163_v10  ;;  %4168 = vtanh.f32 %v1252_v6  ;;  %v4033_v6 = vld [vmem:[#allocation3 + $0xac] sm:$0xf0]  ;;  %v4031_v10 = vld [vmem:[#allocation3 + $0xa4] sm:$0xf] }
 0x22f   :  { %v1249_v23 = vadd.f32 1.0, %v4165_v61  ;;  %1779 = vmatpush.bf16.msrb.mxu3 %v3440_v5  ;;  %v3412_v61 = vor.u32 %v4033_v6, %v3411_v8  ;;  %v4022_v5 = vld [vmem:[#allocation3 + $0x54] sm:$0xf0]  ;;  %v3368_v8 = vor.u32 %v4019_v58, %v3365_v15 }
 0x230   :  { %v1246_v25 = vmul.f32 0.5, %v1245_v19  ;;  %v3413_v19 = vld [vmem:[#allocation3 + $0xb0] sm:$0xf0]  ;;  %v3372_v6 = vor.u32 %v4022_v5, %v3371_v59 }
 0x231   :  { %v1250_v22 = vmul.f32 0.5, %v1249_v23  ;;  %v1224_v1 = vpop.f32.mrf.mxu2  ;;  %v1237_v2 = vpop.f32.mrf.mxu3  ;;  %v3419_v23 = vld [vmem:[#allocation3 + $0xa8] sm:$0xf] }
 0x232   :  { %v4167_v7 = vpop.eup %4166  ;;  %v4032_v2 = vld [vmem:[#allocation3 + $0xac] sm:$0xf] }
 0x233   :  { %v1256_v14 = vmul.f32 %v1250_v22, %v4442_v0  ;;  %v1257_v40 = vmul.f32 %v4167_v7, %v1246_v25  ;;  %v3443_v0 = vld [vmem:[#allocation3 + $0xe0] sm:$0xf]  ;;  %v4034_v25 = vld [vmem:[#allocation3 + $0xb4] sm:$0xf0]  ;;  %v3416_v22 = vor.u32 %v4031_v10, %v3413_v19  ;;  %v3421_v7 = vld [vmem:[#allocation3 + $0xb8] sm:$0xf0] }
 0x234   :  { %v4169_v27 = vpop.eup %4168  ;;  %v3444_v16 = vor.u32 %v4041_v35, %v3443_v0  ;;  %v3420_v1 = vor.u32 %v4034_v25, %v3419_v23  ;;  %v4020_v10 = vld [vmem:[#allocation3 + $0x4c] sm:$0xf]  ;;  %v3347_v23 = vld [vmem:[#allocation3 + $0x20] sm:$0xf]  ;;  %v4017_v25 = vld [vmem:[#allocation3 + $0x2c] sm:$0xf0] }
 0x235   :  { %v4453_v20 = vadd.f32 %v1257_v40, %v1256_v14  ;;  %v1254_v30 = vadd.f32 1.0, %v4169_v27  ;;  %v3424_v14 = vor.u32 %v4032_v2, %v3421_v7  ;;  %1754 = vmatpush.bf16.msrb.mxu1 %v3416_v22  ;;  %v3395_v40 = vld [vmem:[#allocation3 + $0x80] sm:$0xf]  ;;  %v4029_v27 = vld [vmem:[#allocation3 + $0x8c] sm:$0xf0] }
 0x236   :  { %1739 = vmatpush.bf16.msrb.mxu0 %v3444_v16  ;;  %1767 = vmatpush.bf16.msrb.mxu2 %v3420_v1  ;;  %v3405_v16 = vld [vmem:[#allocation3 + $0x98] sm:$0xf0]  ;;  %v4015_v22 = vld [vmem:[#allocation3 + $0x24] sm:$0xf]  ;;  %v3348_v1 = vor.u32 %v4017_v25, %v3347_v23  ;;  %v3349_v2 = vld [vmem:[#allocation3 + $0x30] sm:$0xf0] }
 0x237   :  { %4170 = vtanh.f32 %v4453_v20  ;;  %v1255_v21 = vmul.f32 0.5, %v1254_v30  ;;  %v4027_v30 = vld [vmem:[#allocation3 + $0x84] sm:$0xf]  ;;  %1780 = vmatpush.bf16.msrb.mxu3 %v3424_v14  ;;  %v3408_v36 = vor.u32 %v4028_v9, %v3405_v16  ;;  %v3355_v7 = vld [vmem:[#allocation3 + $0x28] sm:$0xf] }
 0x238   :  { %v4018_v14 = vld [vmem:[#allocation3 + $0x34] sm:$0xf0]  ;;  %v3333_v9 = vld [vmem:[#allocation3 + $0x10] sm:$0xf0]  ;;  %v3339_v16 = vld [vmem:[#allocation3 + $0x8] sm:$0xf] }
 0x23a   :  { %1740 = vmatpush.bf16.msrb.mxu0 %v3428_v51  ;;  %v3389_v51 = vld [vmem:[#allocation3 + $0x78] sm:$0xf0] }
 0x23b   :  { %1781 = vmatpush.bf16.msrb.mxu3 %v3408_v36  ;;  %v3392_v53 = vor.u32 %v4024_v49, %v3389_v51  ;;  %v4014_v36 = vld [vmem:[#allocation3 + $0x14] sm:$0xf0] }
 0x23c   :  { %v3340_v11 = vor.u32 %v4014_v36, %v3339_v16  ;;  %v3582_v16 = vld [vmem:[#allocation3 + $0xf8] sm:$0xf0] }
 0x23d   :  { %v4171_v26 = vpop.eup %4170 }
 0x23e   :  { %v1260_v32 = vmul.f32 %v4171_v26, %v1255_v21  ;;  %1741 = vmatpush.bf16.msrb.mxu0 %v3412_v61  ;;  %v3396_v21 = vor.u32 %v4029_v27, %v3395_v40  ;;  %v3397_v26 = vld [vmem:[#allocation3 + $0x90] sm:$0xf0]  ;;  %v3373_v61 = vld [vmem:[#allocation3 + $0x58] sm:$0xf0]  ;;  %v3352_v40 = vor.u32 %v4015_v22, %v3349_v2  ;;  %v3356_v27 = vor.u32 %v4018_v14, %v3355_v7 }
 0x23f   :  { %v3400_v0 = vor.u32 %v4027_v30, %v3397_v26  ;;  %1782 = vmatpush.bf16.msrb.mxu3 %v3392_v53  ;;  %v3376_v19 = vor.u32 %v4020_v10, %v3373_v61  ;;  %v4016_v30 = vld [vmem:[#allocation3 + $0x2c] sm:$0xf] }
 0x240   :  { %v1261_v34 = vpack.c.bf16 %v1260_v32, %v1260_v32  ;;  %v3403_v32 = vld [vmem:[#allocation3 + $0x88] sm:$0xf] }
 0x241   :  { %1755 = vmatpush.bf16.msrb.mxu1 %v3400_v0  ;;  %v4011_v0 = vld [vmem:[#allocation3 + $0x4] sm:$0xf] }
 0x242   :  { %3199 = vst [vmem:[%s4510_s4 + $0x8] sm:$0xf] %v1261_v34  ;;  %1471 = vmatmul.bf16.vlgmr.msra.gmra.mxu0 %v1261_v34  ;;  %1484 = vmatmul.bf16.vlgmr.msra.gmra.mxu1 %v1261_v34  ;;  %v3336_v37 = vor.u32 %v4011_v0, %v3333_v9  ;;  %v4072_v9 = vld [vmem:[#allocation3 + $0xec] sm:$0xf] }
 0x243   :  { %1497 = vmatmul.bf16.vlgmr.msra.gmra.mxu2 %v1261_v34  ;;  %1510 = vmatmul.bf16.vlgmr.msra.gmra.mxu3 %v1261_v34  ;;  %v4030_v34 = vld [vmem:[#allocation3 + $0x94] sm:$0xf0]  ;;  %v3585_v36 = vor.u32 %v4072_v9, %v3582_v16  ;;  %v4056_v16 = vld [vmem:[#allocation3 + $0x6c] sm:$0xf] }
 0x244   :  { %v3404_v35 = vor.u32 %v4030_v34, %v3403_v32  ;;  %1742 = vmatpush.bf16.msrb.mxu0 %v3396_v21  ;;  %1783 = vmatpush.bf16.msrb.mxu3 %v3376_v19  ;;  %v3357_v21 = vld [vmem:[#allocation3 + $0x38] sm:$0xf0]  ;;  %v3331_v32 = vld [vmem:[#allocation3] sm:$0xf]  ;;  %v4013_v34 = vld [vmem:[#allocation3 + $0xc] sm:$0xf0] }
 0x245   :  { %1756 = vmatpush.bf16.msrb.mxu1 %v3384_v47  ;;  %v3360_v26 = vor.u32 %v4016_v30, %v3357_v21  ;;  %v4071_v30 = vld [vmem:[#allocation3 + $0xe4] sm:$0xf] }
 0x246   :  { %1768 = vmatpush.bf16.msrb.mxu2 %v3404_v35  ;;  %v3332_v35 = vor.u32 %v4013_v34, %v3331_v32  ;;  %v3580_v32 = vld [vmem:[#allocation3 + $0xe8] sm:$0xf]  ;;  %v4074_v34 = vld [vmem:[#allocation3 + $0xf4] sm:$0xf0] }
 0x248   :  { %1743 = vmatpush.bf16.msrb.mxu0 %v3380_v41  ;;  %1784 = vmatpush.bf16.msrb.mxu3 %v3360_v26  ;;  %v3341_v41 = vld [vmem:[#allocation3 + $0x18] sm:$0xf0]  ;;  %v3574_v26 = vld [vmem:[#allocation3 + $0xf0] sm:$0xf0] }
 0x249   :  { %1757 = vmatpush.bf16.msrb.mxu1 %v3368_v8  ;;  %v3344_v42 = vor.u32 %v4012_v17, %v3341_v41  ;;  %v3577_v0 = vor.u32 %v4071_v30, %v3574_v26  ;;  %v4067_v17 = vld [vmem:[#allocation3 + $0xc4] sm:$0xf]  ;;  %v4057_v30 = vld [vmem:[#allocation3 + $0x6c] sm:$0xf0] }
 0x24a   :  { %1769 = vmatpush.bf16.msrb.mxu2 %v3388_v48 }
 0x24c   :  { %1744 = vmatpush.bf16.msrb.mxu0 %v3364_v13  ;;  %1785 = vmatpush.bf16.msrb.mxu3 %v3344_v42  ;;  %v3558_v42 = vld [vmem:[#allocation3 + $0xd0] sm:$0xf0] }
 0x24d   :  { %1758 = vmatpush.bf16.msrb.mxu1 %v3352_v40 }
 0x24e   :  { %1770 = vmatpush.bf16.msrb.mxu2 %v3372_v6 }
 0x250   :  { %1745 = vmatpush.bf16.msrb.mxu0 %v3348_v1  ;;  %2054 = vmatpush.bf16.msra.mxu3 %v3585_v36  ;;  %v3518_v36 = vld [vmem:[#allocation3 + $0x78] sm:$0xf0] }
 0x251   :  { %1759 = vmatpush.bf16.msrb.mxu1 %v3336_v37  ;;  %v3556_v37 = vld [vmem:[#allocation3 + $0xc0] sm:$0xf] }
 0x252   :  { %1771 = vmatpush.bf16.msrb.mxu2 %v3356_v27  ;;  %v4073_v27 = vld [vmem:[#allocation3 + $0xec] sm:$0xf0] }
 0x254   :  { %1746 = vmatpush.bf16.msrb.mxu0 %v3332_v35  ;;  %v3581_v35 = vor.u32 %v4074_v34, %v3580_v32  ;;  %v3510_v32 = vld [vmem:[#allocation3 + $0x70] sm:$0xf0]  ;;  %v3516_v34 = vld [vmem:[#allocation3 + $0x68] sm:$0xf] }
 0x255   :  { %2028 = vmatpush.bf16.msra.mxu1 %v3577_v0  ;;  %v4058_v0 = vld [vmem:[#allocation3 + $0x74] sm:$0xf0] }
 0x256   :  { %1772 = vmatpush.bf16.msrb.mxu2 %v3340_v11  ;;  %v4069_v11 = vld [vmem:[#allocation3 + $0xcc] sm:$0xf0]  ;;  %v3517_v9 = vor.u32 %v4058_v0, %v3516_v34 }
 0x257   :  { %v3557_v41 = vor.u32 %v4069_v11, %v3556_v37  ;;  %v3521_v37 = vor.u32 %v4056_v16, %v3518_v36  ;;  %v3492_v11 = vld [vmem:[#allocation3 + $0x40] sm:$0xf] }
 0x25a   :  { %2041 = vmatpush.bf16.msra.mxu2 %v3581_v35 }
 0x2bf   :  { %v1472_v43 = vpop.f32.mrf.mxu0  ;;  %v1485_v44 = vpop.f32.mrf.mxu1 }
 0x2c0   :  { %v1515_v47 = vadd.f32 %v1472_v43, %v4364_v31  ;;  %v1516_v48 = vadd.f32 %v1485_v44, %v4367_v33  ;;  %v3564_v43 = vld [vmem:[#allocation3 + $0xc8] sm:$0xf]  ;;  %v4070_v44 = vld [vmem:[#allocation3 + $0xd4] sm:$0xf0] }
 0x2c2   :  { %v1519_v49 = vmul.f32 0.5, %v1515_v47  ;;  %v1523_v51 = vmul.f32 0.5, %v1516_v48  ;;  %v3561_v47 = vor.u32 %v4067_v17, %v3558_v42  ;;  %v3565_v48 = vor.u32 %v4070_v44, %v3564_v43  ;;  %v4053_v17 = vld [vmem:[#allocation3 + $0x4c] sm:$0xf0]  ;;  %v3494_v43 = vld [vmem:[#allocation3 + $0x50] sm:$0xf0] }
 0x2c3   :  { %v3493_v42 = vor.u32 %v4053_v17, %v3492_v11  ;;  %v3500_v44 = vld [vmem:[#allocation3 + $0x48] sm:$0xf] }
 0x2c4   :  { %4172 = vtanh.f32 %v1519_v49  ;;  %v4068_v49 = vld [vmem:[#allocation3 + $0xcc] sm:$0xf]  ;;  %2029 = vmatpush.bf16.msra.mxu1 %v3561_v47  ;;  %2042 = vmatpush.bf16.msra.mxu2 %v3565_v48  ;;  %v4054_v47 = vld [vmem:[#allocation3 + $0x54] sm:$0xf0] }
 0x2c5   :  { %4174 = vtanh.f32 %v1523_v51  ;;  %v3566_v51 = vld [vmem:[#allocation3 + $0xd8] sm:$0xf0] }
 0x2c6   :  { %v1498_v53 = vpop.f32.mrf.mxu2  ;;  %v1511_v56 = vpop.f32.mrf.mxu3 }
 0x2c7   :  { %v1517_v57 = vadd.f32 %v1498_v53, %v4370_v38  ;;  %v1518_v58 = vadd.f32 %v1511_v56, %v4373_v45  ;;  %v1474_v13 = vpop.f32.mrf.mxu0  ;;  %v1487_v15 = vpop.f32.mrf.mxu1  ;;  %v3569_v53 = vor.u32 %v4068_v49, %v3566_v51  ;;  %v3540_v56 = vld [vmem:[#allocation3 + $0xa0] sm:$0xf]  ;;  %v3501_v49 = vor.u32 %v4054_v47, %v3500_v44  ;;  %v4052_v51 = vld [vmem:[#allocation3 + $0x4c] sm:$0xf] }
 0x2c8   :  { %v3542_v15 = vld [vmem:[#allocation3 + $0xb0] sm:$0xf0] }
 0x2c9   :  { %4176 = vtanh.f32 %v1517_v57  ;;  %v1528_v59 = vmul.f32 0.5, %v1518_v58  ;;  %v4065_v57 = vld [vmem:[#allocation3 + $0xac] sm:$0xf0]  ;;  %v4063_v58 = vld [vmem:[#allocation3 + $0xa4] sm:$0xf]  ;;  %2055 = vmatpush.bf16.msra.mxu3 %v3569_v53 }
 0x2ca   :  { %v4173_v5 = vpop.eup %4172  ;;  %v3541_v13 = vor.u32 %v4065_v57, %v3540_v56  ;;  %v3502_v53 = vld [vmem:[#allocation3 + $0x58] sm:$0xf0]  ;;  %v3476_v57 = vld [vmem:[#allocation3 + $0x20] sm:$0xf] }
 0x2cb   :  { %v4175_v8 = vpop.eup %4174  ;;  %v1521_v6 = vadd.f32 1.0, %v4173_v5  ;;  %4178 = vtanh.f32 %v1528_v59  ;;  %v3548_v59 = vld [vmem:[#allocation3 + $0xa8] sm:$0xf]  ;;  %v4066_v5 = vld [vmem:[#allocation3 + $0xb4] sm:$0xf0]  ;;  %v3505_v56 = vor.u32 %v4052_v51, %v3502_v53 }
 0x2cc   :  { %v1525_v31 = vadd.f32 1.0, %v4175_v8  ;;  %v3545_v8 = vor.u32 %v4063_v58, %v3542_v15  ;;  %v4049_v58 = vld [vmem:[#allocation3 + $0x2c] sm:$0xf0] }
 0x2cd   :  { %v1522_v33 = vmul.f32 0.5, %v1521_v6  ;;  %v3549_v6 = vor.u32 %v4066_v5, %v3548_v59  ;;  %v3477_v15 = vor.u32 %v4049_v58, %v3476_v57  ;;  %v3478_v59 = vld [vmem:[#allocation3 + $0x30] sm:$0xf0]  ;;  %v3484_v5 = vld [vmem:[#allocation3 + $0x28] sm:$0xf] }
 0x2ce   :  { %v1526_v10 = vmul.f32 0.5, %v1525_v31  ;;  %v1500_v61 = vpop.f32.mrf.mxu2  ;;  %v1513_v19 = vpop.f32.mrf.mxu3  ;;  %v4064_v31 = vld [vmem:[#allocation3 + $0xac] sm:$0xf]  ;;  %2030 = vmatpush.bf16.msra.mxu1 %v3545_v8  ;;  %v4050_v8 = vld [vmem:[#allocation3 + $0x34] sm:$0xf0] }
 0x2cf   :  { %v4177_v23 = vpop.eup %4176  ;;  %2043 = vmatpush.bf16.msra.mxu2 %v3549_v6  ;;  %v3524_v61 = vld [vmem:[#allocation3 + $0x80] sm:$0xf]  ;;  %v4061_v19 = vld [vmem:[#allocation3 + $0x8c] sm:$0xf0] }
 0x2d0   :  { %v1532_v25 = vmul.f32 %v1526_v10, %v4453_v20  ;;  %v1533_v22 = vmul.f32 %v4177_v23, %v1522_v33  ;;  %v3572_v20 = vld [vmem:[#allocation3 + $0xe0] sm:$0xf]  ;;  %v3550_v33 = vld [vmem:[#allocation3 + $0xb8] sm:$0xf0]  ;;  %v4059_v23 = vld [vmem:[#allocation3 + $0x84] sm:$0xf] }
 0x2d1   :  { %v4179_v38 = vpop.eup %4178  ;;  %v3573_v21 = vor.u32 %v4073_v27, %v3572_v20  ;;  %v3553_v10 = vor.u32 %v4064_v31, %v3550_v33  ;;  %v3508_v27 = vld [vmem:[#allocation3 + $0x60] sm:$0xf]  ;;  %v3485_v31 = vor.u32 %v4050_v8, %v3484_v5  ;;  %v4048_v33 = vld [vmem:[#allocation3 + $0x2c] sm:$0xf]  ;;  %v4103_v5 = vld [vmem:[#allocation3 + $0xe4] sm:$0xf] }
 0x2d2   :  { %v4464_v1 = vadd.f32 %v1533_v22, %v1532_v25  ;;  %v1530_v45 = vadd.f32 1.0, %v4179_v38  ;;  %v3525_v25 = vor.u32 %v4061_v19, %v3524_v61  ;;  %v3526_v22 = vld [vmem:[#allocation3 + $0x90] sm:$0xf0]  ;;  %v3532_v38 = vld [vmem:[#allocation3 + $0x88] sm:$0xf]  ;;  %v3509_v26 = vor.u32 %v4057_v30, %v3508_v27 }
 0x2d3   :  { %2015 = vmatpush.bf16.msra.mxu0 %v3573_v21  ;;  %2056 = vmatpush.bf16.msra.mxu3 %v3553_v10  ;;  %v4055_v21 = vld [vmem:[#allocation3 + $0x64] sm:$0xf]  ;;  %v3486_v10 = vld [vmem:[#allocation3 + $0x38] sm:$0xf0]  ;;  %v3460_v19 = vld [vmem:[#allocation3] sm:$0xf] }
 0x2d4   :  { %4180 = vtanh.f32 %v4464_v1  ;;  %v1531_v2 = vmul.f32 0.5, %v1530_v45  ;;  %v4062_v45 = vld [vmem:[#allocation3 + $0x94] sm:$0xf0]  ;;  %v3513_v35 = vor.u32 %v4055_v21, %v3510_v32  ;;  %v3489_v61 = vor.u32 %v4048_v33, %v3486_v10 }
 0x2d5   :  { %v4106_v33 = vld [vmem:[#allocation3 + $0xf4] sm:$0xf0] }
 0x2d7   :  { %2016 = vmatpush.bf16.msra.mxu0 %v3557_v41  ;;  %v4051_v41 = vld [vmem:[#allocation3 + $0x44] sm:$0xf] }
 0x2d8   :  { %v3497_v48 = vor.u32 %v4051_v41, %v3494_v43 }
 0x2da   :  { %v4181_v7 = vpop.eup %4180 }
 0x2db   :  { %v1536_v14 = vmul.f32 %v4181_v7, %v1531_v2  ;;  %2017 = vmatpush.bf16.msra.mxu0 %v3541_v13  ;;  %v3529_v2 = vor.u32 %v4059_v23, %v3526_v22  ;;  %v3533_v7 = vor.u32 %v4062_v45, %v3532_v38  ;;  %v4047_v13 = vld [vmem:[#allocation3 + $0x24] sm:$0xf]  ;;  %v4045_v23 = vld [vmem:[#allocation3 + $0xc] sm:$0xf0]  ;;  %v3462_v38 = vld [vmem:[#allocation3 + $0x10] sm:$0xf0] }
 0x2dc   :  { %v3481_v6 = vor.u32 %v4047_v13, %v3478_v59  ;;  %v3461_v22 = vor.u32 %v4045_v23, %v3460_v19  ;;  %v3468_v45 = vld [vmem:[#allocation3 + $0x8] sm:$0xf]  ;;  %v4105_v59 = vld [vmem:[#allocation3 + $0xec] sm:$0xf0]  ;;  %v4104_v19 = vld [vmem:[#allocation3 + $0xec] sm:$0xf] }
 0x2dd   :  { %v1537_v40 = vpack.c.bf16 %v1536_v14, %v1536_v14  ;;  %v4060_v14 = vld [vmem:[#allocation3 + $0x8c] sm:$0xf]  ;;  %2031 = vmatpush.bf16.msra.mxu1 %v3529_v2  ;;  %2044 = vmatpush.bf16.msra.mxu2 %v3533_v7  ;;  %v4046_v2 = vld [vmem:[#allocation3 + $0x14] sm:$0xf0]  ;;  %v3711_v23 = vld [vmem:[#allocation3 + $0xf8] sm:$0xf0] }
 0x2df   :  { %3328 = vst [vmem:[%s4510_s4 + $0xc] sm:$0xf] %v1537_v40  ;;  %1747 = vmatmul.bf16.vlgmr.msrb.gmra.mxu0 %v1537_v40  ;;  %1760 = vmatmul.bf16.vlgmr.msrb.gmra.mxu1 %v1537_v40 }
 0x2e0   :  { %1773 = vmatmul.bf16.vlgmr.msrb.gmra.mxu2 %v1537_v40  ;;  %1786 = vmatmul.bf16.vlgmr.msrb.gmra.mxu3 %v1537_v40  ;;  %v3534_v40 = vld [vmem:[#allocation3 + $0x98] sm:$0xf0] }
 0x2e1   :  { %2018 = vmatpush.bf16.msra.mxu0 %v3525_v25  ;;  %v3537_v20 = vor.u32 %v4060_v14, %v3534_v40  ;;  %2032 = vmatpush.bf16.msra.mxu1 %v3513_v35  ;;  %v4043_v25 = vld [vmem:[#allocation3 + $0x4] sm:$0xf]  ;;  %v3469_v14 = vor.u32 %v4046_v2, %v3468_v45  ;;  %v4044_v40 = vld [vmem:[#allocation3 + $0xc] sm:$0xf] }
 0x2e2   :  { %2045 = vmatpush.bf16.msra.mxu2 %v3517_v9  ;;  %v3465_v7 = vor.u32 %v4043_v25, %v3462_v38  ;;  %v3714_v25 = vor.u32 %v4104_v19, %v3711_v23  ;;  %v4101_v38 = vld [vmem:[#allocation3 + $0xcc] sm:$0xf0]  ;;  %v4099_v45 = vld [vmem:[#allocation3 + $0xc4] sm:$0xf]  ;;  %v3621_v19 = vld [vmem:[#allocation3 + $0x40] sm:$0xf] }
 0x2e3   :  { %2057 = vmatpush.bf16.msra.mxu3 %v3537_v20  ;;  %v3470_v20 = vld [vmem:[#allocation3 + $0x18] sm:$0xf0]  ;;  %v4085_v23 = vld [vmem:[#allocation3 + $0x4c] sm:$0xf0] }
 0x2e4   :  { %v3473_v27 = vor.u32 %v4044_v40, %v3470_v20  ;;  %v4102_v40 = vld [vmem:[#allocation3 + $0xd4] sm:$0xf0] }
 0x2e5   :  { %2019 = vmatpush.bf16.msra.mxu0 %v3509_v26  ;;  %2033 = vmatpush.bf16.msra.mxu1 %v3497_v48 }
 0x2e6   :  { %2046 = vmatpush.bf16.msra.mxu2 %v3501_v49 }
 0x2e7   :  { %2058 = vmatpush.bf16.msra.mxu3 %v3521_v37 }
 0x2e9   :  { %2020 = vmatpush.bf16.msra.mxu0 %v3493_v42  ;;  %2034 = vmatpush.bf16.msra.mxu1 %v3481_v6  ;;  %v3703_v6 = vld [vmem:[#allocation3 + $0xf0] sm:$0xf0] }
 0x2ea   :  { %2047 = vmatpush.bf16.msra.mxu2 %v3485_v31  ;;  %v3709_v31 = vld [vmem:[#allocation3 + $0xe8] sm:$0xf]  ;;  %v3706_v10 = vor.u32 %v4103_v5, %v3703_v6 }
 0x2eb   :  { %2059 = vmatpush.bf16.msra.mxu3 %v3505_v56  ;;  %v3645_v5 = vld [vmem:[#allocation3 + $0x68] sm:$0xf] }
 0x2ed   :  { %2021 = vmatpush.bf16.msra.mxu0 %v3477_v15  ;;  %2035 = vmatpush.bf16.msra.mxu1 %v3465_v7  ;;  %v3687_v7 = vld [vmem:[#allocation3 + $0xd0] sm:$0xf0] }
 0x2ee   :  { %2048 = vmatpush.bf16.msra.mxu2 %v3469_v14  ;;  %v3693_v14 = vld [vmem:[#allocation3 + $0xc8] sm:$0xf]  ;;  %v3690_v20 = vor.u32 %v4099_v45, %v3687_v7 }
 0x2ef   :  { %2060 = vmatpush.bf16.msra.mxu3 %v3489_v61  ;;  %v3710_v61 = vor.u32 %v4106_v33, %v3709_v31  ;;  %v4088_v33 = vld [vmem:[#allocation3 + $0x6c] sm:$0xf]  ;;  %v3629_v45 = vld [vmem:[#allocation3 + $0x48] sm:$0xf] }
 0x2f1   :  { %2022 = vmatpush.bf16.msra.mxu0 %v3461_v22  ;;  %2304 = vmatpush.bf16.msrb.mxu1 %v3706_v10  ;;  %v3685_v22 = vld [vmem:[#allocation3 + $0xc0] sm:$0xf]  ;;  %v3647_v10 = vld [vmem:[#allocation3 + $0x78] sm:$0xf0] }
 0x2f2   :  { %2317 = vmatpush.bf16.msrb.mxu2 %v3710_v61  ;;  %v3686_v2 = vor.u32 %v4101_v38, %v3685_v22  ;;  %v3650_v61 = vor.u32 %v4088_v33, %v3647_v10  ;;  %v3622_v22 = vor.u32 %v4085_v23, %v3621_v19  ;;  %v3623_v38 = vld [vmem:[#allocation3 + $0x50] sm:$0xf0] }
 0x2f3   :  { %2061 = vmatpush.bf16.msra.mxu3 %v3473_v27  ;;  %v3694_v27 = vor.u32 %v4102_v40, %v3693_v14  ;;  %v4084_v40 = vld [vmem:[#allocation3 + $0x4c] sm:$0xf] }
 0x2f5   :  { %2305 = vmatpush.bf16.msrb.mxu1 %v3690_v20  ;;  %v3631_v20 = vld [vmem:[#allocation3 + $0x58] sm:$0xf0] }
 0x2f6   :  { %2318 = vmatpush.bf16.msrb.mxu2 %v3694_v27  ;;  %v3634_v27 = vor.u32 %v4084_v40, %v3631_v20 }
 0x2f7   :  { %2330 = vmatpush.bf16.msrb.mxu3 %v3714_v25  ;;  %v4083_v25 = vld [vmem:[#allocation3 + $0x44] sm:$0xf] }
 0x2f8   :  { %v3626_v7 = vor.u32 %v4083_v25, %v3623_v38 }
 0x35c   :  { %v1748_v30 = vpop.f32.mrf.mxu0  ;;  %v1761_v21 = vpop.f32.mrf.mxu1 }
 0x35d   :  { %v1791_v26 = vadd.f32 %v1748_v30, %v4376_v46  ;;  %v1792_v32 = vadd.f32 %v1761_v21, %v4379_v52  ;;  %v4100_v30 = vld [vmem:[#allocation3 + $0xcc] sm:$0xf]  ;;  %v3695_v21 = vld [vmem:[#allocation3 + $0xd8] sm:$0xf0] }
 0x35f   :  { %v1795_v34 = vmul.f32 0.5, %v1791_v26  ;;  %v1799_v0 = vmul.f32 0.5, %v1792_v32  ;;  %v3698_v26 = vor.u32 %v4100_v30, %v3695_v21  ;;  %v3669_v32 = vld [vmem:[#allocation3 + $0xa0] sm:$0xf]  ;;  %v4081_v21 = vld [vmem:[#allocation3 + $0x2c] sm:$0xf0] }
 0x360   :  { %v3605_v30 = vld [vmem:[#allocation3 + $0x20] sm:$0xf] }
 0x361   :  { %4182 = vtanh.f32 %v1795_v34  ;;  %v4097_v34 = vld [vmem:[#allocation3 + $0xac] sm:$0xf0]  ;;  %2331 = vmatpush.bf16.msrb.mxu3 %v3698_v26  ;;  %v4079_v26 = vld [vmem:[#allocation3 + $0x24] sm:$0xf] }
 0x362   :  { %4184 = vtanh.f32 %v1799_v0  ;;  %v4095_v0 = vld [vmem:[#allocation3 + $0xa4] sm:$0xf] }
 0x363   :  { %v1774_v35 = vpop.f32.mrf.mxu2  ;;  %v1787_v9 = vpop.f32.mrf.mxu3 }
 0x364   :  { %v1793_v16 = vadd.f32 %v1774_v35, %v4382_v12  ;;  %v1794_v36 = vadd.f32 %v1787_v9, %v4385_v28  ;;  %v1750_v37 = vpop.f32.mrf.mxu0  ;;  %v1763_v11 = vpop.f32.mrf.mxu1  ;;  %v3670_v35 = vor.u32 %v4097_v34, %v3669_v32  ;;  %v3671_v9 = vld [vmem:[#allocation3 + $0xb0] sm:$0xf0]  ;;  %v3606_v32 = vor.u32 %v4081_v21, %v3605_v30  ;;  %v4137_v30 = vld [vmem:[#allocation3 + $0xec] sm:$0xf0]  ;;  %v4135_v21 = vld [vmem:[#allocation3 + $0xe4] sm:$0xf] }
 0x365   :  { %v3674_v37 = vor.u32 %v4095_v0, %v3671_v9  ;;  %v3607_v34 = vld [vmem:[#allocation3 + $0x30] sm:$0xf0]  ;;  %v3613_v0 = vld [vmem:[#allocation3 + $0x28] sm:$0xf] }
 0x366   :  { %4186 = vtanh.f32 %v1793_v16  ;;  %v1804_v17 = vmul.f32 0.5, %v1794_v36  ;;  %v3677_v16 = vld [vmem:[#allocation3 + $0xa8] sm:$0xf]  ;;  %v4098_v36 = vld [vmem:[#allocation3 + $0xb4] sm:$0xf0]  ;;  %v3610_v9 = vor.u32 %v4079_v26, %v3607_v34 }
 0x367   :  { %v4183_v41 = vpop.eup %4182  ;;  %v3678_v11 = vor.u32 %v4098_v36, %v3677_v16  ;;  %2306 = vmatpush.bf16.msrb.mxu1 %v3674_v37  ;;  %v4080_v36 = vld [vmem:[#allocation3 + $0x2c] sm:$0xf]  ;;  %v3615_v37 = vld [vmem:[#allocation3 + $0x38] sm:$0xf0]  ;;  %v3838_v34 = vld [vmem:[#allocation3 + $0xe8] sm:$0xf] }
 0x368   :  { %v4185_v42 = vpop.eup %4184  ;;  %v1797_v43 = vadd.f32 1.0, %v4183_v41  ;;  %4188 = vtanh.f32 %v1804_v17  ;;  %v4096_v17 = vld [vmem:[#allocation3 + $0xac] sm:$0xf]  ;;  %v3679_v41 = vld [vmem:[#allocation3 + $0xb8] sm:$0xf0] }
 0x369   :  { %v1801_v46 = vadd.f32 1.0, %v4185_v42  ;;  %v3682_v42 = vor.u32 %v4096_v17, %v3679_v41  ;;  %2319 = vmatpush.bf16.msrb.mxu2 %v3678_v11  ;;  %v3618_v11 = vor.u32 %v4080_v36, %v3615_v37  ;;  %v3589_v17 = vld [vmem:[#allocation3] sm:$0xf]  ;;  %v4077_v41 = vld [vmem:[#allocation3 + $0xc] sm:$0xf0] }
 0x36a   :  { %v1798_v52 = vmul.f32 0.5, %v1797_v43  ;;  %v3653_v43 = vld [vmem:[#allocation3 + $0x80] sm:$0xf]  ;;  %v3840_v36 = vld [vmem:[#allocation3 + $0xf8] sm:$0xf0] }
 0x36b   :  { %v1802_v44 = vmul.f32 0.5, %v1801_v46  ;;  %v1776_v47 = vpop.f32.mrf.mxu2  ;;  %v1789_v48 = vpop.f32.mrf.mxu3  ;;  %v4093_v46 = vld [vmem:[#allocation3 + $0x8c] sm:$0xf0]  ;;  %2332 = vmatpush.bf16.msrb.mxu3 %v3682_v42  ;;  %v4075_v42 = vld [vmem:[#allocation3 + $0x4] sm:$0xf] }
 0x36c   :  { %v4187_v49 = vpop.eup %4186  ;;  %v3655_v47 = vld [vmem:[#allocation3 + $0x90] sm:$0xf0]  ;;  %v3661_v48 = vld [vmem:[#allocation3 + $0x88] sm:$0xf] }
 0x36d   :  { %v1808_v51 = vmul.f32 %v1802_v44, %v4464_v1  ;;  %v1809_v53 = vmul.f32 %v4187_v49, %v1798_v52  ;;  %v3701_v1 = vld [vmem:[#allocation3 + $0xe0] sm:$0xf]  ;;  %v4091_v52 = vld [vmem:[#allocation3 + $0x84] sm:$0xf]  ;;  %v3654_v44 = vor.u32 %v4093_v46, %v3653_v43  ;;  %v4094_v49 = vld [vmem:[#allocation3 + $0x94] sm:$0xf0]  ;;  %v3590_v43 = vor.u32 %v4077_v41, %v3589_v17 }
 0x36e   :  { %v4189_v12 = vpop.eup %4188  ;;  %v3702_v8 = vor.u32 %v4105_v59, %v3701_v1  ;;  %v3639_v59 = vld [vmem:[#allocation3 + $0x70] sm:$0xf0]  ;;  %v4133_v17 = vld [vmem:[#allocation3 + $0xcc] sm:$0xf0]  ;;  %v4131_v41 = vld [vmem:[#allocation3 + $0xc4] sm:$0xf] }
 0x36f   :  { %v4475_v56 = vadd.f32 %v1809_v53, %v1808_v51  ;;  %v1806_v28 = vadd.f32 1.0, %v4189_v12  ;;  %v3658_v51 = vor.u32 %v4091_v52, %v3655_v47  ;;  %v3662_v53 = vor.u32 %v4094_v49, %v3661_v48  ;;  %v4092_v12 = vld [vmem:[#allocation3 + $0x8c] sm:$0xf]  ;;  %v3591_v46 = vld [vmem:[#allocation3 + $0x10] sm:$0xf0] }
 0x370   :  { %2291 = vmatpush.bf16.msrb.mxu0 %v3702_v8  ;;  %v4090_v8 = vld [vmem:[#allocation3 + $0x74] sm:$0xf0]  ;;  %v3597_v52 = vld [vmem:[#allocation3 + $0x8] sm:$0xf]  ;;  %v3594_v47 = vor.u32 %v4075_v42, %v3591_v46  ;;  %v4076_v49 = vld [vmem:[#allocation3 + $0xc] sm:$0xf] }
 0x371   :  { %4190 = vtanh.f32 %v4475_v56  ;;  %v1807_v57 = vmul.f32 0.5, %v1806_v28  ;;  %v3663_v28 = vld [vmem:[#allocation3 + $0x98] sm:$0xf0]  ;;  %2307 = vmatpush.bf16.msrb.mxu1 %v3658_v51  ;;  %2320 = vmatpush.bf16.msrb.mxu2 %v3662_v53  ;;  %v3646_v31 = vor.u32 %v4090_v8, %v3645_v5  ;;  %v3822_v46 = vld [vmem:[#allocation3 + $0xc8] sm:$0xf] }
 0x372   :  { %v3599_v51 = vld [vmem:[#allocation3 + $0x18] sm:$0xf0] }
 0x373   :  { %v3602_v53 = vor.u32 %v4076_v49, %v3599_v51  ;;  %v3824_v49 = vld [vmem:[#allocation3 + $0xd8] sm:$0xf0] }
 0x374   :  { %2292 = vmatpush.bf16.msrb.mxu0 %v3686_v2  ;;  %v4086_v2 = vld [vmem:[#allocation3 + $0x54] sm:$0xf0] }
 0x375   :  { %2321 = vmatpush.bf16.msrb.mxu2 %v3646_v31  ;;  %v3630_v14 = vor.u32 %v4086_v2, %v3629_v45 }
 0x377   :  { %v4191_v58 = vpop.eup %4190 }
 0x378   :  { %v1812_v13 = vmul.f32 %v4191_v58, %v1807_v57  ;;  %2293 = vmatpush.bf16.msrb.mxu0 %v3670_v35  ;;  %v3666_v57 = vor.u32 %v4092_v12, %v3663_v28  ;;  %v3637_v58 = vld [vmem:[#allocation3 + $0x60] sm:$0xf]  ;;  %v4082_v35 = vld [vmem:[#allocation3 + $0x34] sm:$0xf0] }
 0x379   :  { %2322 = vmatpush.bf16.msrb.mxu2 %v3630_v14  ;;  %v3614_v16 = vor.u32 %v4082_v35, %v3613_v0  ;;  %v4138_v0 = vld [vmem:[#allocation3 + $0xf4] sm:$0xf0] }
 0x37a   :  { %v1813_v15 = vpack.c.bf16 %v1812_v13, %v1812_v13  ;;  %v4089_v13 = vld [vmem:[#allocation3 + $0x6c] sm:$0xf0]  ;;  %2333 = vmatpush.bf16.msrb.mxu3 %v3666_v57 }
 0x37b   :  { %v3638_v1 = vor.u32 %v4089_v13, %v3637_v58 }
 0x37c   :  { %3457 = vst [vmem:[%s4510_s4 + $0x10] sm:$0xf] %v1813_v15  ;;  %2023 = vmatmul.bf16.vlgmr.msra.gmra.mxu0 %v1813_v15  ;;  %2036 = vmatmul.bf16.vlgmr.msra.gmra.mxu1 %v1813_v15 }
 0x37d   :  { %2049 = vmatmul.bf16.vlgmr.msra.gmra.mxu2 %v1813_v15  ;;  %2062 = vmatmul.bf16.vlgmr.msra.gmra.mxu3 %v1813_v15  ;;  %v4087_v15 = vld [vmem:[#allocation3 + $0x64] sm:$0xf] }
 0x37e   :  { %2294 = vmatpush.bf16.msrb.mxu0 %v3654_v44  ;;  %v3642_v6 = vor.u32 %v4087_v15, %v3639_v59  ;;  %2334 = vmatpush.bf16.msrb.mxu3 %v3650_v61  ;;  %v4078_v44 = vld [vmem:[#allocation3 + $0x14] sm:$0xf0] }
 0x37f   :  { %2323 = vmatpush.bf16.msrb.mxu2 %v3614_v16  ;;  %v3598_v48 = vor.u32 %v4078_v44, %v3597_v52  ;;  %v4136_v16 = vld [vmem:[#allocation3 + $0xec] sm:$0xf]  ;;  %v4134_v52 = vld [vmem:[#allocation3 + $0xd4] sm:$0xf0] }
 0x380   :  { %2308 = vmatpush.bf16.msrb.mxu1 %v3642_v6  ;;  %v3843_v37 = vor.u32 %v4136_v16, %v3840_v36  ;;  %v3752_v16 = vld [vmem:[#allocation3 + $0x50] sm:$0xf0]  ;;  %v3758_v36 = vld [vmem:[#allocation3 + $0x48] sm:$0xf] }
 0x382   :  { %2295 = vmatpush.bf16.msrb.mxu0 %v3638_v1  ;;  %2335 = vmatpush.bf16.msrb.mxu3 %v3634_v27 }
 0x383   :  { %2324 = vmatpush.bf16.msrb.mxu2 %v3598_v48  ;;  %v4132_v48 = vld [vmem:[#allocation3 + $0xcc] sm:$0xf] }
 0x384   :  { %2309 = vmatpush.bf16.msrb.mxu1 %v3626_v7  ;;  %v3827_v51 = vor.u32 %v4132_v48, %v3824_v49  ;;  %v3736_v48 = vld [vmem:[#allocation3 + $0x30] sm:$0xf0]  ;;  %v3742_v49 = vld [vmem:[#allocation3 + $0x28] sm:$0xf] }
 0x386   :  { %2296 = vmatpush.bf16.msrb.mxu0 %v3622_v22  ;;  %2336 = vmatpush.bf16.msrb.mxu3 %v3618_v11  ;;  %v3814_v11 = vld [vmem:[#allocation3 + $0xc0] sm:$0xf] }
 0x387   :  { %v3815_v42 = vor.u32 %v4133_v17, %v3814_v11 }
 0x388   :  { %2310 = vmatpush.bf16.msrb.mxu1 %v3610_v9  ;;  %v3839_v9 = vor.u32 %v4138_v0, %v3838_v34  ;;  %v3750_v34 = vld [vmem:[#allocation3 + $0x40] sm:$0xf]  ;;  %v4117_v0 = vld [vmem:[#allocation3 + $0x4c] sm:$0xf0] }
 0x38a   :  { %2297 = vmatpush.bf16.msrb.mxu0 %v3606_v32  ;;  %2337 = vmatpush.bf16.msrb.mxu3 %v3602_v53  ;;  %v3832_v32 = vld [vmem:[#allocation3 + $0xf0] sm:$0xf0]  ;;  %v3798_v53 = vld [vmem:[#allocation3 + $0xa0] sm:$0xf] }
 0x38b   :  { %v3835_v35 = vor.u32 %v4135_v21, %v3832_v32  ;;  %2593 = vmatpush.bf16.msra.mxu2 %v3839_v9  ;;  %v4120_v21 = vld [vmem:[#allocation3 + $0x6c] sm:$0xf]  ;;  %v3751_v9 = vor.u32 %v4117_v0, %v3750_v34 }
 0x38c   :  { %2311 = vmatpush.bf16.msrb.mxu1 %v3594_v47  ;;  %v3823_v47 = vor.u32 %v4134_v52, %v3822_v46  ;;  %v3734_v46 = vld [vmem:[#allocation3 + $0x20] sm:$0xf]  ;;  %v4113_v52 = vld [vmem:[#allocation3 + $0x2c] sm:$0xf0] }
 0x38e   :  { %2298 = vmatpush.bf16.msrb.mxu0 %v3590_v43  ;;  %2606 = vmatpush.bf16.msra.mxu3 %v3843_v37  ;;  %v3816_v43 = vld [vmem:[#allocation3 + $0xd0] sm:$0xf0]  ;;  %v4118_v37 = vld [vmem:[#allocation3 + $0x54] sm:$0xf0] }
 0x38f   :  { %v3819_v44 = vor.u32 %v4131_v41, %v3816_v43  ;;  %2594 = vmatpush.bf16.msra.mxu2 %v3823_v47  ;;  %v3759_v17 = vor.u32 %v4118_v37, %v3758_v36  ;;  %v4116_v41 = vld [vmem:[#allocation3 + $0x4c] sm:$0xf]  ;;  %v3735_v47 = vor.u32 %v4113_v52, %v3734_v46 }
 0x390   :  { %2580 = vmatpush.bf16.msra.mxu1 %v3835_v35  ;;  %v4115_v35 = vld [vmem:[#allocation3 + $0x44] sm:$0xf] }
 0x391   :  { %v3755_v11 = vor.u32 %v4115_v35, %v3752_v16 }
 0x392   :  { %2607 = vmatpush.bf16.msra.mxu3 %v3827_v51  ;;  %v4114_v51 = vld [vmem:[#allocation3 + $0x34] sm:$0xf0] }
 0x394   :  { %2581 = vmatpush.bf16.msra.mxu1 %v3819_v44  ;;  %v4111_v44 = vld [vmem:[#allocation3 + $0x24] sm:$0xf] }
 0x3f9   :  { %v2024_v12 = vpop.f32.mrf.mxu0  ;;  %v2037_v28 = vpop.f32.mrf.mxu1 }
 0x3fa   :  { %v2067_v57 = vadd.f32 %v2024_v12, %v4388_v29  ;;  %v2068_v58 = vadd.f32 %v2037_v28, %v4391_v39  ;;  %v4129_v12 = vld [vmem:[#allocation3 + $0xac] sm:$0xf0]  ;;  %v4127_v28 = vld [vmem:[#allocation3 + $0xa4] sm:$0xf] }
 0x3fc   :  { %v2071_v13 = vmul.f32 0.5, %v2067_v57  ;;  %v2075_v15 = vmul.f32 0.5, %v2068_v58  ;;  %v3799_v57 = vor.u32 %v4129_v12, %v3798_v53  ;;  %v3800_v58 = vld [vmem:[#allocation3 + $0xb0] sm:$0xf0]  ;;  %v3739_v53 = vor.u32 %v4111_v44, %v3736_v48 }
 0x3fd   :  { %v3743_v12 = vor.u32 %v4114_v51, %v3742_v49 }
 0x3fe   :  { %4192 = vtanh.f32 %v2071_v13  ;;  %v3806_v13 = vld [vmem:[#allocation3 + $0xa8] sm:$0xf] }
 0x3ff   :  { %4194 = vtanh.f32 %v2075_v15  ;;  %v4130_v15 = vld [vmem:[#allocation3 + $0xb4] sm:$0xf0] }
 0x400   :  { %v2050_v1 = vpop.f32.mrf.mxu2  ;;  %v2063_v59 = vpop.f32.mrf.mxu3 }
 0x401   :  { %v2069_v5 = vadd.f32 %v2050_v1, %v4394_v60  ;;  %v2070_v8 = vadd.f32 %v2063_v59, %v4397_v3  ;;  %v2026_v6 = vpop.f32.mrf.mxu0  ;;  %v2039_v31 = vpop.f32.mrf.mxu1  ;;  %v3803_v1 = vor.u32 %v4127_v28, %v3800_v58  ;;  %v3807_v59 = vor.u32 %v4130_v15, %v3806_v13  ;;  %v4112_v28 = vld [vmem:[#allocation3 + $0x2c] sm:$0xf]  ;;  %v3718_v13 = vld [vmem:[#allocation3] sm:$0xf]  ;;  %v4109_v15 = vld [vmem:[#allocation3 + $0xc] sm:$0xf0] }
 0x402   :  { %v3782_v31 = vld [vmem:[#allocation3 + $0x80] sm:$0xf] }
 0x403   :  { %4196 = vtanh.f32 %v2069_v5  ;;  %v2080_v33 = vmul.f32 0.5, %v2070_v8  ;;  %v4128_v5 = vld [vmem:[#allocation3 + $0xac] sm:$0xf]  ;;  %v3808_v8 = vld [vmem:[#allocation3 + $0xb8] sm:$0xf0]  ;;  %2582 = vmatpush.bf16.msra.mxu1 %v3803_v1  ;;  %2595 = vmatpush.bf16.msra.mxu2 %v3807_v59  ;;  %v3719_v59 = vor.u32 %v4109_v15, %v3718_v13 }
 0x404   :  { %v4193_v10 = vpop.eup %4192  ;;  %v3811_v6 = vor.u32 %v4128_v5, %v3808_v8  ;;  %v4107_v1 = vld [vmem:[#allocation3 + $0x4] sm:$0xf]  ;;  %v3720_v5 = vld [vmem:[#allocation3 + $0x10] sm:$0xf0]  ;;  %v3726_v8 = vld [vmem:[#allocation3 + $0x8] sm:$0xf] }
 0x405   :  { %v4195_v61 = vpop.eup %4194  ;;  %v2073_v19 = vadd.f32 1.0, %v4193_v10  ;;  %4198 = vtanh.f32 %v2080_v33  ;;  %v4125_v33 = vld [vmem:[#allocation3 + $0x8c] sm:$0xf0]  ;;  %v4123_v10 = vld [vmem:[#allocation3 + $0x84] sm:$0xf] }
 0x406   :  { %v2077_v29 = vadd.f32 1.0, %v4195_v61  ;;  %2608 = vmatpush.bf16.msra.mxu3 %v3811_v6  ;;  %v3783_v61 = vor.u32 %v4125_v33, %v3782_v31  ;;  %v4110_v6 = vld [vmem:[#allocation3 + $0x14] sm:$0xf0]  ;;  %v3723_v31 = vor.u32 %v4107_v1, %v3720_v5 }
 0x407   :  { %v2074_v39 = vmul.f32 0.5, %v2073_v19  ;;  %v3784_v19 = vld [vmem:[#allocation3 + $0x90] sm:$0xf0]  ;;  %v3727_v33 = vor.u32 %v4110_v6, %v3726_v8 }
 0x408   :  { %v2078_v23 = vmul.f32 0.5, %v2077_v29  ;;  %v2052_v25 = vpop.f32.mrf.mxu2  ;;  %v2065_v22 = vpop.f32.mrf.mxu3  ;;  %v3790_v29 = vld [vmem:[#allocation3 + $0x88] sm:$0xf] }
 0x409   :  { %v4197_v38 = vpop.eup %4196  ;;  %v4124_v22 = vld [vmem:[#allocation3 + $0x8c] sm:$0xf] }
 0x40a   :  { %v2084_v45 = vmul.f32 %v2078_v23, %v4475_v56  ;;  %v2085_v2 = vmul.f32 %v4197_v38, %v2074_v39  ;;  %v3830_v56 = vld [vmem:[#allocation3 + $0xe0] sm:$0xf]  ;;  %v4126_v39 = vld [vmem:[#allocation3 + $0x94] sm:$0xf0]  ;;  %v3787_v23 = vor.u32 %v4123_v10, %v3784_v19  ;;  %v3792_v38 = vld [vmem:[#allocation3 + $0x98] sm:$0xf0] }
 0x40b   :  { %v4199_v60 = vpop.eup %4198  ;;  %v3831_v26 = vor.u32 %v4137_v30, %v3830_v56  ;;  %v3791_v25 = vor.u32 %v4126_v39, %v3790_v29  ;;  %v4108_v10 = vld [vmem:[#allocation3 + $0xc] sm:$0xf] }
 0x40c   :  { %v4486_v7 = vadd.f32 %v2085_v2, %v2084_v45  ;;  %v2082_v3 = vadd.f32 1.0, %v4199_v60  ;;  %v3795_v45 = vor.u32 %v4124_v22, %v3792_v38  ;;  %2583 = vmatpush.bf16.msra.mxu1 %v3787_v23  ;;  %v3766_v2 = vld [vmem:[#allocation3 + $0x60] sm:$0xf]  ;;  %v4121_v60 = vld [vmem:[#allocation3 + $0x6c] sm:$0xf0] }
 0x40d   :  { %2567 = vmatpush.bf16.msra.mxu0 %v3831_v26  ;;  %2596 = vmatpush.bf16.msra.mxu2 %v3791_v25  ;;  %v3776_v26 = vld [vmem:[#allocation3 + $0x78] sm:$0xf0] }
 0x40e   :  { %4200 = vtanh.f32 %v4486_v7  ;;  %v2083_v14 = vmul.f32 0.5, %v2082_v3  ;;  %v4119_v3 = vld [vmem:[#allocation3 + $0x64] sm:$0xf]  ;;  %2609 = vmatpush.bf16.msra.mxu3 %v3795_v45  ;;  %v3779_v32 = vor.u32 %v4120_v21, %v3776_v26 }
 0x411   :  { %2568 = vmatpush.bf16.msra.mxu0 %v3815_v42  ;;  %v3760_v42 = vld [vmem:[#allocation3 + $0x58] sm:$0xf0] }
 0x412   :  { %2610 = vmatpush.bf16.msra.mxu3 %v3779_v32  ;;  %v3763_v43 = vor.u32 %v4116_v41, %v3760_v42 }
 0x414   :  { %v4201_v40 = vpop.eup %4200 }
 0x415   :  { %v2088_v20 = vmul.f32 %v4201_v40, %v2083_v14  ;;  %2569 = vmatpush.bf16.msra.mxu0 %v3799_v57  ;;  %v3767_v14 = vor.u32 %v4121_v60, %v3766_v2  ;;  %v3768_v40 = vld [vmem:[#allocation3 + $0x70] sm:$0xf0]  ;;  %v3744_v57 = vld [vmem:[#allocation3 + $0x38] sm:$0xf0] }
 0x416   :  { %v3771_v56 = vor.u32 %v4119_v3, %v3768_v40  ;;  %2611 = vmatpush.bf16.msra.mxu3 %v3763_v43  ;;  %v3747_v58 = vor.u32 %v4112_v28, %v3744_v57 }
 0x417   :  { %v2089_v27 = vpack.c.bf16 %v2088_v20, %v2088_v20  ;;  %v3774_v20 = vld [vmem:[#allocation3 + $0x68] sm:$0xf] }
 0x418   :  { %2584 = vmatpush.bf16.msra.mxu1 %v3771_v56 }
 0x419   :  { %3586 = vst [vmem:[%s4510_s4 + $0x14] sm:$0xf] %v2089_v27  ;;  %2299 = vmatmul.bf16.vlgmr.msrb.gmra.mxu0 %v2089_v27  ;;  %2312 = vmatmul.bf16.vlgmr.msrb.gmra.mxu1 %v2089_v27 }
 0x41a   :  { %2325 = vmatmul.bf16.vlgmr.msrb.gmra.mxu2 %v2089_v27  ;;  %2338 = vmatmul.bf16.vlgmr.msrb.gmra.mxu3 %v2089_v27  ;;  %v4122_v27 = vld [vmem:[#allocation3 + $0x74] sm:$0xf0] }
 0x41b   :  { %2570 = vmatpush.bf16.msra.mxu0 %v3783_v61  ;;  %v3775_v30 = vor.u32 %v4122_v27, %v3774_v20  ;;  %2612 = vmatpush.bf16.msra.mxu3 %v3747_v58  ;;  %v3728_v61 = vld [vmem:[#allocation3 + $0x18] sm:$0xf0] }
 0x41c   :  { %2585 = vmatpush.bf16.msra.mxu1 %v3755_v11  ;;  %v3731_v19 = vor.u32 %v4108_v10, %v3728_v61 }
 0x41d   :  { %2597 = vmatpush.bf16.msra.mxu2 %v3775_v30 }
 0x41f   :  { %2571 = vmatpush.bf16.msra.mxu0 %v3767_v14  ;;  %2613 = vmatpush.bf16.msra.mxu3 %v3731_v19 }
 0x420   :  { %2586 = vmatpush.bf16.msra.mxu1 %v3739_v53 }
 0x421   :  { %2598 = vmatpush.bf16.msra.mxu2 %v3759_v17 }
 0x423   :  { %2572 = vmatpush.bf16.msra.mxu0 %v3751_v9 }
 0x424   :  { %2587 = vmatpush.bf16.msra.mxu1 %v3723_v31 }
 0x425   :  { %2599 = vmatpush.bf16.msra.mxu2 %v3743_v12 }
 0x427   :  { %2573 = vmatpush.bf16.msra.mxu0 %v3735_v47 }
 0x429   :  { %2600 = vmatpush.bf16.msra.mxu2 %v3727_v33 }
 0x42b   :  { %2574 = vmatpush.bf16.msra.mxu0 %v3719_v59 }
 0x496   :  { %v2300_v29 = vpop.f32.mrf.mxu0  ;;  %v2313_v39 = vpop.f32.mrf.mxu1 }
 0x497   :  { %v2343_v23 = vadd.f32 %v2300_v29, %v4400_v4  ;;  %v2344_v25 = vadd.f32 %v2313_v39, %v4403_v24 }
 0x499   :  { %v2347_v22 = vmul.f32 0.5, %v2343_v23  ;;  %v2351_v38 = vmul.f32 0.5, %v2344_v25 }
 0x49b   :  { %4202 = vtanh.f32 %v2347_v22 }
 0x49c   :  { %4204 = vtanh.f32 %v2351_v38 }
 0x49d   :  { %v2326_v45 = vpop.f32.mrf.mxu2  ;;  %v2339_v2 = vpop.f32.mrf.mxu3 }
 0x49e   :  { %v2345_v60 = vadd.f32 %v2326_v45, %v4406_v54  ;;  %v2346_v3 = vadd.f32 %v2339_v2, %v4409_v62  ;;  %v2302_v14 = vpop.f32.mrf.mxu0  ;;  %v2315_v40 = vpop.f32.mrf.mxu1 }
 0x4a0   :  { %4206 = vtanh.f32 %v2345_v60  ;;  %v2356_v20 = vmul.f32 0.5, %v2346_v3 }
 0x4a1   :  { %v4203_v27 = vpop.eup %4202 }
 0x4a2   :  { %v4205_v56 = vpop.eup %4204  ;;  %v2349_v30 = vadd.f32 1.0, %v4203_v27  ;;  %4208 = vtanh.f32 %v2356_v20 }
 0x4a3   :  { %v2353_v4 = vadd.f32 1.0, %v4205_v56 }
 0x4a4   :  { %v2350_v24 = vmul.f32 0.5, %v2349_v30 }
 0x4a5   :  { %v2354_v21 = vmul.f32 0.5, %v2353_v4  ;;  %v2328_v26 = vpop.f32.mrf.mxu2  ;;  %v2341_v32 = vpop.f32.mrf.mxu3 }
 0x4a6   :  { %v4207_v34 = vpop.eup %4206 }
 0x4a7   :  { %v2360_v0 = vmul.f32 %v2354_v21, %v4486_v7  ;;  %v2361_v35 = vmul.f32 %v4207_v34, %v2350_v24 }
 0x4a8   :  { %v4209_v54 = vpop.eup %4208 }
 0x4a9   :  { %v2362_v9 = vadd.f32 %v2361_v35, %v2360_v0  ;;  %v2358_v62 = vadd.f32 1.0, %v4209_v54 }
 0x4ab   :  { %4210 = vtanh.f32 %v2362_v9  ;;  %v2359_v16 = vmul.f32 0.5, %v2358_v62 }
 0x4b1   :  { %v4211_v36 = vpop.eup %4210 }
 0x4b2   :  { %v2364_v37 = vmul.f32 %v4211_v36, %v2359_v16 }
 0x4b4   :  { %v2365_v11 = vpack.c.bf16 %v2364_v37, %v2364_v37 }
 0x4b6   :  { %3715 = vst [vmem:[%s4510_s4 + $0x18] sm:$0xf] %v2365_v11  ;;  %2575 = vmatmul.bf16.vlgmr.msra.gmra.mxu0 %v2365_v11  ;;  %2588 = vmatmul.bf16.vlgmr.msra.gmra.mxu1 %v2365_v11 }
 0x4b7   :  { %2601 = vmatmul.bf16.vlgmr.msra.gmra.mxu2 %v2365_v11  ;;  %2614 = vmatmul.bf16.vlgmr.msra.gmra.mxu3 %v2365_v11 }
 0x533   :  { %v2576_v17 = vpop.f32.mrf.mxu0  ;;  %v2589_v41 = vpop.f32.mrf.mxu1 }
 0x534   :  { %v2619_v7 = vadd.f32 %v2576_v17, %v4412_v63  ;;  %v2620_v42 = vadd.f32 %v2589_v41, %v4415_v18 }
 0x536   :  { %v2623_v43 = vmul.f32 0.5, %v2619_v7  ;;  %v2627_v46 = vmul.f32 0.5, %v2620_v42 }
 0x538   :  { %4212 = vtanh.f32 %v2623_v43 }
 0x539   :  { %4214 = vtanh.f32 %v2627_v46 }
 0x53a   :  { %v2602_v52 = vpop.f32.mrf.mxu2  ;;  %v2615_v44 = vpop.f32.mrf.mxu3 }
 0x53b   :  { %v2621_v47 = vadd.f32 %v2602_v52, %v4422_v50  ;;  %v2622_v48 = vadd.f32 %v2615_v44, %v4425_v55  ;;  %v2578_v49 = vpop.f32.mrf.mxu0  ;;  %v2591_v51 = vpop.f32.mrf.mxu1 }
 0x53d   :  { %4216 = vtanh.f32 %v2621_v47  ;;  %v2632_v53 = vmul.f32 0.5, %v2622_v48 }
 0x53e   :  { %v4213_v12 = vpop.eup %4212 }
 0x53f   :  { %v4215_v28 = vpop.eup %4214  ;;  %v2625_v57 = vadd.f32 1.0, %v4213_v12  ;;  %4218 = vtanh.f32 %v2632_v53 }
 0x540   :  { %v2629_v63 = vadd.f32 1.0, %v4215_v28 }
 0x541   :  { %v2626_v18 = vmul.f32 0.5, %v2625_v57 }
 0x542   :  { %v2630_v58 = vmul.f32 0.5, %v2629_v63  ;;  %v2604_v13 = vpop.f32.mrf.mxu2  ;;  %v2617_v15 = vpop.f32.mrf.mxu3 }
 0x543   :  { %v4217_v1 = vpop.eup %4216 }
 0x544   :  { %v2636_v59 = vmul.f32 %v2630_v58, %v2362_v9  ;;  %v2637_v5 = vmul.f32 %v4217_v1, %v2626_v18 }
 0x545   :  { %v4219_v8 = vpop.eup %4218 }
 0x546   :  { %v2638_v50 = vadd.f32 %v2637_v5, %v2636_v59  ;;  %v2634_v55 = vadd.f32 1.0, %v4219_v8 }
 0x548   :  { %4220 = vtanh.f32 %v2638_v50  ;;  %v2635_v6 = vmul.f32 0.5, %v2634_v55 }
 0x54e   :  { %v4221_v31 = vpop.eup %4220 }
 0x54f   :  { %v2640_v33 = vmul.f32 %v4221_v31, %v2635_v6 }
 0x551   :  { %v2641_v10 = vpack.c.bf16 %v2640_v33, %v2640_v33 }
 0x553   :  { %3844 = vst [vmem:[%s4510_s4 + $0x1c] sm:$0xf] %v2641_v10 }
 0x554   :  { %2650 = vsyncmov [#allocation4] }
 0x557   :  { %s2651_s21 = vpop.sfrf %2650 }
 0x558   :  { %p3845_p0 = scmp.ne.s32.totalorder %s2651_s21, 0 }
 0x55a   :  { %2655 = shalt.err (%p3845_p0)  }
 0x55b   :  { %2657 = vsyncmov [#allocation4 + $0x1] }
 0x55e   :  { %s2658_s22 = vpop.sfrf %2657 }
 0x55f   :  { %p3846_p1 = scmp.ne.s32.totalorder %s2658_s22, 0 }
 0x561   :  { %2662 = shalt.err (%p3846_p1)  }

</bundles_post_ra>
